<compile_context>
chip_gen: v7x
topology: tpu7x:2x2x1
jax: 0.10.0
libtpu: 0.0.40
codegen_flags: <defaults>
</compile_context>

<pallas_src>
import jax
import jax.numpy as jnp
from jax import lax
from jax.experimental import pallas as pl
from jax.experimental.pallas import tpu as pltpu


# ----------------------------------------------------------------------------
# Fused kernel: 2-layer bidirectional GRU (PyTorch gate order r, z, n, h0 = 0)
#               + flatten(batch_first) + fc1/relu + fc2/relu + fc3 + softmax
#
#   x_ref            : (T, B, E)   time-major embedded input
#   wih*_ref         : (I, 3H)     input-hidden weights (pre-transposed; layer-1
#                                   split into fwd-feature / bwd-feature halves)
#   whh*_ref         : (H, 3H)     hidden-hidden weights (pre-transposed)
#   bih*/bhh*_ref    : (1, 3H)
#   w1f/w1b_ref      : (T, H, U)   fc1 weight re-laid per-timestep / per-direction
#   out_ref          : (B, C)      softmax probabilities
#   seqf/seqb_scr    : (T, B, H)   layer-0 per-direction outputs (VMEM scratch)
# ----------------------------------------------------------------------------
def fused_bigru_mlp_kernel(
    x_ref,
    wih0f_ref, whh0f_ref, bih0f_ref, bhh0f_ref,
    wih0b_ref, whh0b_ref, bih0b_ref, bhh0b_ref,
    wih1ff_ref, wih1fb_ref, whh1f_ref, bih1f_ref, bhh1f_ref,
    wih1bf_ref, wih1bb_ref, whh1b_ref, bih1b_ref, bhh1b_ref,
    w1f_ref, w1b_ref, b1_ref, w2_ref, b2_ref, w3_ref, b3_ref,
    out_ref,
    seqf_scr, seqb_scr,
):
    T, B, E = x_ref.shape
    H = whh0f_ref.shape[0]
    U = b1_ref.shape[1]
    f32 = jnp.float32

    def matmul(a, b):
        return jnp.dot(a, b, preferred_element_type=f32)

    def gru_gates(gi, gh, h_prev):
        # gi = x @ W_ih + b_ih ; gh = h @ W_hh + b_hh ; PyTorch gate order (r, z, n)
        r = jax.nn.sigmoid(gi[:, 0:H] + gh[:, 0:H])
        z = jax.nn.sigmoid(gi[:, H:2 * H] + gh[:, H:2 * H])
        n = jnp.tanh(gi[:, 2 * H:3 * H] + r * gh[:, 2 * H:3 * H])
        return (1.0 - z) * n + z * h_prev

    # ---- layer 0: hoisted input projections (one batched matmul per direction) ----
    x_flat = x_ref[...].reshape(T * B, E)
    gi0f = (matmul(x_flat, wih0f_ref[...]) + bih0f_ref[...]).reshape(T, B, 3 * H)
    gi0b = (matmul(x_flat, wih0b_ref[...]) + bih0b_ref[...]).reshape(T, B, 3 * H)

    # ---- layer 0 recurrence: fwd & bwd chains interleaved, fully unrolled ----
    h_f = jnp.zeros((B, H), f32)
    h_b = jnp.zeros((B, H), f32)
    for t in range(T):
        tb = T - 1 - t
        gh_f = matmul(h_f, whh0f_ref[...]) + bhh0f_ref[...]
        gh_b = matmul(h_b, whh0b_ref[...]) + bhh0b_ref[...]
        h_f = gru_gates(gi0f[t], gh_f, h_f)
        h_b = gru_gates(gi0b[tb], gh_b, h_b)
        seqf_scr[t] = h_f
        seqb_scr[tb] = h_b

    # ---- layer 1: hoisted input projections from layer-0 outputs (still in VMEM) ----
    s0f = seqf_scr[...].reshape(T * B, H)
    s0b = seqb_scr[...].reshape(T * B, H)
    gi1f = (matmul(s0f, wih1ff_ref[...]) + matmul(s0b, wih1fb_ref[...])
            + bih1f_ref[...]).reshape(T, B, 3 * H)
    gi1b = (matmul(s0f, wih1bf_ref[...]) + matmul(s0b, wih1bb_ref[...])
            + bih1b_ref[...]).reshape(T, B, 3 * H)

    # ---- layer 1 recurrence fused with the fc1 contraction ----
    # flatten(batch_first) of (B, T, 2H): position t*2H + j is fwd[t, j] for j < H
    # and bwd[t, j-H] otherwise, so fc1 = sum_t h_f(t) @ W1f[t] + h_b(t) @ W1b[t].
    h_f = jnp.zeros((B, H), f32)
    h_b = jnp.zeros((B, H), f32)
    h1 = jnp.zeros((B, U), f32)
    for t in range(T):
        tb = T - 1 - t
        gh_f = matmul(h_f, whh1f_ref[...]) + bhh1f_ref[...]
        gh_b = matmul(h_b, whh1b_ref[...]) + bhh1b_ref[...]
        h_f = gru_gates(gi1f[t], gh_f, h_f)
        h_b = gru_gates(gi1b[tb], gh_b, h_b)
        h1 = h1 + matmul(h_f, w1f_ref[t]) + matmul(h_b, w1b_ref[tb])

    # ---- MLP head ----
    h1 = jnp.maximum(h1 + b1_ref[...], 0.0)
    h2 = jnp.maximum(matmul(h1, w2_ref[...]) + b2_ref[...], 0.0)
    logits = matmul(h2, w3_ref[...]) + b3_ref[...]
    m = jnp.max(logits, axis=-1, keepdims=True)
    ex = jnp.exp(logits - m)
    denom = jnp.sum(ex, axis=-1, keepdims=True)
    out_ref[...] = ex * pl.reciprocal(denom, approx=False)


# ----------------------------------------------------------------------------
# One-time parameter preparation: transpose / reshape / split weights ONCE
# (nothing is re-laid-out on the steady-state forward path).
# ----------------------------------------------------------------------------
def prepare_params(params):
    f32 = jnp.float32

    def tr(w):
        return jnp.asarray(w, f32).T

    def rb(b):
        return jnp.asarray(b, f32).reshape(1, -1)

    assert "gru_l1_fwd" in params, "fused kernel is specialized to 2 GRU layers"

    wih0f, whh0f, bih0f, bhh0f = params["gru_l0_fwd"]
    wih0b, whh0b, bih0b, bhh0b = params["gru_l0_bwd"]
    wih1f, whh1f, bih1f, bhh1f = params["gru_l1_fwd"]
    wih1b, whh1b, bih1b, bhh1b = params["gru_l1_bwd"]

    H = whh0f.shape[1]                       # w_hh: (3H, H)
    U = params["fc1_w"].shape[0]
    T = params["fc1_w"].shape[1] // (2 * H)

    # layer-1 input weights: (3H, 2H) -> (2H, 3H), split into fwd / bwd halves
    wih1f_t = tr(wih1f)
    wih1b_t = tr(wih1b)

    # fc1: (U, T*2H) -> (T, 2H, U), split into per-direction per-timestep blocks
    w1_r = tr(params["fc1_w"]).reshape(T, 2 * H, U)

    args = (
        tr(wih0f), tr(whh0f), rb(bih0f), rb(bhh0f),
        tr(wih0b), tr(whh0b), rb(bih0b), rb(bhh0b),
        wih1f_t[:H], wih1f_t[H:], tr(whh1f), rb(bih1f), rb(bhh1f),
        wih1b_t[:H], wih1b_t[H:], tr(whh1b), rb(bih1b), rb(bhh1b),
        w1_r[:, :H, :], w1_r[:, H:, :], rb(params["fc1_b"]),
        tr(params["fc2_w"]), rb(params["fc2_b"]),
        tr(params["fc3_w"]), rb(params["fc3_b"]),
    )
    return {"emb": jnp.asarray(params["emb"], f32), "args": args}


# ----------------------------------------------------------------------------
# Forward pass: embedding gather + max_norm renorm (plain-JAX glue),
# then one fused Pallas kernel for GRU stack + MLP + softmax.
# ----------------------------------------------------------------------------
def forward(x_ids, prep):
    e = prep["emb"][x_ids]                                # (B, T, E)
    nrm = jnp.sqrt(jnp.sum(e * e, axis=-1, keepdims=True))
    e = e * jnp.where(nrm > 1.0, 1.0 / (nrm + 1e-7), 1.0)  # nn.Embedding(max_norm=1)
    x_tbe = jnp.transpose(e, (1, 0, 2)).astype(jnp.float32)  # (T, B, E) time-major

    T, B, _ = x_tbe.shape
    H = prep["args"][1].shape[0]      # whh0f (H, 3H)
    C = prep["args"][-1].shape[1]     # b3   (1, C)
    n_in = 1 + len(prep["args"])

    return pl.pallas_call(
        fused_bigru_mlp_kernel,
        out_shape=jax.ShapeDtypeStruct((B, C), jnp.float32),
        in_specs=[pl.BlockSpec(memory_space=pltpu.MemorySpace.VMEM)] * n_in,
        out_specs=pl.BlockSpec(memory_space=pltpu.MemorySpace.VMEM),
        scratch_shapes=[pltpu.VMEM((T, B, H), jnp.float32),
                        pltpu.VMEM((T, B, H), jnp.float32)],
    )(x_tbe, *prep["args"])


# ----------------------------------------------------------------------------
# Deterministic parameter construction (PyTorch layouts / shapes)
# ----------------------------------------------------------------------------
def make_params(key, vocab_size, seq_len, embed_dim, hidden, num_layers,
                units, num_classes, bidirectional=True):
    keys = iter(jax.random.split(key, 64))
    params = {}
    params["emb"] = jax.random.normal(next(keys), (vocab_size, embed_dim), jnp.float32)
    dirs = 2 if bidirectional else 1
    for l in range(num_layers):
        in_dim = embed_dim if l == 0 else hidden * dirs
        for _, name in zip(range(dirs), ("fwd", "bwd")):
            k = 1.0 / jnp.sqrt(hidden)
            w_ih = jax.random.uniform(next(keys), (3 * hidden, in_dim), jnp.float32, -k, k)
            w_hh = jax.random.uniform(next(keys), (3 * hidden, hidden), jnp.float32, -k, k)
            b_ih = jax.random.uniform(next(keys), (3 * hidden,), jnp.float32, -k, k)
            b_hh = jax.random.uniform(next(keys), (3 * hidden,), jnp.float32, -k, k)
            params[f"gru_l{l}_{name}"] = (w_ih, w_hh, b_ih, b_hh)
    rnn_out_dim = hidden * seq_len * dirs

    def lin(kw, kb, fan_in, fan_out):
        bound = 1.0 / jnp.sqrt(fan_in)
        w = jax.random.uniform(kw, (fan_out, fan_in), jnp.float32, -bound, bound)
        b = jax.random.uniform(kb, (fan_out,), jnp.float32, -bound, bound)
        return w, b

    params["fc1_w"], params["fc1_b"] = lin(next(keys), next(keys), rnn_out_dim, units)
    params["fc2_w"], params["fc2_b"] = lin(next(keys), next(keys), units, units)
    params["fc3_w"], params["fc3_b"] = lin(next(keys), next(keys), units, num_classes)
    return params


# ----------------------------------------------------------------------------
# Pure-JAX reference (mirrors the PyTorch module math) for numerical validation
# ----------------------------------------------------------------------------
def reference_forward(x_ids, params, num_layers=2):
    hp = lax.Precision.HIGHEST
    e = params["emb"][x_ids]
    nrm = jnp.sqrt(jnp.sum(e * e, axis=-1, keepdims=True))
    e = e * jnp.where(nrm > 1.0, 1.0 / (nrm + 1e-7), 1.0)
    seq = e                                     # (B, T, E), batch_first
    B, T, _ = seq.shape
    for l in range(num_layers):
        outs = []
        for name in ("fwd", "bwd"):
            w_ih, w_hh, b_ih, b_hh = params[f"gru_l{l}_{name}"]
            H = w_hh.shape[1]
            x_dir = seq[:, ::-1] if name == "bwd" else seq
            h = jnp.zeros((B, H), jnp.float32)
            hs = []
            for t in range(T):
                gi = jnp.dot(x_dir[:, t], w_ih.T, precision=hp) + b_ih
                gh = jnp.dot(h, w_hh.T, precision=hp) + b_hh
                r = jax.nn.sigmoid(gi[:, :H] + gh[:, :H])
                z = jax.nn.sigmoid(gi[:, H:2 * H] + gh[:, H:2 * H])
                n = jnp.tanh(gi[:, 2 * H:] + r * gh[:, 2 * H:])
                h = (1.0 - z) * n + z * h
                hs.append(h)
            out = jnp.stack(hs, axis=1)          # (B, T, H)
            if name == "bwd":
                out = out[:, ::-1]
            outs.append(out)
        seq = jnp.concatenate(outs, axis=-1)     # (B, T, 2H)
    flat = seq.reshape(B, -1)
    h = jax.nn.relu(jnp.dot(flat, params["fc1_w"].T, precision=hp) + params["fc1_b"])
    h = jax.nn.relu(jnp.dot(h, params["fc2_w"].T, precision=hp) + params["fc2_b"])
    logits = jnp.dot(h, params["fc3_w"].T, precision=hp) + params["fc3_b"]
    return jax.nn.softmax(logits, axis=-1)


if __name__ == "__main__":
    # Hyper-params matching RNN_Baseline_Model defaults (small shapes).
    VOCAB = 20
    B, T = 2, 8        # input_shape = (n_samples, max_sentence_length)
    EMBED = 5
    HIDDEN = 2         # rnn_hidden_out
    LAYERS = 2         # rnn_hidden_size (stacked GRU layers)
    UNITS = 50
    CLASSES = 3

    key = jax.random.PRNGKey(0)
    k_param, k_ids = jax.random.split(key)
    params = make_params(k_param, VOCAB, T, EMBED, HIDDEN, LAYERS, UNITS, CLASSES)
    prep = prepare_params(params)
    x_ids = jax.random.randint(k_ids, (B, T), 0, VOCAB, dtype=jnp.int32)

    fwd_fn = jax.jit(forward)
    out = jax.block_until_ready(fwd_fn(x_ids, prep))          # (B, CLASSES)
    ref = jax.block_until_ready(reference_forward(x_ids, params, LAYERS))

    assert out.shape == (B, CLASSES)
    assert bool(jnp.all(jnp.isfinite(out)))
    assert bool(jnp.allclose(jnp.sum(out, axis=-1), 1.0, atol=1e-5))
    assert bool(jnp.allclose(out, ref, atol=1e-2, rtol=1e-2))
    print("KERNEL_OK")
</pallas_src>

<mosaic_0001>
module attributes {stable_mosaic.version = 11 : i64} {
  func.func @fused_bigru_mlp_kernel(%arg0: memref<8x2x5xf32, #tpu.memory_space<vmem>>, %arg1: memref<5x6xf32, #tpu.memory_space<vmem>>, %arg2: memref<2x6xf32, #tpu.memory_space<vmem>>, %arg3: memref<1x6xf32, #tpu.memory_space<vmem>>, %arg4: memref<1x6xf32, #tpu.memory_space<vmem>>, %arg5: memref<5x6xf32, #tpu.memory_space<vmem>>, %arg6: memref<2x6xf32, #tpu.memory_space<vmem>>, %arg7: memref<1x6xf32, #tpu.memory_space<vmem>>, %arg8: memref<1x6xf32, #tpu.memory_space<vmem>>, %arg9: memref<2x6xf32, #tpu.memory_space<vmem>>, %arg10: memref<2x6xf32, #tpu.memory_space<vmem>>, %arg11: memref<2x6xf32, #tpu.memory_space<vmem>>, %arg12: memref<1x6xf32, #tpu.memory_space<vmem>>, %arg13: memref<1x6xf32, #tpu.memory_space<vmem>>, %arg14: memref<2x6xf32, #tpu.memory_space<vmem>>, %arg15: memref<2x6xf32, #tpu.memory_space<vmem>>, %arg16: memref<2x6xf32, #tpu.memory_space<vmem>>, %arg17: memref<1x6xf32, #tpu.memory_space<vmem>>, %arg18: memref<1x6xf32, #tpu.memory_space<vmem>>, %arg19: memref<8x2x50xf32, #tpu.memory_space<vmem>>, %arg20: memref<8x2x50xf32, #tpu.memory_space<vmem>>, %arg21: memref<1x50xf32, #tpu.memory_space<vmem>>, %arg22: memref<50x50xf32, #tpu.memory_space<vmem>>, %arg23: memref<1x50xf32, #tpu.memory_space<vmem>>, %arg24: memref<50x3xf32, #tpu.memory_space<vmem>>, %arg25: memref<1x3xf32, #tpu.memory_space<vmem>>, %arg26: memref<2x3xf32, #tpu.memory_space<vmem>>, %arg27: memref<8x2x2xf32, #tpu.memory_space<vmem>>, %arg28: memref<8x2x2xf32, #tpu.memory_space<vmem>>) attributes {dimension_semantics = [], scalar_prefetch = 0 : i64, scratch_operands = 2 : i64, tpu.core_type = #tpu.core_type<tc>} {
    %c0 = arith.constant 0 : index
    %c0_0 = arith.constant 0 : index
    %c0_1 = arith.constant 0 : index
    %0 = vector.load %arg0[%c0, %c0_0, %c0_1] : memref<8x2x5xf32, #tpu.memory_space<vmem>>, vector<8x2x5xf32>
    %1 = vector.shape_cast %0 : vector<8x2x5xf32> to vector<16x5xf32>
    %c0_2 = arith.constant 0 : index
    %c0_3 = arith.constant 0 : index
    %2 = vector.load %arg1[%c0_2, %c0_3] : memref<5x6xf32, #tpu.memory_space<vmem>>, vector<5x6xf32>
    %cst = arith.constant dense<0.000000e+00> : vector<16x6xf32>
    %3 = tpu.matmul %1, %2, %cst {dimension_numbers = #tpu.dot_dimension_numbers<[1], [0], [0], [1], [0, 0, 1, 1], [], []>} : vector<16x5xf32>, vector<5x6xf32>, vector<16x6xf32> -> vector<16x6xf32>
    %c0_4 = arith.constant 0 : index
    %c0_5 = arith.constant 0 : index
    %4 = vector.load %arg3[%c0_4, %c0_5] : memref<1x6xf32, #tpu.memory_space<vmem>>, vector<1x6xf32>
    %5 = vector.broadcast %4 : vector<1x6xf32> to vector<16x6xf32>
    %6 = arith.addf %3, %5 : vector<16x6xf32>
    %7 = vector.shape_cast %6 : vector<16x6xf32> to vector<8x2x6xf32>
    %c0_6 = arith.constant 0 : index
    %c0_7 = arith.constant 0 : index
    %8 = vector.load %arg5[%c0_6, %c0_7] : memref<5x6xf32, #tpu.memory_space<vmem>>, vector<5x6xf32>
    %cst_8 = arith.constant dense<0.000000e+00> : vector<16x6xf32>
    %9 = tpu.matmul %1, %8, %cst_8 {dimension_numbers = #tpu.dot_dimension_numbers<[1], [0], [0], [1], [0, 0, 1, 1], [], []>} : vector<16x5xf32>, vector<5x6xf32>, vector<16x6xf32> -> vector<16x6xf32>
    %c0_9 = arith.constant 0 : index
    %c0_10 = arith.constant 0 : index
    %10 = vector.load %arg7[%c0_9, %c0_10] : memref<1x6xf32, #tpu.memory_space<vmem>>, vector<1x6xf32>
    %11 = vector.broadcast %10 : vector<1x6xf32> to vector<16x6xf32>
    %12 = arith.addf %9, %11 : vector<16x6xf32>
    %13 = vector.shape_cast %12 : vector<16x6xf32> to vector<8x2x6xf32>
    %cst_11 = arith.constant 0.000000e+00 : f32
    %14 = vector.broadcast %cst_11 : f32 to vector<2x2xf32>
    %cst_12 = arith.constant 0.000000e+00 : f32
    %15 = vector.broadcast %cst_12 : f32 to vector<2x2xf32>
    %c0_13 = arith.constant 0 : index
    %c0_14 = arith.constant 0 : index
    %16 = vector.load %arg2[%c0_13, %c0_14] : memref<2x6xf32, #tpu.memory_space<vmem>>, vector<2x6xf32>
    %cst_15 = arith.constant dense<0.000000e+00> : vector<2x6xf32>
    %17 = tpu.matmul %14, %16, %cst_15 {dimension_numbers = #tpu.dot_dimension_numbers<[1], [0], [0], [1], [0, 0, 1, 1], [], []>} : vector<2x2xf32>, vector<2x6xf32>, vector<2x6xf32> -> vector<2x6xf32>
    %c0_16 = arith.constant 0 : index
    %c0_17 = arith.constant 0 : index
    %18 = vector.load %arg4[%c0_16, %c0_17] : memref<1x6xf32, #tpu.memory_space<vmem>>, vector<1x6xf32>
    %19 = vector.broadcast %18 : vector<1x6xf32> to vector<2x6xf32>
    %20 = arith.addf %17, %19 : vector<2x6xf32>
    %c0_18 = arith.constant 0 : index
    %c0_19 = arith.constant 0 : index
    %21 = vector.load %arg6[%c0_18, %c0_19] : memref<2x6xf32, #tpu.memory_space<vmem>>, vector<2x6xf32>
    %cst_20 = arith.constant dense<0.000000e+00> : vector<2x6xf32>
    %22 = tpu.matmul %15, %21, %cst_20 {dimension_numbers = #tpu.dot_dimension_numbers<[1], [0], [0], [1], [0, 0, 1, 1], [], []>} : vector<2x2xf32>, vector<2x6xf32>, vector<2x6xf32> -> vector<2x6xf32>
    %c0_21 = arith.constant 0 : index
    %c0_22 = arith.constant 0 : index
    %23 = vector.load %arg8[%c0_21, %c0_22] : memref<1x6xf32, #tpu.memory_space<vmem>>, vector<1x6xf32>
    %24 = vector.broadcast %23 : vector<1x6xf32> to vector<2x6xf32>
    %25 = arith.addf %22, %24 : vector<2x6xf32>
    %26 = vector.extract_strided_slice %7 {offsets = [0, 0, 0], sizes = [1, 2, 6], strides = [1, 1, 1]} : vector<8x2x6xf32> to vector<1x2x6xf32>
    %27 = vector.shape_cast %26 : vector<1x2x6xf32> to vector<2x6xf32>
    %28 = vector.extract_strided_slice %27 {offsets = [0, 0], sizes = [2, 2], strides = [1, 1]} : vector<2x6xf32> to vector<2x2xf32>
    %29 = vector.extract_strided_slice %20 {offsets = [0, 0], sizes = [2, 2], strides = [1, 1]} : vector<2x6xf32> to vector<2x2xf32>
    %30 = arith.addf %28, %29 : vector<2x2xf32>
    %31 = arith.negf %30 : vector<2x2xf32>
    %32 = math.exp %31 : vector<2x2xf32>
    %cst_23 = arith.constant 1.000000e+00 : f32
    %33 = vector.broadcast %cst_23 : f32 to vector<2x2xf32>
    %34 = arith.addf %33, %32 : vector<2x2xf32>
    %35 = arith.divf %33, %34 : vector<2x2xf32>
    %36 = vector.extract_strided_slice %27 {offsets = [0, 2], sizes = [2, 2], strides = [1, 1]} : vector<2x6xf32> to vector<2x2xf32>
    %37 = vector.extract_strided_slice %20 {offsets = [0, 2], sizes = [2, 2], strides = [1, 1]} : vector<2x6xf32> to vector<2x2xf32>
    %38 = arith.addf %36, %37 : vector<2x2xf32>
    %39 = arith.negf %38 : vector<2x2xf32>
    %40 = math.exp %39 : vector<2x2xf32>
    %cst_24 = arith.constant 1.000000e+00 : f32
    %41 = vector.broadcast %cst_24 : f32 to vector<2x2xf32>
    %42 = arith.addf %41, %40 : vector<2x2xf32>
    %43 = arith.divf %41, %42 : vector<2x2xf32>
    %44 = vector.extract_strided_slice %27 {offsets = [0, 4], sizes = [2, 2], strides = [1, 1]} : vector<2x6xf32> to vector<2x2xf32>
    %45 = vector.extract_strided_slice %20 {offsets = [0, 4], sizes = [2, 2], strides = [1, 1]} : vector<2x6xf32> to vector<2x2xf32>
    %46 = arith.mulf %35, %45 : vector<2x2xf32>
    %47 = arith.addf %44, %46 : vector<2x2xf32>
    %48 = math.tanh %47 : vector<2x2xf32>
    %cst_25 = arith.constant 1.000000e+00 : f32
    %49 = vector.broadcast %cst_25 : f32 to vector<2x2xf32>
    %50 = arith.subf %49, %43 : vector<2x2xf32>
    %51 = arith.mulf %50, %48 : vector<2x2xf32>
    %52 = arith.mulf %43, %14 : vector<2x2xf32>
    %53 = arith.addf %51, %52 : vector<2x2xf32>
    %54 = vector.extract_strided_slice %13 {offsets = [7, 0, 0], sizes = [1, 2, 6], strides = [1, 1, 1]} : vector<8x2x6xf32> to vector<1x2x6xf32>
    %55 = vector.shape_cast %54 : vector<1x2x6xf32> to vector<2x6xf32>
    %56 = vector.extract_strided_slice %55 {offsets = [0, 0], sizes = [2, 2], strides = [1, 1]} : vector<2x6xf32> to vector<2x2xf32>
    %57 = vector.extract_strided_slice %25 {offsets = [0, 0], sizes = [2, 2], strides = [1, 1]} : vector<2x6xf32> to vector<2x2xf32>
    %58 = arith.addf %56, %57 : vector<2x2xf32>
    %59 = arith.negf %58 : vector<2x2xf32>
    %60 = math.exp %59 : vector<2x2xf32>
    %cst_26 = arith.constant 1.000000e+00 : f32
    %61 = vector.broadcast %cst_26 : f32 to vector<2x2xf32>
    %62 = arith.addf %61, %60 : vector<2x2xf32>
    %63 = arith.divf %61, %62 : vector<2x2xf32>
    %64 = vector.extract_strided_slice %55 {offsets = [0, 2], sizes = [2, 2], strides = [1, 1]} : vector<2x6xf32> to vector<2x2xf32>
    %65 = vector.extract_strided_slice %25 {offsets = [0, 2], sizes = [2, 2], strides = [1, 1]} : vector<2x6xf32> to vector<2x2xf32>
    %66 = arith.addf %64, %65 : vector<2x2xf32>
    %67 = arith.negf %66 : vector<2x2xf32>
    %68 = math.exp %67 : vector<2x2xf32>
    %cst_27 = arith.constant 1.000000e+00 : f32
    %69 = vector.broadcast %cst_27 : f32 to vector<2x2xf32>
    %70 = arith.addf %69, %68 : vector<2x2xf32>
    %71 = arith.divf %69, %70 : vector<2x2xf32>
    %72 = vector.extract_strided_slice %55 {offsets = [0, 4], sizes = [2, 2], strides = [1, 1]} : vector<2x6xf32> to vector<2x2xf32>
    %73 = vector.extract_strided_slice %25 {offsets = [0, 4], sizes = [2, 2], strides = [1, 1]} : vector<2x6xf32> to vector<2x2xf32>
    %74 = arith.mulf %63, %73 : vector<2x2xf32>
    %75 = arith.addf %72, %74 : vector<2x2xf32>
    %76 = math.tanh %75 : vector<2x2xf32>
    %cst_28 = arith.constant 1.000000e+00 : f32
    %77 = vector.broadcast %cst_28 : f32 to vector<2x2xf32>
    %78 = arith.subf %77, %71 : vector<2x2xf32>
    %79 = arith.mulf %78, %76 : vector<2x2xf32>
    %80 = arith.mulf %71, %15 : vector<2x2xf32>
    %81 = arith.addf %79, %80 : vector<2x2xf32>
    %c0_29 = arith.constant 0 : index
    %c0_30 = arith.constant 0 : index
    %c0_31 = arith.constant 0 : index
    %82 = vector.load %arg27[%c0_29, %c0_30, %c0_31] : memref<8x2x2xf32, #tpu.memory_space<vmem>>, vector<1x2x2xf32>
    %83 = vector.shape_cast %82 : vector<1x2x2xf32> to vector<2x2xf32>
    %84 = vector.shape_cast %53 : vector<2x2xf32> to vector<1x2x2xf32>
    tpu.vector_store %arg27[%c0_29, %c0_30, %c0_31], %84 {strides = array<i32>} : memref<8x2x2xf32, #tpu.memory_space<vmem>>, vector<1x2x2xf32>,
    %c7 = arith.constant 7 : index
    %c0_32 = arith.constant 0 : index
    %c0_33 = arith.constant 0 : index
    %85 = vector.load %arg28[%c7, %c0_32, %c0_33] : memref<8x2x2xf32, #tpu.memory_space<vmem>>, vector<1x2x2xf32>
    %86 = vector.shape_cast %85 : vector<1x2x2xf32> to vector<2x2xf32>
    %87 = vector.shape_cast %81 : vector<2x2xf32> to vector<1x2x2xf32>
    tpu.vector_store %arg28[%c7, %c0_32, %c0_33], %87 {strides = array<i32>} : memref<8x2x2xf32, #tpu.memory_space<vmem>>, vector<1x2x2xf32>,
    %c0_34 = arith.constant 0 : index
    %c0_35 = arith.constant 0 : index
    %88 = vector.load %arg2[%c0_34, %c0_35] : memref<2x6xf32, #tpu.memory_space<vmem>>, vector<2x6xf32>
    %cst_36 = arith.constant dense<0.000000e+00> : vector<2x6xf32>
    %89 = tpu.matmul %53, %88, %cst_36 {dimension_numbers = #tpu.dot_dimension_numbers<[1], [0], [0], [1], [0, 0, 1, 1], [], []>} : vector<2x2xf32>, vector<2x6xf32>, vector<2x6xf32> -> vector<2x6xf32>
    %c0_37 = arith.constant 0 : index
    %c0_38 = arith.constant 0 : index
    %90 = vector.load %arg4[%c0_37, %c0_38] : memref<1x6xf32, #tpu.memory_space<vmem>>, vector<1x6xf32>
    %91 = vector.broadcast %90 : vector<1x6xf32> to vector<2x6xf32>
    %92 = arith.addf %89, %91 : vector<2x6xf32>
    %c0_39 = arith.constant 0 : index
    %c0_40 = arith.constant 0 : index
    %93 = vector.load %arg6[%c0_39, %c0_40] : memref<2x6xf32, #tpu.memory_space<vmem>>, vector<2x6xf32>
    %cst_41 = arith.constant dense<0.000000e+00> : vector<2x6xf32>
    %94 = tpu.matmul %81, %93, %cst_41 {dimension_numbers = #tpu.dot_dimension_numbers<[1], [0], [0], [1], [0, 0, 1, 1], [], []>} : vector<2x2xf32>, vector<2x6xf32>, vector<2x6xf32> -> vector<2x6xf32>
    %c0_42 = arith.constant 0 : index
    %c0_43 = arith.constant 0 : index
    %95 = vector.load %arg8[%c0_42, %c0_43] : memref<1x6xf32, #tpu.memory_space<vmem>>, vector<1x6xf32>
    %96 = vector.broadcast %95 : vector<1x6xf32> to vector<2x6xf32>
    %97 = arith.addf %94, %96 : vector<2x6xf32>
    %98 = vector.extract_strided_slice %7 {offsets = [1, 0, 0], sizes = [1, 2, 6], strides = [1, 1, 1]} : vector<8x2x6xf32> to vector<1x2x6xf32>
    %99 = vector.shape_cast %98 : vector<1x2x6xf32> to vector<2x6xf32>
    %100 = vector.extract_strided_slice %99 {offsets = [0, 0], sizes = [2, 2], strides = [1, 1]} : vector<2x6xf32> to vector<2x2xf32>
    %101 = vector.extract_strided_slice %92 {offsets = [0, 0], sizes = [2, 2], strides = [1, 1]} : vector<2x6xf32> to vector<2x2xf32>
    %102 = arith.addf %100, %101 : vector<2x2xf32>
    %103 = arith.negf %102 : vector<2x2xf32>
    %104 = math.exp %103 : vector<2x2xf32>
    %cst_44 = arith.constant 1.000000e+00 : f32
    %105 = vector.broadcast %cst_44 : f32 to vector<2x2xf32>
    %106 = arith.addf %105, %104 : vector<2x2xf32>
    %107 = arith.divf %105, %106 : vector<2x2xf32>
    %108 = vector.extract_strided_slice %99 {offsets = [0, 2], sizes = [2, 2], strides = [1, 1]} : vector<2x6xf32> to vector<2x2xf32>
    %109 = vector.extract_strided_slice %92 {offsets = [0, 2], sizes = [2, 2], strides = [1, 1]} : vector<2x6xf32> to vector<2x2xf32>
    %110 = arith.addf %108, %109 : vector<2x2xf32>
    %111 = arith.negf %110 : vector<2x2xf32>
    %112 = math.exp %111 : vector<2x2xf32>
    %cst_45 = arith.constant 1.000000e+00 : f32
    %113 = vector.broadcast %cst_45 : f32 to vector<2x2xf32>
    %114 = arith.addf %113, %112 : vector<2x2xf32>
    %115 = arith.divf %113, %114 : vector<2x2xf32>
    %116 = vector.extract_strided_slice %99 {offsets = [0, 4], sizes = [2, 2], strides = [1, 1]} : vector<2x6xf32> to vector<2x2xf32>
    %117 = vector.extract_strided_slice %92 {offsets = [0, 4], sizes = [2, 2], strides = [1, 1]} : vector<2x6xf32> to vector<2x2xf32>
    %118 = arith.mulf %107, %117 : vector<2x2xf32>
    %119 = arith.addf %116, %118 : vector<2x2xf32>
    %120 = math.tanh %119 : vector<2x2xf32>
    %cst_46 = arith.constant 1.000000e+00 : f32
    %121 = vector.broadcast %cst_46 : f32 to vector<2x2xf32>
    %122 = arith.subf %121, %115 : vector<2x2xf32>
    %123 = arith.mulf %122, %120 : vector<2x2xf32>
    %124 = arith.mulf %115, %53 : vector<2x2xf32>
    %125 = arith.addf %123, %124 : vector<2x2xf32>
    %126 = vector.extract_strided_slice %13 {offsets = [6, 0, 0], sizes = [1, 2, 6], strides = [1, 1, 1]} : vector<8x2x6xf32> to vector<1x2x6xf32>
    %127 = vector.shape_cast %126 : vector<1x2x6xf32> to vector<2x6xf32>
    %128 = vector.extract_strided_slice %127 {offsets = [0, 0], sizes = [2, 2], strides = [1, 1]} : vector<2x6xf32> to vector<2x2xf32>
    %129 = vector.extract_strided_slice %97 {offsets = [0, 0], sizes = [2, 2], strides = [1, 1]} : vector<2x6xf32> to vector<2x2xf32>
    %130 = arith.addf %128, %129 : vector<2x2xf32>
    %131 = arith.negf %130 : vector<2x2xf32>
    %132 = math.exp %131 : vector<2x2xf32>
    %cst_47 = arith.constant 1.000000e+00 : f32
    %133 = vector.broadcast %cst_47 : f32 to vector<2x2xf32>
    %134 = arith.addf %133, %132 : vector<2x2xf32>
    %135 = arith.divf %133, %134 : vector<2x2xf32>
    %136 = vector.extract_strided_slice %127 {offsets = [0, 2], sizes = [2, 2], strides = [1, 1]} : vector<2x6xf32> to vector<2x2xf32>
    %137 = vector.extract_strided_slice %97 {offsets = [0, 2], sizes = [2, 2], strides = [1, 1]} : vector<2x6xf32> to vector<2x2xf32>
    %138 = arith.addf %136, %137 : vector<2x2xf32>
    %139 = arith.negf %138 : vector<2x2xf32>
    %140 = math.exp %139 : vector<2x2xf32>
    %cst_48 = arith.constant 1.000000e+00 : f32
    %141 = vector.broadcast %cst_48 : f32 to vector<2x2xf32>
    %142 = arith.addf %141, %140 : vector<2x2xf32>
    %143 = arith.divf %141, %142 : vector<2x2xf32>
    %144 = vector.extract_strided_slice %127 {offsets = [0, 4], sizes = [2, 2], strides = [1, 1]} : vector<2x6xf32> to vector<2x2xf32>
    %145 = vector.extract_strided_slice %97 {offsets = [0, 4], sizes = [2, 2], strides = [1, 1]} : vector<2x6xf32> to vector<2x2xf32>
    %146 = arith.mulf %135, %145 : vector<2x2xf32>
    %147 = arith.addf %144, %146 : vector<2x2xf32>
    %148 = math.tanh %147 : vector<2x2xf32>
    %cst_49 = arith.constant 1.000000e+00 : f32
    %149 = vector.broadcast %cst_49 : f32 to vector<2x2xf32>
    %150 = arith.subf %149, %143 : vector<2x2xf32>
    %151 = arith.mulf %150, %148 : vector<2x2xf32>
    %152 = arith.mulf %143, %81 : vector<2x2xf32>
    %153 = arith.addf %151, %152 : vector<2x2xf32>
    %c1 = arith.constant 1 : index
    %c0_50 = arith.constant 0 : index
    %c0_51 = arith.constant 0 : index
    %154 = vector.load %arg27[%c1, %c0_50, %c0_51] : memref<8x2x2xf32, #tpu.memory_space<vmem>>, vector<1x2x2xf32>
    %155 = vector.shape_cast %154 : vector<1x2x2xf32> to vector<2x2xf32>
    %156 = vector.shape_cast %125 : vector<2x2xf32> to vector<1x2x2xf32>
    tpu.vector_store %arg27[%c1, %c0_50, %c0_51], %156 {strides = array<i32>} : memref<8x2x2xf32, #tpu.memory_space<vmem>>, vector<1x2x2xf32>,
    %c6 = arith.constant 6 : index
    %c0_52 = arith.constant 0 : index
    %c0_53 = arith.constant 0 : index
    %157 = vector.load %arg28[%c6, %c0_52, %c0_53] : memref<8x2x2xf32, #tpu.memory_space<vmem>>, vector<1x2x2xf32>
    %158 = vector.shape_cast %157 : vector<1x2x2xf32> to vector<2x2xf32>
    %159 = vector.shape_cast %153 : vector<2x2xf32> to vector<1x2x2xf32>
    tpu.vector_store %arg28[%c6, %c0_52, %c0_53], %159 {strides = array<i32>} : memref<8x2x2xf32, #tpu.memory_space<vmem>>, vector<1x2x2xf32>,
    %c0_54 = arith.constant 0 : index
    %c0_55 = arith.constant 0 : index
    %160 = vector.load %arg2[%c0_54, %c0_55] : memref<2x6xf32, #tpu.memory_space<vmem>>, vector<2x6xf32>
    %cst_56 = arith.constant dense<0.000000e+00> : vector<2x6xf32>
    %161 = tpu.matmul %125, %160, %cst_56 {dimension_numbers = #tpu.dot_dimension_numbers<[1], [0], [0], [1], [0, 0, 1, 1], [], []>} : vector<2x2xf32>, vector<2x6xf32>, vector<2x6xf32> -> vector<2x6xf32>
    %c0_57 = arith.constant 0 : index
    %c0_58 = arith.constant 0 : index
    %162 = vector.load %arg4[%c0_57, %c0_58] : memref<1x6xf32, #tpu.memory_space<vmem>>, vector<1x6xf32>
    %163 = vector.broadcast %162 : vector<1x6xf32> to vector<2x6xf32>
    %164 = arith.addf %161, %163 : vector<2x6xf32>
    %c0_59 = arith.constant 0 : index
    %c0_60 = arith.constant 0 : index
    %165 = vector.load %arg6[%c0_59, %c0_60] : memref<2x6xf32, #tpu.memory_space<vmem>>, vector<2x6xf32>
    %cst_61 = arith.constant dense<0.000000e+00> : vector<2x6xf32>
    %166 = tpu.matmul %153, %165, %cst_61 {dimension_numbers = #tpu.dot_dimension_numbers<[1], [0], [0], [1], [0, 0, 1, 1], [], []>} : vector<2x2xf32>, vector<2x6xf32>, vector<2x6xf32> -> vector<2x6xf32>
    %c0_62 = arith.constant 0 : index
    %c0_63 = arith.constant 0 : index
    %167 = vector.load %arg8[%c0_62, %c0_63] : memref<1x6xf32, #tpu.memory_space<vmem>>, vector<1x6xf32>
    %168 = vector.broadcast %167 : vector<1x6xf32> to vector<2x6xf32>
    %169 = arith.addf %166, %168 : vector<2x6xf32>
    %170 = vector.extract_strided_slice %7 {offsets = [2, 0, 0], sizes = [1, 2, 6], strides = [1, 1, 1]} : vector<8x2x6xf32> to vector<1x2x6xf32>
    %171 = vector.shape_cast %170 : vector<1x2x6xf32> to vector<2x6xf32>
    %172 = vector.extract_strided_slice %171 {offsets = [0, 0], sizes = [2, 2], strides = [1, 1]} : vector<2x6xf32> to vector<2x2xf32>
    %173 = vector.extract_strided_slice %164 {offsets = [0, 0], sizes = [2, 2], strides = [1, 1]} : vector<2x6xf32> to vector<2x2xf32>
    %174 = arith.addf %172, %173 : vector<2x2xf32>
    %175 = arith.negf %174 : vector<2x2xf32>
    %176 = math.exp %175 : vector<2x2xf32>
    %cst_64 = arith.constant 1.000000e+00 : f32
    %177 = vector.broadcast %cst_64 : f32 to vector<2x2xf32>
    %178 = arith.addf %177, %176 : vector<2x2xf32>
    %179 = arith.divf %177, %178 : vector<2x2xf32>
    %180 = vector.extract_strided_slice %171 {offsets = [0, 2], sizes = [2, 2], strides = [1, 1]} : vector<2x6xf32> to vector<2x2xf32>
    %181 = vector.extract_strided_slice %164 {offsets = [0, 2], sizes = [2, 2], strides = [1, 1]} : vector<2x6xf32> to vector<2x2xf32>
    %182 = arith.addf %180, %181 : vector<2x2xf32>
    %183 = arith.negf %182 : vector<2x2xf32>
    %184 = math.exp %183 : vector<2x2xf32>
    %cst_65 = arith.constant 1.000000e+00 : f32
    %185 = vector.broadcast %cst_65 : f32 to vector<2x2xf32>
    %186 = arith.addf %185, %184 : vector<2x2xf32>
    %187 = arith.divf %185, %186 : vector<2x2xf32>
    %188 = vector.extract_strided_slice %171 {offsets = [0, 4], sizes = [2, 2], strides = [1, 1]} : vector<2x6xf32> to vector<2x2xf32>
    %189 = vector.extract_strided_slice %164 {offsets = [0, 4], sizes = [2, 2], strides = [1, 1]} : vector<2x6xf32> to vector<2x2xf32>
    %190 = arith.mulf %179, %189 : vector<2x2xf32>
    %191 = arith.addf %188, %190 : vector<2x2xf32>
    %192 = math.tanh %191 : vector<2x2xf32>
    %cst_66 = arith.constant 1.000000e+00 : f32
    %193 = vector.broadcast %cst_66 : f32 to vector<2x2xf32>
    %194 = arith.subf %193, %187 : vector<2x2xf32>
    %195 = arith.mulf %194, %192 : vector<2x2xf32>
    %196 = arith.mulf %187, %125 : vector<2x2xf32>
    %197 = arith.addf %195, %196 : vector<2x2xf32>
    %198 = vector.extract_strided_slice %13 {offsets = [5, 0, 0], sizes = [1, 2, 6], strides = [1, 1, 1]} : vector<8x2x6xf32> to vector<1x2x6xf32>
    %199 = vector.shape_cast %198 : vector<1x2x6xf32> to vector<2x6xf32>
    %200 = vector.extract_strided_slice %199 {offsets = [0, 0], sizes = [2, 2], strides = [1, 1]} : vector<2x6xf32> to vector<2x2xf32>
    %201 = vector.extract_strided_slice %169 {offsets = [0, 0], sizes = [2, 2], strides = [1, 1]} : vector<2x6xf32> to vector<2x2xf32>
    %202 = arith.addf %200, %201 : vector<2x2xf32>
    %203 = arith.negf %202 : vector<2x2xf32>
    %204 = math.exp %203 : vector<2x2xf32>
    %cst_67 = arith.constant 1.000000e+00 : f32
    %205 = vector.broadcast %cst_67 : f32 to vector<2x2xf32>
    %206 = arith.addf %205, %204 : vector<2x2xf32>
    %207 = arith.divf %205, %206 : vector<2x2xf32>
    %208 = vector.extract_strided_slice %199 {offsets = [0, 2], sizes = [2, 2], strides = [1, 1]} : vector<2x6xf32> to vector<2x2xf32>
    %209 = vector.extract_strided_slice %169 {offsets = [0, 2], sizes = [2, 2], strides = [1, 1]} : vector<2x6xf32> to vector<2x2xf32>
    %210 = arith.addf %208, %209 : vector<2x2xf32>
    %211 = arith.negf %210 : vector<2x2xf32>
    %212 = math.exp %211 : vector<2x2xf32>
    %cst_68 = arith.constant 1.000000e+00 : f32
    %213 = vector.broadcast %cst_68 : f32 to vector<2x2xf32>
    %214 = arith.addf %213, %212 : vector<2x2xf32>
    %215 = arith.divf %213, %214 : vector<2x2xf32>
    %216 = vector.extract_strided_slice %199 {offsets = [0, 4], sizes = [2, 2], strides = [1, 1]} : vector<2x6xf32> to vector<2x2xf32>
    %217 = vector.extract_strided_slice %169 {offsets = [0, 4], sizes = [2, 2], strides = [1, 1]} : vector<2x6xf32> to vector<2x2xf32>
    %218 = arith.mulf %207, %217 : vector<2x2xf32>
    %219 = arith.addf %216, %218 : vector<2x2xf32>
    %220 = math.tanh %219 : vector<2x2xf32>
    %cst_69 = arith.constant 1.000000e+00 : f32
    %221 = vector.broadcast %cst_69 : f32 to vector<2x2xf32>
    %222 = arith.subf %221, %215 : vector<2x2xf32>
    %223 = arith.mulf %222, %220 : vector<2x2xf32>
    %224 = arith.mulf %215, %153 : vector<2x2xf32>
    %225 = arith.addf %223, %224 : vector<2x2xf32>
    %c2 = arith.constant 2 : index
    %c0_70 = arith.constant 0 : index
    %c0_71 = arith.constant 0 : index
    %226 = vector.load %arg27[%c2, %c0_70, %c0_71] : memref<8x2x2xf32, #tpu.memory_space<vmem>>, vector<1x2x2xf32>
    %227 = vector.shape_cast %226 : vector<1x2x2xf32> to vector<2x2xf32>
    %228 = vector.shape_cast %197 : vector<2x2xf32> to vector<1x2x2xf32>
    tpu.vector_store %arg27[%c2, %c0_70, %c0_71], %228 {strides = array<i32>} : memref<8x2x2xf32, #tpu.memory_space<vmem>>, vector<1x2x2xf32>,
    %c5 = arith.constant 5 : index
    %c0_72 = arith.constant 0 : index
    %c0_73 = arith.constant 0 : index
    %229 = vector.load %arg28[%c5, %c0_72, %c0_73] : memref<8x2x2xf32, #tpu.memory_space<vmem>>, vector<1x2x2xf32>
    %230 = vector.shape_cast %229 : vector<1x2x2xf32> to vector<2x2xf32>
    %231 = vector.shape_cast %225 : vector<2x2xf32> to vector<1x2x2xf32>
    tpu.vector_store %arg28[%c5, %c0_72, %c0_73], %231 {strides = array<i32>} : memref<8x2x2xf32, #tpu.memory_space<vmem>>, vector<1x2x2xf32>,
    %c0_74 = arith.constant 0 : index
    %c0_75 = arith.constant 0 : index
    %232 = vector.load %arg2[%c0_74, %c0_75] : memref<2x6xf32, #tpu.memory_space<vmem>>, vector<2x6xf32>
    %cst_76 = arith.constant dense<0.000000e+00> : vector<2x6xf32>
    %233 = tpu.matmul %197, %232, %cst_76 {dimension_numbers = #tpu.dot_dimension_numbers<[1], [0], [0], [1], [0, 0, 1, 1], [], []>} : vector<2x2xf32>, vector<2x6xf32>, vector<2x6xf32> -> vector<2x6xf32>
    %c0_77 = arith.constant 0 : index
    %c0_78 = arith.constant 0 : index
    %234 = vector.load %arg4[%c0_77, %c0_78] : memref<1x6xf32, #tpu.memory_space<vmem>>, vector<1x6xf32>
    %235 = vector.broadcast %234 : vector<1x6xf32> to vector<2x6xf32>
    %236 = arith.addf %233, %235 : vector<2x6xf32>
    %c0_79 = arith.constant 0 : index
    %c0_80 = arith.constant 0 : index
    %237 = vector.load %arg6[%c0_79, %c0_80] : memref<2x6xf32, #tpu.memory_space<vmem>>, vector<2x6xf32>
    %cst_81 = arith.constant dense<0.000000e+00> : vector<2x6xf32>
    %238 = tpu.matmul %225, %237, %cst_81 {dimension_numbers = #tpu.dot_dimension_numbers<[1], [0], [0], [1], [0, 0, 1, 1], [], []>} : vector<2x2xf32>, vector<2x6xf32>, vector<2x6xf32> -> vector<2x6xf32>
    %c0_82 = arith.constant 0 : index
    %c0_83 = arith.constant 0 : index
    %239 = vector.load %arg8[%c0_82, %c0_83] : memref<1x6xf32, #tpu.memory_space<vmem>>, vector<1x6xf32>
    %240 = vector.broadcast %239 : vector<1x6xf32> to vector<2x6xf32>
    %241 = arith.addf %238, %240 : vector<2x6xf32>
    %242 = vector.extract_strided_slice %7 {offsets = [3, 0, 0], sizes = [1, 2, 6], strides = [1, 1, 1]} : vector<8x2x6xf32> to vector<1x2x6xf32>
    %243 = vector.shape_cast %242 : vector<1x2x6xf32> to vector<2x6xf32>
    %244 = vector.extract_strided_slice %243 {offsets = [0, 0], sizes = [2, 2], strides = [1, 1]} : vector<2x6xf32> to vector<2x2xf32>
    %245 = vector.extract_strided_slice %236 {offsets = [0, 0], sizes = [2, 2], strides = [1, 1]} : vector<2x6xf32> to vector<2x2xf32>
    %246 = arith.addf %244, %245 : vector<2x2xf32>
    %247 = arith.negf %246 : vector<2x2xf32>
    %248 = math.exp %247 : vector<2x2xf32>
    %cst_84 = arith.constant 1.000000e+00 : f32
    %249 = vector.broadcast %cst_84 : f32 to vector<2x2xf32>
    %250 = arith.addf %249, %248 : vector<2x2xf32>
    %251 = arith.divf %249, %250 : vector<2x2xf32>
    %252 = vector.extract_strided_slice %243 {offsets = [0, 2], sizes = [2, 2], strides = [1, 1]} : vector<2x6xf32> to vector<2x2xf32>
    %253 = vector.extract_strided_slice %236 {offsets = [0, 2], sizes = [2, 2], strides = [1, 1]} : vector<2x6xf32> to vector<2x2xf32>
    %254 = arith.addf %252, %253 : vector<2x2xf32>
    %255 = arith.negf %254 : vector<2x2xf32>
    %256 = math.exp %255 : vector<2x2xf32>
    %cst_85 = arith.constant 1.000000e+00 : f32
    %257 = vector.broadcast %cst_85 : f32 to vector<2x2xf32>
    %258 = arith.addf %257, %256 : vector<2x2xf32>
    %259 = arith.divf %257, %258 : vector<2x2xf32>
    %260 = vector.extract_strided_slice %243 {offsets = [0, 4], sizes = [2, 2], strides = [1, 1]} : vector<2x6xf32> to vector<2x2xf32>
    %261 = vector.extract_strided_slice %236 {offsets = [0, 4], sizes = [2, 2], strides = [1, 1]} : vector<2x6xf32> to vector<2x2xf32>
    %262 = arith.mulf %251, %261 : vector<2x2xf32>
    %263 = arith.addf %260, %262 : vector<2x2xf32>
    %264 = math.tanh %263 : vector<2x2xf32>
    %cst_86 = arith.constant 1.000000e+00 : f32
    %265 = vector.broadcast %cst_86 : f32 to vector<2x2xf32>
    %266 = arith.subf %265, %259 : vector<2x2xf32>
    %267 = arith.mulf %266, %264 : vector<2x2xf32>
    %268 = arith.mulf %259, %197 : vector<2x2xf32>
    %269 = arith.addf %267, %268 : vector<2x2xf32>
    %270 = vector.extract_strided_slice %13 {offsets = [4, 0, 0], sizes = [1, 2, 6], strides = [1, 1, 1]} : vector<8x2x6xf32> to vector<1x2x6xf32>
    %271 = vector.shape_cast %270 : vector<1x2x6xf32> to vector<2x6xf32>
    %272 = vector.extract_strided_slice %271 {offsets = [0, 0], sizes = [2, 2], strides = [1, 1]} : vector<2x6xf32> to vector<2x2xf32>
    %273 = vector.extract_strided_slice %241 {offsets = [0, 0], sizes = [2, 2], strides = [1, 1]} : vector<2x6xf32> to vector<2x2xf32>
    %274 = arith.addf %272, %273 : vector<2x2xf32>
    %275 = arith.negf %274 : vector<2x2xf32>
    %276 = math.exp %275 : vector<2x2xf32>
    %cst_87 = arith.constant 1.000000e+00 : f32
    %277 = vector.broadcast %cst_87 : f32 to vector<2x2xf32>
    %278 = arith.addf %277, %276 : vector<2x2xf32>
    %279 = arith.divf %277, %278 : vector<2x2xf32>
    %280 = vector.extract_strided_slice %271 {offsets = [0, 2], sizes = [2, 2], strides = [1, 1]} : vector<2x6xf32> to vector<2x2xf32>
    %281 = vector.extract_strided_slice %241 {offsets = [0, 2], sizes = [2, 2], strides = [1, 1]} : vector<2x6xf32> to vector<2x2xf32>
    %282 = arith.addf %280, %281 : vector<2x2xf32>
    %283 = arith.negf %282 : vector<2x2xf32>
    %284 = math.exp %283 : vector<2x2xf32>
    %cst_88 = arith.constant 1.000000e+00 : f32
    %285 = vector.broadcast %cst_88 : f32 to vector<2x2xf32>
    %286 = arith.addf %285, %284 : vector<2x2xf32>
    %287 = arith.divf %285, %286 : vector<2x2xf32>
    %288 = vector.extract_strided_slice %271 {offsets = [0, 4], sizes = [2, 2], strides = [1, 1]} : vector<2x6xf32> to vector<2x2xf32>
    %289 = vector.extract_strided_slice %241 {offsets = [0, 4], sizes = [2, 2], strides = [1, 1]} : vector<2x6xf32> to vector<2x2xf32>
    %290 = arith.mulf %279, %289 : vector<2x2xf32>
    %291 = arith.addf %288, %290 : vector<2x2xf32>
    %292 = math.tanh %291 : vector<2x2xf32>
    %cst_89 = arith.constant 1.000000e+00 : f32
    %293 = vector.broadcast %cst_89 : f32 to vector<2x2xf32>
    %294 = arith.subf %293, %287 : vector<2x2xf32>
    %295 = arith.mulf %294, %292 : vector<2x2xf32>
    %296 = arith.mulf %287, %225 : vector<2x2xf32>
    %297 = arith.addf %295, %296 : vector<2x2xf32>
    %c3 = arith.constant 3 : index
    %c0_90 = arith.constant 0 : index
    %c0_91 = arith.constant 0 : index
    %298 = vector.load %arg27[%c3, %c0_90, %c0_91] : memref<8x2x2xf32, #tpu.memory_space<vmem>>, vector<1x2x2xf32>
    %299 = vector.shape_cast %298 : vector<1x2x2xf32> to vector<2x2xf32>
    %300 = vector.shape_cast %269 : vector<2x2xf32> to vector<1x2x2xf32>
    tpu.vector_store %arg27[%c3, %c0_90, %c0_91], %300 {strides = array<i32>} : memref<8x2x2xf32, #tpu.memory_space<vmem>>, vector<1x2x2xf32>,
    %c4 = arith.constant 4 : index
    %c0_92 = arith.constant 0 : index
    %c0_93 = arith.constant 0 : index
    %301 = vector.load %arg28[%c4, %c0_92, %c0_93] : memref<8x2x2xf32, #tpu.memory_space<vmem>>, vector<1x2x2xf32>
    %302 = vector.shape_cast %301 : vector<1x2x2xf32> to vector<2x2xf32>
    %303 = vector.shape_cast %297 : vector<2x2xf32> to vector<1x2x2xf32>
    tpu.vector_store %arg28[%c4, %c0_92, %c0_93], %303 {strides = array<i32>} : memref<8x2x2xf32, #tpu.memory_space<vmem>>, vector<1x2x2xf32>,
    %c0_94 = arith.constant 0 : index
    %c0_95 = arith.constant 0 : index
    %304 = vector.load %arg2[%c0_94, %c0_95] : memref<2x6xf32, #tpu.memory_space<vmem>>, vector<2x6xf32>
    %cst_96 = arith.constant dense<0.000000e+00> : vector<2x6xf32>
    %305 = tpu.matmul %269, %304, %cst_96 {dimension_numbers = #tpu.dot_dimension_numbers<[1], [0], [0], [1], [0, 0, 1, 1], [], []>} : vector<2x2xf32>, vector<2x6xf32>, vector<2x6xf32> -> vector<2x6xf32>
    %c0_97 = arith.constant 0 : index
    %c0_98 = arith.constant 0 : index
    %306 = vector.load %arg4[%c0_97, %c0_98] : memref<1x6xf32, #tpu.memory_space<vmem>>, vector<1x6xf32>
    %307 = vector.broadcast %306 : vector<1x6xf32> to vector<2x6xf32>
    %308 = arith.addf %305, %307 : vector<2x6xf32>
    %c0_99 = arith.constant 0 : index
    %c0_100 = arith.constant 0 : index
    %309 = vector.load %arg6[%c0_99, %c0_100] : memref<2x6xf32, #tpu.memory_space<vmem>>, vector<2x6xf32>
    %cst_101 = arith.constant dense<0.000000e+00> : vector<2x6xf32>
    %310 = tpu.matmul %297, %309, %cst_101 {dimension_numbers = #tpu.dot_dimension_numbers<[1], [0], [0], [1], [0, 0, 1, 1], [], []>} : vector<2x2xf32>, vector<2x6xf32>, vector<2x6xf32> -> vector<2x6xf32>
    %c0_102 = arith.constant 0 : index
    %c0_103 = arith.constant 0 : index
    %311 = vector.load %arg8[%c0_102, %c0_103] : memref<1x6xf32, #tpu.memory_space<vmem>>, vector<1x6xf32>
    %312 = vector.broadcast %311 : vector<1x6xf32> to vector<2x6xf32>
    %313 = arith.addf %310, %312 : vector<2x6xf32>
    %314 = vector.extract_strided_slice %7 {offsets = [4, 0, 0], sizes = [1, 2, 6], strides = [1, 1, 1]} : vector<8x2x6xf32> to vector<1x2x6xf32>
    %315 = vector.shape_cast %314 : vector<1x2x6xf32> to vector<2x6xf32>
    %316 = vector.extract_strided_slice %315 {offsets = [0, 0], sizes = [2, 2], strides = [1, 1]} : vector<2x6xf32> to vector<2x2xf32>
    %317 = vector.extract_strided_slice %308 {offsets = [0, 0], sizes = [2, 2], strides = [1, 1]} : vector<2x6xf32> to vector<2x2xf32>
    %318 = arith.addf %316, %317 : vector<2x2xf32>
    %319 = arith.negf %318 : vector<2x2xf32>
    %320 = math.exp %319 : vector<2x2xf32>
    %cst_104 = arith.constant 1.000000e+00 : f32
    %321 = vector.broadcast %cst_104 : f32 to vector<2x2xf32>
    %322 = arith.addf %321, %320 : vector<2x2xf32>
    %323 = arith.divf %321, %322 : vector<2x2xf32>
    %324 = vector.extract_strided_slice %315 {offsets = [0, 2], sizes = [2, 2], strides = [1, 1]} : vector<2x6xf32> to vector<2x2xf32>
    %325 = vector.extract_strided_slice %308 {offsets = [0, 2], sizes = [2, 2], strides = [1, 1]} : vector<2x6xf32> to vector<2x2xf32>
    %326 = arith.addf %324, %325 : vector<2x2xf32>
    %327 = arith.negf %326 : vector<2x2xf32>
    %328 = math.exp %327 : vector<2x2xf32>
    %cst_105 = arith.constant 1.000000e+00 : f32
    %329 = vector.broadcast %cst_105 : f32 to vector<2x2xf32>
    %330 = arith.addf %329, %328 : vector<2x2xf32>
    %331 = arith.divf %329, %330 : vector<2x2xf32>
    %332 = vector.extract_strided_slice %315 {offsets = [0, 4], sizes = [2, 2], strides = [1, 1]} : vector<2x6xf32> to vector<2x2xf32>
    %333 = vector.extract_strided_slice %308 {offsets = [0, 4], sizes = [2, 2], strides = [1, 1]} : vector<2x6xf32> to vector<2x2xf32>
    %334 = arith.mulf %323, %333 : vector<2x2xf32>
    %335 = arith.addf %332, %334 : vector<2x2xf32>
    %336 = math.tanh %335 : vector<2x2xf32>
    %cst_106 = arith.constant 1.000000e+00 : f32
    %337 = vector.broadcast %cst_106 : f32 to vector<2x2xf32>
    %338 = arith.subf %337, %331 : vector<2x2xf32>
    %339 = arith.mulf %338, %336 : vector<2x2xf32>
    %340 = arith.mulf %331, %269 : vector<2x2xf32>
    %341 = arith.addf %339, %340 : vector<2x2xf32>
    %342 = vector.extract_strided_slice %13 {offsets = [3, 0, 0], sizes = [1, 2, 6], strides = [1, 1, 1]} : vector<8x2x6xf32> to vector<1x2x6xf32>
    %343 = vector.shape_cast %342 : vector<1x2x6xf32> to vector<2x6xf32>
    %344 = vector.extract_strided_slice %343 {offsets = [0, 0], sizes = [2, 2], strides = [1, 1]} : vector<2x6xf32> to vector<2x2xf32>
    %345 = vector.extract_strided_slice %313 {offsets = [0, 0], sizes = [2, 2], strides = [1, 1]} : vector<2x6xf32> to vector<2x2xf32>
    %346 = arith.addf %344, %345 : vector<2x2xf32>
    %347 = arith.negf %346 : vector<2x2xf32>
    %348 = math.exp %347 : vector<2x2xf32>
    %cst_107 = arith.constant 1.000000e+00 : f32
    %349 = vector.broadcast %cst_107 : f32 to vector<2x2xf32>
    %350 = arith.addf %349, %348 : vector<2x2xf32>
    %351 = arith.divf %349, %350 : vector<2x2xf32>
    %352 = vector.extract_strided_slice %343 {offsets = [0, 2], sizes = [2, 2], strides = [1, 1]} : vector<2x6xf32> to vector<2x2xf32>
    %353 = vector.extract_strided_slice %313 {offsets = [0, 2], sizes = [2, 2], strides = [1, 1]} : vector<2x6xf32> to vector<2x2xf32>
    %354 = arith.addf %352, %353 : vector<2x2xf32>
    %355 = arith.negf %354 : vector<2x2xf32>
    %356 = math.exp %355 : vector<2x2xf32>
    %cst_108 = arith.constant 1.000000e+00 : f32
    %357 = vector.broadcast %cst_108 : f32 to vector<2x2xf32>
    %358 = arith.addf %357, %356 : vector<2x2xf32>
    %359 = arith.divf %357, %358 : vector<2x2xf32>
    %360 = vector.extract_strided_slice %343 {offsets = [0, 4], sizes = [2, 2], strides = [1, 1]} : vector<2x6xf32> to vector<2x2xf32>
    %361 = vector.extract_strided_slice %313 {offsets = [0, 4], sizes = [2, 2], strides = [1, 1]} : vector<2x6xf32> to vector<2x2xf32>
    %362 = arith.mulf %351, %361 : vector<2x2xf32>
    %363 = arith.addf %360, %362 : vector<2x2xf32>
    %364 = math.tanh %363 : vector<2x2xf32>
    %cst_109 = arith.constant 1.000000e+00 : f32
    %365 = vector.broadcast %cst_109 : f32 to vector<2x2xf32>
    %366 = arith.subf %365, %359 : vector<2x2xf32>
    %367 = arith.mulf %366, %364 : vector<2x2xf32>
    %368 = arith.mulf %359, %297 : vector<2x2xf32>
    %369 = arith.addf %367, %368 : vector<2x2xf32>
    %c4_110 = arith.constant 4 : index
    %c0_111 = arith.constant 0 : index
    %c0_112 = arith.constant 0 : index
    %370 = vector.load %arg27[%c4_110, %c0_111, %c0_112] : memref<8x2x2xf32, #tpu.memory_space<vmem>>, vector<1x2x2xf32>
    %371 = vector.shape_cast %370 : vector<1x2x2xf32> to vector<2x2xf32>
    %372 = vector.shape_cast %341 : vector<2x2xf32> to vector<1x2x2xf32>
    tpu.vector_store %arg27[%c4_110, %c0_111, %c0_112], %372 {strides = array<i32>} : memref<8x2x2xf32, #tpu.memory_space<vmem>>, vector<1x2x2xf32>,
    %c3_113 = arith.constant 3 : index
    %c0_114 = arith.constant 0 : index
    %c0_115 = arith.constant 0 : index
    %373 = vector.load %arg28[%c3_113, %c0_114, %c0_115] : memref<8x2x2xf32, #tpu.memory_space<vmem>>, vector<1x2x2xf32>
    %374 = vector.shape_cast %373 : vector<1x2x2xf32> to vector<2x2xf32>
    %375 = vector.shape_cast %369 : vector<2x2xf32> to vector<1x2x2xf32>
    tpu.vector_store %arg28[%c3_113, %c0_114, %c0_115], %375 {strides = array<i32>} : memref<8x2x2xf32, #tpu.memory_space<vmem>>, vector<1x2x2xf32>,
    %c0_116 = arith.constant 0 : index
    %c0_117 = arith.constant 0 : index
    %376 = vector.load %arg2[%c0_116, %c0_117] : memref<2x6xf32, #tpu.memory_space<vmem>>, vector<2x6xf32>
    %cst_118 = arith.constant dense<0.000000e+00> : vector<2x6xf32>
    %377 = tpu.matmul %341, %376, %cst_118 {dimension_numbers = #tpu.dot_dimension_numbers<[1], [0], [0], [1], [0, 0, 1, 1], [], []>} : vector<2x2xf32>, vector<2x6xf32>, vector<2x6xf32> -> vector<2x6xf32>
    %c0_119 = arith.constant 0 : index
    %c0_120 = arith.constant 0 : index
    %378 = vector.load %arg4[%c0_119, %c0_120] : memref<1x6xf32, #tpu.memory_space<vmem>>, vector<1x6xf32>
    %379 = vector.broadcast %378 : vector<1x6xf32> to vector<2x6xf32>
    %380 = arith.addf %377, %379 : vector<2x6xf32>
    %c0_121 = arith.constant 0 : index
    %c0_122 = arith.constant 0 : index
    %381 = vector.load %arg6[%c0_121, %c0_122] : memref<2x6xf32, #tpu.memory_space<vmem>>, vector<2x6xf32>
    %cst_123 = arith.constant dense<0.000000e+00> : vector<2x6xf32>
    %382 = tpu.matmul %369, %381, %cst_123 {dimension_numbers = #tpu.dot_dimension_numbers<[1], [0], [0], [1], [0, 0, 1, 1], [], []>} : vector<2x2xf32>, vector<2x6xf32>, vector<2x6xf32> -> vector<2x6xf32>
    %c0_124 = arith.constant 0 : index
    %c0_125 = arith.constant 0 : index
    %383 = vector.load %arg8[%c0_124, %c0_125] : memref<1x6xf32, #tpu.memory_space<vmem>>, vector<1x6xf32>
    %384 = vector.broadcast %383 : vector<1x6xf32> to vector<2x6xf32>
    %385 = arith.addf %382, %384 : vector<2x6xf32>
    %386 = vector.extract_strided_slice %7 {offsets = [5, 0, 0], sizes = [1, 2, 6], strides = [1, 1, 1]} : vector<8x2x6xf32> to vector<1x2x6xf32>
    %387 = vector.shape_cast %386 : vector<1x2x6xf32> to vector<2x6xf32>
    %388 = vector.extract_strided_slice %387 {offsets = [0, 0], sizes = [2, 2], strides = [1, 1]} : vector<2x6xf32> to vector<2x2xf32>
    %389 = vector.extract_strided_slice %380 {offsets = [0, 0], sizes = [2, 2], strides = [1, 1]} : vector<2x6xf32> to vector<2x2xf32>
    %390 = arith.addf %388, %389 : vector<2x2xf32>
    %391 = arith.negf %390 : vector<2x2xf32>
    %392 = math.exp %391 : vector<2x2xf32>
    %cst_126 = arith.constant 1.000000e+00 : f32
    %393 = vector.broadcast %cst_126 : f32 to vector<2x2xf32>
    %394 = arith.addf %393, %392 : vector<2x2xf32>
    %395 = arith.divf %393, %394 : vector<2x2xf32>
    %396 = vector.extract_strided_slice %387 {offsets = [0, 2], sizes = [2, 2], strides = [1, 1]} : vector<2x6xf32> to vector<2x2xf32>
    %397 = vector.extract_strided_slice %380 {offsets = [0, 2], sizes = [2, 2], strides = [1, 1]} : vector<2x6xf32> to vector<2x2xf32>
    %398 = arith.addf %396, %397 : vector<2x2xf32>
    %399 = arith.negf %398 : vector<2x2xf32>
    %400 = math.exp %399 : vector<2x2xf32>
    %cst_127 = arith.constant 1.000000e+00 : f32
    %401 = vector.broadcast %cst_127 : f32 to vector<2x2xf32>
    %402 = arith.addf %401, %400 : vector<2x2xf32>
    %403 = arith.divf %401, %402 : vector<2x2xf32>
    %404 = vector.extract_strided_slice %387 {offsets = [0, 4], sizes = [2, 2], strides = [1, 1]} : vector<2x6xf32> to vector<2x2xf32>
    %405 = vector.extract_strided_slice %380 {offsets = [0, 4], sizes = [2, 2], strides = [1, 1]} : vector<2x6xf32> to vector<2x2xf32>
    %406 = arith.mulf %395, %405 : vector<2x2xf32>
    %407 = arith.addf %404, %406 : vector<2x2xf32>
    %408 = math.tanh %407 : vector<2x2xf32>
    %cst_128 = arith.constant 1.000000e+00 : f32
    %409 = vector.broadcast %cst_128 : f32 to vector<2x2xf32>
    %410 = arith.subf %409, %403 : vector<2x2xf32>
    %411 = arith.mulf %410, %408 : vector<2x2xf32>
    %412 = arith.mulf %403, %341 : vector<2x2xf32>
    %413 = arith.addf %411, %412 : vector<2x2xf32>
    %414 = vector.extract_strided_slice %13 {offsets = [2, 0, 0], sizes = [1, 2, 6], strides = [1, 1, 1]} : vector<8x2x6xf32> to vector<1x2x6xf32>
    %415 = vector.shape_cast %414 : vector<1x2x6xf32> to vector<2x6xf32>
    %416 = vector.extract_strided_slice %415 {offsets = [0, 0], sizes = [2, 2], strides = [1, 1]} : vector<2x6xf32> to vector<2x2xf32>
    %417 = vector.extract_strided_slice %385 {offsets = [0, 0], sizes = [2, 2], strides = [1, 1]} : vector<2x6xf32> to vector<2x2xf32>
    %418 = arith.addf %416, %417 : vector<2x2xf32>
    %419 = arith.negf %418 : vector<2x2xf32>
    %420 = math.exp %419 : vector<2x2xf32>
    %cst_129 = arith.constant 1.000000e+00 : f32
    %421 = vector.broadcast %cst_129 : f32 to vector<2x2xf32>
    %422 = arith.addf %421, %420 : vector<2x2xf32>
    %423 = arith.divf %421, %422 : vector<2x2xf32>
    %424 = vector.extract_strided_slice %415 {offsets = [0, 2], sizes = [2, 2], strides = [1, 1]} : vector<2x6xf32> to vector<2x2xf32>
    %425 = vector.extract_strided_slice %385 {offsets = [0, 2], sizes = [2, 2], strides = [1, 1]} : vector<2x6xf32> to vector<2x2xf32>
    %426 = arith.addf %424, %425 : vector<2x2xf32>
    %427 = arith.negf %426 : vector<2x2xf32>
    %428 = math.exp %427 : vector<2x2xf32>
    %cst_130 = arith.constant 1.000000e+00 : f32
    %429 = vector.broadcast %cst_130 : f32 to vector<2x2xf32>
    %430 = arith.addf %429, %428 : vector<2x2xf32>
    %431 = arith.divf %429, %430 : vector<2x2xf32>
    %432 = vector.extract_strided_slice %415 {offsets = [0, 4], sizes = [2, 2], strides = [1, 1]} : vector<2x6xf32> to vector<2x2xf32>
    %433 = vector.extract_strided_slice %385 {offsets = [0, 4], sizes = [2, 2], strides = [1, 1]} : vector<2x6xf32> to vector<2x2xf32>
    %434 = arith.mulf %423, %433 : vector<2x2xf32>
    %435 = arith.addf %432, %434 : vector<2x2xf32>
    %436 = math.tanh %435 : vector<2x2xf32>
    %cst_131 = arith.constant 1.000000e+00 : f32
    %437 = vector.broadcast %cst_131 : f32 to vector<2x2xf32>
    %438 = arith.subf %437, %431 : vector<2x2xf32>
    %439 = arith.mulf %438, %436 : vector<2x2xf32>
    %440 = arith.mulf %431, %369 : vector<2x2xf32>
    %441 = arith.addf %439, %440 : vector<2x2xf32>
    %c5_132 = arith.constant 5 : index
    %c0_133 = arith.constant 0 : index
    %c0_134 = arith.constant 0 : index
    %442 = vector.load %arg27[%c5_132, %c0_133, %c0_134] : memref<8x2x2xf32, #tpu.memory_space<vmem>>, vector<1x2x2xf32>
    %443 = vector.shape_cast %442 : vector<1x2x2xf32> to vector<2x2xf32>
    %444 = vector.shape_cast %413 : vector<2x2xf32> to vector<1x2x2xf32>
    tpu.vector_store %arg27[%c5_132, %c0_133, %c0_134], %444 {strides = array<i32>} : memref<8x2x2xf32, #tpu.memory_space<vmem>>, vector<1x2x2xf32>,
    %c2_135 = arith.constant 2 : index
    %c0_136 = arith.constant 0 : index
    %c0_137 = arith.constant 0 : index
    %445 = vector.load %arg28[%c2_135, %c0_136, %c0_137] : memref<8x2x2xf32, #tpu.memory_space<vmem>>, vector<1x2x2xf32>
    %446 = vector.shape_cast %445 : vector<1x2x2xf32> to vector<2x2xf32>
    %447 = vector.shape_cast %441 : vector<2x2xf32> to vector<1x2x2xf32>
    tpu.vector_store %arg28[%c2_135, %c0_136, %c0_137], %447 {strides = array<i32>} : memref<8x2x2xf32, #tpu.memory_space<vmem>>, vector<1x2x2xf32>,
    %c0_138 = arith.constant 0 : index
    %c0_139 = arith.constant 0 : index
    %448 = vector.load %arg2[%c0_138, %c0_139] : memref<2x6xf32, #tpu.memory_space<vmem>>, vector<2x6xf32>
    %cst_140 = arith.constant dense<0.000000e+00> : vector<2x6xf32>
    %449 = tpu.matmul %413, %448, %cst_140 {dimension_numbers = #tpu.dot_dimension_numbers<[1], [0], [0], [1], [0, 0, 1, 1], [], []>} : vector<2x2xf32>, vector<2x6xf32>, vector<2x6xf32> -> vector<2x6xf32>
    %c0_141 = arith.constant 0 : index
    %c0_142 = arith.constant 0 : index
    %450 = vector.load %arg4[%c0_141, %c0_142] : memref<1x6xf32, #tpu.memory_space<vmem>>, vector<1x6xf32>
    %451 = vector.broadcast %450 : vector<1x6xf32> to vector<2x6xf32>
    %452 = arith.addf %449, %451 : vector<2x6xf32>
    %c0_143 = arith.constant 0 : index
    %c0_144 = arith.constant 0 : index
    %453 = vector.load %arg6[%c0_143, %c0_144] : memref<2x6xf32, #tpu.memory_space<vmem>>, vector<2x6xf32>
    %cst_145 = arith.constant dense<0.000000e+00> : vector<2x6xf32>
    %454 = tpu.matmul %441, %453, %cst_145 {dimension_numbers = #tpu.dot_dimension_numbers<[1], [0], [0], [1], [0, 0, 1, 1], [], []>} : vector<2x2xf32>, vector<2x6xf32>, vector<2x6xf32> -> vector<2x6xf32>
    %c0_146 = arith.constant 0 : index
    %c0_147 = arith.constant 0 : index
    %455 = vector.load %arg8[%c0_146, %c0_147] : memref<1x6xf32, #tpu.memory_space<vmem>>, vector<1x6xf32>
    %456 = vector.broadcast %455 : vector<1x6xf32> to vector<2x6xf32>
    %457 = arith.addf %454, %456 : vector<2x6xf32>
    %458 = vector.extract_strided_slice %7 {offsets = [6, 0, 0], sizes = [1, 2, 6], strides = [1, 1, 1]} : vector<8x2x6xf32> to vector<1x2x6xf32>
    %459 = vector.shape_cast %458 : vector<1x2x6xf32> to vector<2x6xf32>
    %460 = vector.extract_strided_slice %459 {offsets = [0, 0], sizes = [2, 2], strides = [1, 1]} : vector<2x6xf32> to vector<2x2xf32>
    %461 = vector.extract_strided_slice %452 {offsets = [0, 0], sizes = [2, 2], strides = [1, 1]} : vector<2x6xf32> to vector<2x2xf32>
    %462 = arith.addf %460, %461 : vector<2x2xf32>
    %463 = arith.negf %462 : vector<2x2xf32>
    %464 = math.exp %463 : vector<2x2xf32>
    %cst_148 = arith.constant 1.000000e+00 : f32
    %465 = vector.broadcast %cst_148 : f32 to vector<2x2xf32>
    %466 = arith.addf %465, %464 : vector<2x2xf32>
    %467 = arith.divf %465, %466 : vector<2x2xf32>
    %468 = vector.extract_strided_slice %459 {offsets = [0, 2], sizes = [2, 2], strides = [1, 1]} : vector<2x6xf32> to vector<2x2xf32>
    %469 = vector.extract_strided_slice %452 {offsets = [0, 2], sizes = [2, 2], strides = [1, 1]} : vector<2x6xf32> to vector<2x2xf32>
    %470 = arith.addf %468, %469 : vector<2x2xf32>
    %471 = arith.negf %470 : vector<2x2xf32>
    %472 = math.exp %471 : vector<2x2xf32>
    %cst_149 = arith.constant 1.000000e+00 : f32
    %473 = vector.broadcast %cst_149 : f32 to vector<2x2xf32>
    %474 = arith.addf %473, %472 : vector<2x2xf32>
    %475 = arith.divf %473, %474 : vector<2x2xf32>
    %476 = vector.extract_strided_slice %459 {offsets = [0, 4], sizes = [2, 2], strides = [1, 1]} : vector<2x6xf32> to vector<2x2xf32>
    %477 = vector.extract_strided_slice %452 {offsets = [0, 4], sizes = [2, 2], strides = [1, 1]} : vector<2x6xf32> to vector<2x2xf32>
    %478 = arith.mulf %467, %477 : vector<2x2xf32>
    %479 = arith.addf %476, %478 : vector<2x2xf32>
    %480 = math.tanh %479 : vector<2x2xf32>
    %cst_150 = arith.constant 1.000000e+00 : f32
    %481 = vector.broadcast %cst_150 : f32 to vector<2x2xf32>
    %482 = arith.subf %481, %475 : vector<2x2xf32>
    %483 = arith.mulf %482, %480 : vector<2x2xf32>
    %484 = arith.mulf %475, %413 : vector<2x2xf32>
    %485 = arith.addf %483, %484 : vector<2x2xf32>
    %486 = vector.extract_strided_slice %13 {offsets = [1, 0, 0], sizes = [1, 2, 6], strides = [1, 1, 1]} : vector<8x2x6xf32> to vector<1x2x6xf32>
    %487 = vector.shape_cast %486 : vector<1x2x6xf32> to vector<2x6xf32>
    %488 = vector.extract_strided_slice %487 {offsets = [0, 0], sizes = [2, 2], strides = [1, 1]} : vector<2x6xf32> to vector<2x2xf32>
    %489 = vector.extract_strided_slice %457 {offsets = [0, 0], sizes = [2, 2], strides = [1, 1]} : vector<2x6xf32> to vector<2x2xf32>
    %490 = arith.addf %488, %489 : vector<2x2xf32>
    %491 = arith.negf %490 : vector<2x2xf32>
    %492 = math.exp %491 : vector<2x2xf32>
    %cst_151 = arith.constant 1.000000e+00 : f32
    %493 = vector.broadcast %cst_151 : f32 to vector<2x2xf32>
    %494 = arith.addf %493, %492 : vector<2x2xf32>
    %495 = arith.divf %493, %494 : vector<2x2xf32>
    %496 = vector.extract_strided_slice %487 {offsets = [0, 2], sizes = [2, 2], strides = [1, 1]} : vector<2x6xf32> to vector<2x2xf32>
    %497 = vector.extract_strided_slice %457 {offsets = [0, 2], sizes = [2, 2], strides = [1, 1]} : vector<2x6xf32> to vector<2x2xf32>
    %498 = arith.addf %496, %497 : vector<2x2xf32>
    %499 = arith.negf %498 : vector<2x2xf32>
    %500 = math.exp %499 : vector<2x2xf32>
    %cst_152 = arith.constant 1.000000e+00 : f32
    %501 = vector.broadcast %cst_152 : f32 to vector<2x2xf32>
    %502 = arith.addf %501, %500 : vector<2x2xf32>
    %503 = arith.divf %501, %502 : vector<2x2xf32>
    %504 = vector.extract_strided_slice %487 {offsets = [0, 4], sizes = [2, 2], strides = [1, 1]} : vector<2x6xf32> to vector<2x2xf32>
    %505 = vector.extract_strided_slice %457 {offsets = [0, 4], sizes = [2, 2], strides = [1, 1]} : vector<2x6xf32> to vector<2x2xf32>
    %506 = arith.mulf %495, %505 : vector<2x2xf32>
    %507 = arith.addf %504, %506 : vector<2x2xf32>
    %508 = math.tanh %507 : vector<2x2xf32>
    %cst_153 = arith.constant 1.000000e+00 : f32
    %509 = vector.broadcast %cst_153 : f32 to vector<2x2xf32>
    %510 = arith.subf %509, %503 : vector<2x2xf32>
    %511 = arith.mulf %510, %508 : vector<2x2xf32>
    %512 = arith.mulf %503, %441 : vector<2x2xf32>
    %513 = arith.addf %511, %512 : vector<2x2xf32>
    %c6_154 = arith.constant 6 : index
    %c0_155 = arith.constant 0 : index
    %c0_156 = arith.constant 0 : index
    %514 = vector.load %arg27[%c6_154, %c0_155, %c0_156] : memref<8x2x2xf32, #tpu.memory_space<vmem>>, vector<1x2x2xf32>
    %515 = vector.shape_cast %514 : vector<1x2x2xf32> to vector<2x2xf32>
    %516 = vector.shape_cast %485 : vector<2x2xf32> to vector<1x2x2xf32>
    tpu.vector_store %arg27[%c6_154, %c0_155, %c0_156], %516 {strides = array<i32>} : memref<8x2x2xf32, #tpu.memory_space<vmem>>, vector<1x2x2xf32>,
    %c1_157 = arith.constant 1 : index
    %c0_158 = arith.constant 0 : index
    %c0_159 = arith.constant 0 : index
    %517 = vector.load %arg28[%c1_157, %c0_158, %c0_159] : memref<8x2x2xf32, #tpu.memory_space<vmem>>, vector<1x2x2xf32>
    %518 = vector.shape_cast %517 : vector<1x2x2xf32> to vector<2x2xf32>
    %519 = vector.shape_cast %513 : vector<2x2xf32> to vector<1x2x2xf32>
    tpu.vector_store %arg28[%c1_157, %c0_158, %c0_159], %519 {strides = array<i32>} : memref<8x2x2xf32, #tpu.memory_space<vmem>>, vector<1x2x2xf32>,
    %c0_160 = arith.constant 0 : index
    %c0_161 = arith.constant 0 : index
    %520 = vector.load %arg2[%c0_160, %c0_161] : memref<2x6xf32, #tpu.memory_space<vmem>>, vector<2x6xf32>
    %cst_162 = arith.constant dense<0.000000e+00> : vector<2x6xf32>
    %521 = tpu.matmul %485, %520, %cst_162 {dimension_numbers = #tpu.dot_dimension_numbers<[1], [0], [0], [1], [0, 0, 1, 1], [], []>} : vector<2x2xf32>, vector<2x6xf32>, vector<2x6xf32> -> vector<2x6xf32>
    %c0_163 = arith.constant 0 : index
    %c0_164 = arith.constant 0 : index
    %522 = vector.load %arg4[%c0_163, %c0_164] : memref<1x6xf32, #tpu.memory_space<vmem>>, vector<1x6xf32>
    %523 = vector.broadcast %522 : vector<1x6xf32> to vector<2x6xf32>
    %524 = arith.addf %521, %523 : vector<2x6xf32>
    %c0_165 = arith.constant 0 : index
    %c0_166 = arith.constant 0 : index
    %525 = vector.load %arg6[%c0_165, %c0_166] : memref<2x6xf32, #tpu.memory_space<vmem>>, vector<2x6xf32>
    %cst_167 = arith.constant dense<0.000000e+00> : vector<2x6xf32>
    %526 = tpu.matmul %513, %525, %cst_167 {dimension_numbers = #tpu.dot_dimension_numbers<[1], [0], [0], [1], [0, 0, 1, 1], [], []>} : vector<2x2xf32>, vector<2x6xf32>, vector<2x6xf32> -> vector<2x6xf32>
    %c0_168 = arith.constant 0 : index
    %c0_169 = arith.constant 0 : index
    %527 = vector.load %arg8[%c0_168, %c0_169] : memref<1x6xf32, #tpu.memory_space<vmem>>, vector<1x6xf32>
    %528 = vector.broadcast %527 : vector<1x6xf32> to vector<2x6xf32>
    %529 = arith.addf %526, %528 : vector<2x6xf32>
    %530 = vector.extract_strided_slice %7 {offsets = [7, 0, 0], sizes = [1, 2, 6], strides = [1, 1, 1]} : vector<8x2x6xf32> to vector<1x2x6xf32>
    %531 = vector.shape_cast %530 : vector<1x2x6xf32> to vector<2x6xf32>
    %532 = vector.extract_strided_slice %531 {offsets = [0, 0], sizes = [2, 2], strides = [1, 1]} : vector<2x6xf32> to vector<2x2xf32>
    %533 = vector.extract_strided_slice %524 {offsets = [0, 0], sizes = [2, 2], strides = [1, 1]} : vector<2x6xf32> to vector<2x2xf32>
    %534 = arith.addf %532, %533 : vector<2x2xf32>
    %535 = arith.negf %534 : vector<2x2xf32>
    %536 = math.exp %535 : vector<2x2xf32>
    %cst_170 = arith.constant 1.000000e+00 : f32
    %537 = vector.broadcast %cst_170 : f32 to vector<2x2xf32>
    %538 = arith.addf %537, %536 : vector<2x2xf32>
    %539 = arith.divf %537, %538 : vector<2x2xf32>
    %540 = vector.extract_strided_slice %531 {offsets = [0, 2], sizes = [2, 2], strides = [1, 1]} : vector<2x6xf32> to vector<2x2xf32>
    %541 = vector.extract_strided_slice %524 {offsets = [0, 2], sizes = [2, 2], strides = [1, 1]} : vector<2x6xf32> to vector<2x2xf32>
    %542 = arith.addf %540, %541 : vector<2x2xf32>
    %543 = arith.negf %542 : vector<2x2xf32>
    %544 = math.exp %543 : vector<2x2xf32>
    %cst_171 = arith.constant 1.000000e+00 : f32
    %545 = vector.broadcast %cst_171 : f32 to vector<2x2xf32>
    %546 = arith.addf %545, %544 : vector<2x2xf32>
    %547 = arith.divf %545, %546 : vector<2x2xf32>
    %548 = vector.extract_strided_slice %531 {offsets = [0, 4], sizes = [2, 2], strides = [1, 1]} : vector<2x6xf32> to vector<2x2xf32>
    %549 = vector.extract_strided_slice %524 {offsets = [0, 4], sizes = [2, 2], strides = [1, 1]} : vector<2x6xf32> to vector<2x2xf32>
    %550 = arith.mulf %539, %549 : vector<2x2xf32>
    %551 = arith.addf %548, %550 : vector<2x2xf32>
    %552 = math.tanh %551 : vector<2x2xf32>
    %cst_172 = arith.constant 1.000000e+00 : f32
    %553 = vector.broadcast %cst_172 : f32 to vector<2x2xf32>
    %554 = arith.subf %553, %547 : vector<2x2xf32>
    %555 = arith.mulf %554, %552 : vector<2x2xf32>
    %556 = arith.mulf %547, %485 : vector<2x2xf32>
    %557 = arith.addf %555, %556 : vector<2x2xf32>
    %558 = vector.extract_strided_slice %13 {offsets = [0, 0, 0], sizes = [1, 2, 6], strides = [1, 1, 1]} : vector<8x2x6xf32> to vector<1x2x6xf32>
    %559 = vector.shape_cast %558 : vector<1x2x6xf32> to vector<2x6xf32>
    %560 = vector.extract_strided_slice %559 {offsets = [0, 0], sizes = [2, 2], strides = [1, 1]} : vector<2x6xf32> to vector<2x2xf32>
    %561 = vector.extract_strided_slice %529 {offsets = [0, 0], sizes = [2, 2], strides = [1, 1]} : vector<2x6xf32> to vector<2x2xf32>
    %562 = arith.addf %560, %561 : vector<2x2xf32>
    %563 = arith.negf %562 : vector<2x2xf32>
    %564 = math.exp %563 : vector<2x2xf32>
    %cst_173 = arith.constant 1.000000e+00 : f32
    %565 = vector.broadcast %cst_173 : f32 to vector<2x2xf32>
    %566 = arith.addf %565, %564 : vector<2x2xf32>
    %567 = arith.divf %565, %566 : vector<2x2xf32>
    %568 = vector.extract_strided_slice %559 {offsets = [0, 2], sizes = [2, 2], strides = [1, 1]} : vector<2x6xf32> to vector<2x2xf32>
    %569 = vector.extract_strided_slice %529 {offsets = [0, 2], sizes = [2, 2], strides = [1, 1]} : vector<2x6xf32> to vector<2x2xf32>
    %570 = arith.addf %568, %569 : vector<2x2xf32>
    %571 = arith.negf %570 : vector<2x2xf32>
    %572 = math.exp %571 : vector<2x2xf32>
    %cst_174 = arith.constant 1.000000e+00 : f32
    %573 = vector.broadcast %cst_174 : f32 to vector<2x2xf32>
    %574 = arith.addf %573, %572 : vector<2x2xf32>
    %575 = arith.divf %573, %574 : vector<2x2xf32>
    %576 = vector.extract_strided_slice %559 {offsets = [0, 4], sizes = [2, 2], strides = [1, 1]} : vector<2x6xf32> to vector<2x2xf32>
    %577 = vector.extract_strided_slice %529 {offsets = [0, 4], sizes = [2, 2], strides = [1, 1]} : vector<2x6xf32> to vector<2x2xf32>
    %578 = arith.mulf %567, %577 : vector<2x2xf32>
    %579 = arith.addf %576, %578 : vector<2x2xf32>
    %580 = math.tanh %579 : vector<2x2xf32>
    %cst_175 = arith.constant 1.000000e+00 : f32
    %581 = vector.broadcast %cst_175 : f32 to vector<2x2xf32>
    %582 = arith.subf %581, %575 : vector<2x2xf32>
    %583 = arith.mulf %582, %580 : vector<2x2xf32>
    %584 = arith.mulf %575, %513 : vector<2x2xf32>
    %585 = arith.addf %583, %584 : vector<2x2xf32>
    %c7_176 = arith.constant 7 : index
    %c0_177 = arith.constant 0 : index
    %c0_178 = arith.constant 0 : index
    %586 = vector.load %arg27[%c7_176, %c0_177, %c0_178] : memref<8x2x2xf32, #tpu.memory_space<vmem>>, vector<1x2x2xf32>
    %587 = vector.shape_cast %586 : vector<1x2x2xf32> to vector<2x2xf32>
    %588 = vector.shape_cast %557 : vector<2x2xf32> to vector<1x2x2xf32>
    tpu.vector_store %arg27[%c7_176, %c0_177, %c0_178], %588 {strides = array<i32>} : memref<8x2x2xf32, #tpu.memory_space<vmem>>, vector<1x2x2xf32>,
    %c0_179 = arith.constant 0 : index
    %c0_180 = arith.constant 0 : index
    %c0_181 = arith.constant 0 : index
    %589 = vector.load %arg28[%c0_179, %c0_180, %c0_181] : memref<8x2x2xf32, #tpu.memory_space<vmem>>, vector<1x2x2xf32>
    %590 = vector.shape_cast %589 : vector<1x2x2xf32> to vector<2x2xf32>
    %591 = vector.shape_cast %585 : vector<2x2xf32> to vector<1x2x2xf32>
    tpu.vector_store %arg28[%c0_179, %c0_180, %c0_181], %591 {strides = array<i32>} : memref<8x2x2xf32, #tpu.memory_space<vmem>>, vector<1x2x2xf32>,
    %c0_182 = arith.constant 0 : index
    %c0_183 = arith.constant 0 : index
    %c0_184 = arith.constant 0 : index
    %592 = vector.load %arg27[%c0_182, %c0_183, %c0_184] : memref<8x2x2xf32, #tpu.memory_space<vmem>>, vector<8x2x2xf32>
    %593 = vector.shape_cast %592 : vector<8x2x2xf32> to vector<16x2xf32>
    %c0_185 = arith.constant 0 : index
    %c0_186 = arith.constant 0 : index
    %c0_187 = arith.constant 0 : index
    %594 = vector.load %arg28[%c0_185, %c0_186, %c0_187] : memref<8x2x2xf32, #tpu.memory_space<vmem>>, vector<8x2x2xf32>
    %595 = vector.shape_cast %594 : vector<8x2x2xf32> to vector<16x2xf32>
    %c0_188 = arith.constant 0 : index
    %c0_189 = arith.constant 0 : index
    %596 = vector.load %arg9[%c0_188, %c0_189] : memref<2x6xf32, #tpu.memory_space<vmem>>, vector<2x6xf32>
    %cst_190 = arith.constant dense<0.000000e+00> : vector<16x6xf32>
    %597 = tpu.matmul %593, %596, %cst_190 {dimension_numbers = #tpu.dot_dimension_numbers<[1], [0], [0], [1], [0, 0, 1, 1], [], []>} : vector<16x2xf32>, vector<2x6xf32>, vector<16x6xf32> -> vector<16x6xf32>
    %c0_191 = arith.constant 0 : index
    %c0_192 = arith.constant 0 : index
    %598 = vector.load %arg10[%c0_191, %c0_192] : memref<2x6xf32, #tpu.memory_space<vmem>>, vector<2x6xf32>
    %cst_193 = arith.constant dense<0.000000e+00> : vector<16x6xf32>
    %599 = tpu.matmul %595, %598, %cst_193 {dimension_numbers = #tpu.dot_dimension_numbers<[1], [0], [0], [1], [0, 0, 1, 1], [], []>} : vector<16x2xf32>, vector<2x6xf32>, vector<16x6xf32> -> vector<16x6xf32>
    %600 = arith.addf %597, %599 : vector<16x6xf32>
    %c0_194 = arith.constant 0 : index
    %c0_195 = arith.constant 0 : index
    %601 = vector.load %arg12[%c0_194, %c0_195] : memref<1x6xf32, #tpu.memory_space<vmem>>, vector<1x6xf32>
    %602 = vector.broadcast %601 : vector<1x6xf32> to vector<16x6xf32>
    %603 = arith.addf %600, %602 : vector<16x6xf32>
    %604 = vector.shape_cast %603 : vector<16x6xf32> to vector<8x2x6xf32>
    %c0_196 = arith.constant 0 : index
    %c0_197 = arith.constant 0 : index
    %605 = vector.load %arg14[%c0_196, %c0_197] : memref<2x6xf32, #tpu.memory_space<vmem>>, vector<2x6xf32>
    %cst_198 = arith.constant dense<0.000000e+00> : vector<16x6xf32>
    %606 = tpu.matmul %593, %605, %cst_198 {dimension_numbers = #tpu.dot_dimension_numbers<[1], [0], [0], [1], [0, 0, 1, 1], [], []>} : vector<16x2xf32>, vector<2x6xf32>, vector<16x6xf32> -> vector<16x6xf32>
    %c0_199 = arith.constant 0 : index
    %c0_200 = arith.constant 0 : index
    %607 = vector.load %arg15[%c0_199, %c0_200] : memref<2x6xf32, #tpu.memory_space<vmem>>, vector<2x6xf32>
    %cst_201 = arith.constant dense<0.000000e+00> : vector<16x6xf32>
    %608 = tpu.matmul %595, %607, %cst_201 {dimension_numbers = #tpu.dot_dimension_numbers<[1], [0], [0], [1], [0, 0, 1, 1], [], []>} : vector<16x2xf32>, vector<2x6xf32>, vector<16x6xf32> -> vector<16x6xf32>
    %609 = arith.addf %606, %608 : vector<16x6xf32>
    %c0_202 = arith.constant 0 : index
    %c0_203 = arith.constant 0 : index
    %610 = vector.load %arg17[%c0_202, %c0_203] : memref<1x6xf32, #tpu.memory_space<vmem>>, vector<1x6xf32>
    %611 = vector.broadcast %610 : vector<1x6xf32> to vector<16x6xf32>
    %612 = arith.addf %609, %611 : vector<16x6xf32>
    %613 = vector.shape_cast %612 : vector<16x6xf32> to vector<8x2x6xf32>
    %cst_204 = arith.constant 0.000000e+00 : f32
    %614 = vector.broadcast %cst_204 : f32 to vector<2x2xf32>
    %cst_205 = arith.constant 0.000000e+00 : f32
    %615 = vector.broadcast %cst_205 : f32 to vector<2x2xf32>
    %cst_206 = arith.constant 0.000000e+00 : f32
    %616 = vector.broadcast %cst_206 : f32 to vector<2x50xf32>
    %c0_207 = arith.constant 0 : index
    %c0_208 = arith.constant 0 : index
    %617 = vector.load %arg11[%c0_207, %c0_208] : memref<2x6xf32, #tpu.memory_space<vmem>>, vector<2x6xf32>
    %cst_209 = arith.constant dense<0.000000e+00> : vector<2x6xf32>
    %618 = tpu.matmul %614, %617, %cst_209 {dimension_numbers = #tpu.dot_dimension_numbers<[1], [0], [0], [1], [0, 0, 1, 1], [], []>} : vector<2x2xf32>, vector<2x6xf32>, vector<2x6xf32> -> vector<2x6xf32>
    %c0_210 = arith.constant 0 : index
    %c0_211 = arith.constant 0 : index
    %619 = vector.load %arg13[%c0_210, %c0_211] : memref<1x6xf32, #tpu.memory_space<vmem>>, vector<1x6xf32>
    %620 = vector.broadcast %619 : vector<1x6xf32> to vector<2x6xf32>
    %621 = arith.addf %618, %620 : vector<2x6xf32>
    %c0_212 = arith.constant 0 : index
    %c0_213 = arith.constant 0 : index
    %622 = vector.load %arg16[%c0_212, %c0_213] : memref<2x6xf32, #tpu.memory_space<vmem>>, vector<2x6xf32>
    %cst_214 = arith.constant dense<0.000000e+00> : vector<2x6xf32>
    %623 = tpu.matmul %615, %622, %cst_214 {dimension_numbers = #tpu.dot_dimension_numbers<[1], [0], [0], [1], [0, 0, 1, 1], [], []>} : vector<2x2xf32>, vector<2x6xf32>, vector<2x6xf32> -> vector<2x6xf32>
    %c0_215 = arith.constant 0 : index
    %c0_216 = arith.constant 0 : index
    %624 = vector.load %arg18[%c0_215, %c0_216] : memref<1x6xf32, #tpu.memory_space<vmem>>, vector<1x6xf32>
    %625 = vector.broadcast %624 : vector<1x6xf32> to vector<2x6xf32>
    %626 = arith.addf %623, %625 : vector<2x6xf32>
    %627 = vector.extract_strided_slice %604 {offsets = [0, 0, 0], sizes = [1, 2, 6], strides = [1, 1, 1]} : vector<8x2x6xf32> to vector<1x2x6xf32>
    %628 = vector.shape_cast %627 : vector<1x2x6xf32> to vector<2x6xf32>
    %629 = vector.extract_strided_slice %628 {offsets = [0, 0], sizes = [2, 2], strides = [1, 1]} : vector<2x6xf32> to vector<2x2xf32>
    %630 = vector.extract_strided_slice %621 {offsets = [0, 0], sizes = [2, 2], strides = [1, 1]} : vector<2x6xf32> to vector<2x2xf32>
    %631 = arith.addf %629, %630 : vector<2x2xf32>
    %632 = arith.negf %631 : vector<2x2xf32>
    %633 = math.exp %632 : vector<2x2xf32>
    %cst_217 = arith.constant 1.000000e+00 : f32
    %634 = vector.broadcast %cst_217 : f32 to vector<2x2xf32>
    %635 = arith.addf %634, %633 : vector<2x2xf32>
    %636 = arith.divf %634, %635 : vector<2x2xf32>
    %637 = vector.extract_strided_slice %628 {offsets = [0, 2], sizes = [2, 2], strides = [1, 1]} : vector<2x6xf32> to vector<2x2xf32>
    %638 = vector.extract_strided_slice %621 {offsets = [0, 2], sizes = [2, 2], strides = [1, 1]} : vector<2x6xf32> to vector<2x2xf32>
    %639 = arith.addf %637, %638 : vector<2x2xf32>
    %640 = arith.negf %639 : vector<2x2xf32>
    %641 = math.exp %640 : vector<2x2xf32>
    %cst_218 = arith.constant 1.000000e+00 : f32
    %642 = vector.broadcast %cst_218 : f32 to vector<2x2xf32>
    %643 = arith.addf %642, %641 : vector<2x2xf32>
    %644 = arith.divf %642, %643 : vector<2x2xf32>
    %645 = vector.extract_strided_slice %628 {offsets = [0, 4], sizes = [2, 2], strides = [1, 1]} : vector<2x6xf32> to vector<2x2xf32>
    %646 = vector.extract_strided_slice %621 {offsets = [0, 4], sizes = [2, 2], strides = [1, 1]} : vector<2x6xf32> to vector<2x2xf32>
    %647 = arith.mulf %636, %646 : vector<2x2xf32>
    %648 = arith.addf %645, %647 : vector<2x2xf32>
    %649 = math.tanh %648 : vector<2x2xf32>
    %cst_219 = arith.constant 1.000000e+00 : f32
    %650 = vector.broadcast %cst_219 : f32 to vector<2x2xf32>
    %651 = arith.subf %650, %644 : vector<2x2xf32>
    %652 = arith.mulf %651, %649 : vector<2x2xf32>
    %653 = arith.mulf %644, %614 : vector<2x2xf32>
    %654 = arith.addf %652, %653 : vector<2x2xf32>
    %655 = vector.extract_strided_slice %613 {offsets = [7, 0, 0], sizes = [1, 2, 6], strides = [1, 1, 1]} : vector<8x2x6xf32> to vector<1x2x6xf32>
    %656 = vector.shape_cast %655 : vector<1x2x6xf32> to vector<2x6xf32>
    %657 = vector.extract_strided_slice %656 {offsets = [0, 0], sizes = [2, 2], strides = [1, 1]} : vector<2x6xf32> to vector<2x2xf32>
    %658 = vector.extract_strided_slice %626 {offsets = [0, 0], sizes = [2, 2], strides = [1, 1]} : vector<2x6xf32> to vector<2x2xf32>
    %659 = arith.addf %657, %658 : vector<2x2xf32>
    %660 = arith.negf %659 : vector<2x2xf32>
    %661 = math.exp %660 : vector<2x2xf32>
    %cst_220 = arith.constant 1.000000e+00 : f32
    %662 = vector.broadcast %cst_220 : f32 to vector<2x2xf32>
    %663 = arith.addf %662, %661 : vector<2x2xf32>
    %664 = arith.divf %662, %663 : vector<2x2xf32>
    %665 = vector.extract_strided_slice %656 {offsets = [0, 2], sizes = [2, 2], strides = [1, 1]} : vector<2x6xf32> to vector<2x2xf32>
    %666 = vector.extract_strided_slice %626 {offsets = [0, 2], sizes = [2, 2], strides = [1, 1]} : vector<2x6xf32> to vector<2x2xf32>
    %667 = arith.addf %665, %666 : vector<2x2xf32>
    %668 = arith.negf %667 : vector<2x2xf32>
    %669 = math.exp %668 : vector<2x2xf32>
    %cst_221 = arith.constant 1.000000e+00 : f32
    %670 = vector.broadcast %cst_221 : f32 to vector<2x2xf32>
    %671 = arith.addf %670, %669 : vector<2x2xf32>
    %672 = arith.divf %670, %671 : vector<2x2xf32>
    %673 = vector.extract_strided_slice %656 {offsets = [0, 4], sizes = [2, 2], strides = [1, 1]} : vector<2x6xf32> to vector<2x2xf32>
    %674 = vector.extract_strided_slice %626 {offsets = [0, 4], sizes = [2, 2], strides = [1, 1]} : vector<2x6xf32> to vector<2x2xf32>
    %675 = arith.mulf %664, %674 : vector<2x2xf32>
    %676 = arith.addf %673, %675 : vector<2x2xf32>
    %677 = math.tanh %676 : vector<2x2xf32>
    %cst_222 = arith.constant 1.000000e+00 : f32
    %678 = vector.broadcast %cst_222 : f32 to vector<2x2xf32>
    %679 = arith.subf %678, %672 : vector<2x2xf32>
    %680 = arith.mulf %679, %677 : vector<2x2xf32>
    %681 = arith.mulf %672, %615 : vector<2x2xf32>
    %682 = arith.addf %680, %681 : vector<2x2xf32>
    %c0_223 = arith.constant 0 : index
    %c0_224 = arith.constant 0 : index
    %c0_225 = arith.constant 0 : index
    %683 = vector.load %arg19[%c0_223, %c0_224, %c0_225] : memref<8x2x50xf32, #tpu.memory_space<vmem>>, vector<1x2x50xf32>
    %684 = vector.shape_cast %683 : vector<1x2x50xf32> to vector<2x50xf32>
    %cst_226 = arith.constant dense<0.000000e+00> : vector<2x50xf32>
    %685 = tpu.matmul %654, %684, %cst_226 {dimension_numbers = #tpu.dot_dimension_numbers<[1], [0], [0], [1], [0, 0, 1, 1], [], []>} : vector<2x2xf32>, vector<2x50xf32>, vector<2x50xf32> -> vector<2x50xf32>
    %686 = arith.addf %616, %685 : vector<2x50xf32>
    %c7_227 = arith.constant 7 : index
    %c0_228 = arith.constant 0 : index
    %c0_229 = arith.constant 0 : index
    %687 = vector.load %arg20[%c7_227, %c0_228, %c0_229] : memref<8x2x50xf32, #tpu.memory_space<vmem>>, vector<1x2x50xf32>
    %688 = vector.shape_cast %687 : vector<1x2x50xf32> to vector<2x50xf32>
    %cst_230 = arith.constant dense<0.000000e+00> : vector<2x50xf32>
    %689 = tpu.matmul %682, %688, %cst_230 {dimension_numbers = #tpu.dot_dimension_numbers<[1], [0], [0], [1], [0, 0, 1, 1], [], []>} : vector<2x2xf32>, vector<2x50xf32>, vector<2x50xf32> -> vector<2x50xf32>
    %690 = arith.addf %686, %689 : vector<2x50xf32>
    %c0_231 = arith.constant 0 : index
    %c0_232 = arith.constant 0 : index
    %691 = vector.load %arg11[%c0_231, %c0_232] : memref<2x6xf32, #tpu.memory_space<vmem>>, vector<2x6xf32>
    %cst_233 = arith.constant dense<0.000000e+00> : vector<2x6xf32>
    %692 = tpu.matmul %654, %691, %cst_233 {dimension_numbers = #tpu.dot_dimension_numbers<[1], [0], [0], [1], [0, 0, 1, 1], [], []>} : vector<2x2xf32>, vector<2x6xf32>, vector<2x6xf32> -> vector<2x6xf32>
    %c0_234 = arith.constant 0 : index
    %c0_235 = arith.constant 0 : index
    %693 = vector.load %arg13[%c0_234, %c0_235] : memref<1x6xf32, #tpu.memory_space<vmem>>, vector<1x6xf32>
    %694 = vector.broadcast %693 : vector<1x6xf32> to vector<2x6xf32>
    %695 = arith.addf %692, %694 : vector<2x6xf32>
    %c0_236 = arith.constant 0 : index
    %c0_237 = arith.constant 0 : index
    %696 = vector.load %arg16[%c0_236, %c0_237] : memref<2x6xf32, #tpu.memory_space<vmem>>, vector<2x6xf32>
    %cst_238 = arith.constant dense<0.000000e+00> : vector<2x6xf32>
    %697 = tpu.matmul %682, %696, %cst_238 {dimension_numbers = #tpu.dot_dimension_numbers<[1], [0], [0], [1], [0, 0, 1, 1], [], []>} : vector<2x2xf32>, vector<2x6xf32>, vector<2x6xf32> -> vector<2x6xf32>
    %c0_239 = arith.constant 0 : index
    %c0_240 = arith.constant 0 : index
    %698 = vector.load %arg18[%c0_239, %c0_240] : memref<1x6xf32, #tpu.memory_space<vmem>>, vector<1x6xf32>
    %699 = vector.broadcast %698 : vector<1x6xf32> to vector<2x6xf32>
    %700 = arith.addf %697, %699 : vector<2x6xf32>
    %701 = vector.extract_strided_slice %604 {offsets = [1, 0, 0], sizes = [1, 2, 6], strides = [1, 1, 1]} : vector<8x2x6xf32> to vector<1x2x6xf32>
    %702 = vector.shape_cast %701 : vector<1x2x6xf32> to vector<2x6xf32>
    %703 = vector.extract_strided_slice %702 {offsets = [0, 0], sizes = [2, 2], strides = [1, 1]} : vector<2x6xf32> to vector<2x2xf32>
    %704 = vector.extract_strided_slice %695 {offsets = [0, 0], sizes = [2, 2], strides = [1, 1]} : vector<2x6xf32> to vector<2x2xf32>
    %705 = arith.addf %703, %704 : vector<2x2xf32>
    %706 = arith.negf %705 : vector<2x2xf32>
    %707 = math.exp %706 : vector<2x2xf32>
    %cst_241 = arith.constant 1.000000e+00 : f32
    %708 = vector.broadcast %cst_241 : f32 to vector<2x2xf32>
    %709 = arith.addf %708, %707 : vector<2x2xf32>
    %710 = arith.divf %708, %709 : vector<2x2xf32>
    %711 = vector.extract_strided_slice %702 {offsets = [0, 2], sizes = [2, 2], strides = [1, 1]} : vector<2x6xf32> to vector<2x2xf32>
    %712 = vector.extract_strided_slice %695 {offsets = [0, 2], sizes = [2, 2], strides = [1, 1]} : vector<2x6xf32> to vector<2x2xf32>
    %713 = arith.addf %711, %712 : vector<2x2xf32>
    %714 = arith.negf %713 : vector<2x2xf32>
    %715 = math.exp %714 : vector<2x2xf32>
    %cst_242 = arith.constant 1.000000e+00 : f32
    %716 = vector.broadcast %cst_242 : f32 to vector<2x2xf32>
    %717 = arith.addf %716, %715 : vector<2x2xf32>
    %718 = arith.divf %716, %717 : vector<2x2xf32>
    %719 = vector.extract_strided_slice %702 {offsets = [0, 4], sizes = [2, 2], strides = [1, 1]} : vector<2x6xf32> to vector<2x2xf32>
    %720 = vector.extract_strided_slice %695 {offsets = [0, 4], sizes = [2, 2], strides = [1, 1]} : vector<2x6xf32> to vector<2x2xf32>
    %721 = arith.mulf %710, %720 : vector<2x2xf32>
    %722 = arith.addf %719, %721 : vector<2x2xf32>
    %723 = math.tanh %722 : vector<2x2xf32>
    %cst_243 = arith.constant 1.000000e+00 : f32
    %724 = vector.broadcast %cst_243 : f32 to vector<2x2xf32>
    %725 = arith.subf %724, %718 : vector<2x2xf32>
    %726 = arith.mulf %725, %723 : vector<2x2xf32>
    %727 = arith.mulf %718, %654 : vector<2x2xf32>
    %728 = arith.addf %726, %727 : vector<2x2xf32>
    %729 = vector.extract_strided_slice %613 {offsets = [6, 0, 0], sizes = [1, 2, 6], strides = [1, 1, 1]} : vector<8x2x6xf32> to vector<1x2x6xf32>
    %730 = vector.shape_cast %729 : vector<1x2x6xf32> to vector<2x6xf32>
    %731 = vector.extract_strided_slice %730 {offsets = [0, 0], sizes = [2, 2], strides = [1, 1]} : vector<2x6xf32> to vector<2x2xf32>
    %732 = vector.extract_strided_slice %700 {offsets = [0, 0], sizes = [2, 2], strides = [1, 1]} : vector<2x6xf32> to vector<2x2xf32>
    %733 = arith.addf %731, %732 : vector<2x2xf32>
    %734 = arith.negf %733 : vector<2x2xf32>
    %735 = math.exp %734 : vector<2x2xf32>
    %cst_244 = arith.constant 1.000000e+00 : f32
    %736 = vector.broadcast %cst_244 : f32 to vector<2x2xf32>
    %737 = arith.addf %736, %735 : vector<2x2xf32>
    %738 = arith.divf %736, %737 : vector<2x2xf32>
    %739 = vector.extract_strided_slice %730 {offsets = [0, 2], sizes = [2, 2], strides = [1, 1]} : vector<2x6xf32> to vector<2x2xf32>
    %740 = vector.extract_strided_slice %700 {offsets = [0, 2], sizes = [2, 2], strides = [1, 1]} : vector<2x6xf32> to vector<2x2xf32>
    %741 = arith.addf %739, %740 : vector<2x2xf32>
    %742 = arith.negf %741 : vector<2x2xf32>
    %743 = math.exp %742 : vector<2x2xf32>
    %cst_245 = arith.constant 1.000000e+00 : f32
    %744 = vector.broadcast %cst_245 : f32 to vector<2x2xf32>
    %745 = arith.addf %744, %743 : vector<2x2xf32>
    %746 = arith.divf %744, %745 : vector<2x2xf32>
    %747 = vector.extract_strided_slice %730 {offsets = [0, 4], sizes = [2, 2], strides = [1, 1]} : vector<2x6xf32> to vector<2x2xf32>
    %748 = vector.extract_strided_slice %700 {offsets = [0, 4], sizes = [2, 2], strides = [1, 1]} : vector<2x6xf32> to vector<2x2xf32>
    %749 = arith.mulf %738, %748 : vector<2x2xf32>
    %750 = arith.addf %747, %749 : vector<2x2xf32>
    %751 = math.tanh %750 : vector<2x2xf32>
    %cst_246 = arith.constant 1.000000e+00 : f32
    %752 = vector.broadcast %cst_246 : f32 to vector<2x2xf32>
    %753 = arith.subf %752, %746 : vector<2x2xf32>
    %754 = arith.mulf %753, %751 : vector<2x2xf32>
    %755 = arith.mulf %746, %682 : vector<2x2xf32>
    %756 = arith.addf %754, %755 : vector<2x2xf32>
    %c1_247 = arith.constant 1 : index
    %c0_248 = arith.constant 0 : index
    %c0_249 = arith.constant 0 : index
    %757 = vector.load %arg19[%c1_247, %c0_248, %c0_249] : memref<8x2x50xf32, #tpu.memory_space<vmem>>, vector<1x2x50xf32>
    %758 = vector.shape_cast %757 : vector<1x2x50xf32> to vector<2x50xf32>
    %cst_250 = arith.constant dense<0.000000e+00> : vector<2x50xf32>
    %759 = tpu.matmul %728, %758, %cst_250 {dimension_numbers = #tpu.dot_dimension_numbers<[1], [0], [0], [1], [0, 0, 1, 1], [], []>} : vector<2x2xf32>, vector<2x50xf32>, vector<2x50xf32> -> vector<2x50xf32>
    %760 = arith.addf %690, %759 : vector<2x50xf32>
    %c6_251 = arith.constant 6 : index
    %c0_252 = arith.constant 0 : index
    %c0_253 = arith.constant 0 : index
    %761 = vector.load %arg20[%c6_251, %c0_252, %c0_253] : memref<8x2x50xf32, #tpu.memory_space<vmem>>, vector<1x2x50xf32>
    %762 = vector.shape_cast %761 : vector<1x2x50xf32> to vector<2x50xf32>
    %cst_254 = arith.constant dense<0.000000e+00> : vector<2x50xf32>
    %763 = tpu.matmul %756, %762, %cst_254 {dimension_numbers = #tpu.dot_dimension_numbers<[1], [0], [0], [1], [0, 0, 1, 1], [], []>} : vector<2x2xf32>, vector<2x50xf32>, vector<2x50xf32> -> vector<2x50xf32>
    %764 = arith.addf %760, %763 : vector<2x50xf32>
    %c0_255 = arith.constant 0 : index
    %c0_256 = arith.constant 0 : index
    %765 = vector.load %arg11[%c0_255, %c0_256] : memref<2x6xf32, #tpu.memory_space<vmem>>, vector<2x6xf32>
    %cst_257 = arith.constant dense<0.000000e+00> : vector<2x6xf32>
    %766 = tpu.matmul %728, %765, %cst_257 {dimension_numbers = #tpu.dot_dimension_numbers<[1], [0], [0], [1], [0, 0, 1, 1], [], []>} : vector<2x2xf32>, vector<2x6xf32>, vector<2x6xf32> -> vector<2x6xf32>
    %c0_258 = arith.constant 0 : index
    %c0_259 = arith.constant 0 : index
    %767 = vector.load %arg13[%c0_258, %c0_259] : memref<1x6xf32, #tpu.memory_space<vmem>>, vector<1x6xf32>
    %768 = vector.broadcast %767 : vector<1x6xf32> to vector<2x6xf32>
    %769 = arith.addf %766, %768 : vector<2x6xf32>
    %c0_260 = arith.constant 0 : index
    %c0_261 = arith.constant 0 : index
    %770 = vector.load %arg16[%c0_260, %c0_261] : memref<2x6xf32, #tpu.memory_space<vmem>>, vector<2x6xf32>
    %cst_262 = arith.constant dense<0.000000e+00> : vector<2x6xf32>
    %771 = tpu.matmul %756, %770, %cst_262 {dimension_numbers = #tpu.dot_dimension_numbers<[1], [0], [0], [1], [0, 0, 1, 1], [], []>} : vector<2x2xf32>, vector<2x6xf32>, vector<2x6xf32> -> vector<2x6xf32>
    %c0_263 = arith.constant 0 : index
    %c0_264 = arith.constant 0 : index
    %772 = vector.load %arg18[%c0_263, %c0_264] : memref<1x6xf32, #tpu.memory_space<vmem>>, vector<1x6xf32>
    %773 = vector.broadcast %772 : vector<1x6xf32> to vector<2x6xf32>
    %774 = arith.addf %771, %773 : vector<2x6xf32>
    %775 = vector.extract_strided_slice %604 {offsets = [2, 0, 0], sizes = [1, 2, 6], strides = [1, 1, 1]} : vector<8x2x6xf32> to vector<1x2x6xf32>
    %776 = vector.shape_cast %775 : vector<1x2x6xf32> to vector<2x6xf32>
    %777 = vector.extract_strided_slice %776 {offsets = [0, 0], sizes = [2, 2], strides = [1, 1]} : vector<2x6xf32> to vector<2x2xf32>
    %778 = vector.extract_strided_slice %769 {offsets = [0, 0], sizes = [2, 2], strides = [1, 1]} : vector<2x6xf32> to vector<2x2xf32>
    %779 = arith.addf %777, %778 : vector<2x2xf32>
    %780 = arith.negf %779 : vector<2x2xf32>
    %781 = math.exp %780 : vector<2x2xf32>
    %cst_265 = arith.constant 1.000000e+00 : f32
    %782 = vector.broadcast %cst_265 : f32 to vector<2x2xf32>
    %783 = arith.addf %782, %781 : vector<2x2xf32>
    %784 = arith.divf %782, %783 : vector<2x2xf32>
    %785 = vector.extract_strided_slice %776 {offsets = [0, 2], sizes = [2, 2], strides = [1, 1]} : vector<2x6xf32> to vector<2x2xf32>
    %786 = vector.extract_strided_slice %769 {offsets = [0, 2], sizes = [2, 2], strides = [1, 1]} : vector<2x6xf32> to vector<2x2xf32>
    %787 = arith.addf %785, %786 : vector<2x2xf32>
    %788 = arith.negf %787 : vector<2x2xf32>
    %789 = math.exp %788 : vector<2x2xf32>
    %cst_266 = arith.constant 1.000000e+00 : f32
    %790 = vector.broadcast %cst_266 : f32 to vector<2x2xf32>
    %791 = arith.addf %790, %789 : vector<2x2xf32>
    %792 = arith.divf %790, %791 : vector<2x2xf32>
    %793 = vector.extract_strided_slice %776 {offsets = [0, 4], sizes = [2, 2], strides = [1, 1]} : vector<2x6xf32> to vector<2x2xf32>
    %794 = vector.extract_strided_slice %769 {offsets = [0, 4], sizes = [2, 2], strides = [1, 1]} : vector<2x6xf32> to vector<2x2xf32>
    %795 = arith.mulf %784, %794 : vector<2x2xf32>
    %796 = arith.addf %793, %795 : vector<2x2xf32>
    %797 = math.tanh %796 : vector<2x2xf32>
    %cst_267 = arith.constant 1.000000e+00 : f32
    %798 = vector.broadcast %cst_267 : f32 to vector<2x2xf32>
    %799 = arith.subf %798, %792 : vector<2x2xf32>
    %800 = arith.mulf %799, %797 : vector<2x2xf32>
    %801 = arith.mulf %792, %728 : vector<2x2xf32>
    %802 = arith.addf %800, %801 : vector<2x2xf32>
    %803 = vector.extract_strided_slice %613 {offsets = [5, 0, 0], sizes = [1, 2, 6], strides = [1, 1, 1]} : vector<8x2x6xf32> to vector<1x2x6xf32>
    %804 = vector.shape_cast %803 : vector<1x2x6xf32> to vector<2x6xf32>
    %805 = vector.extract_strided_slice %804 {offsets = [0, 0], sizes = [2, 2], strides = [1, 1]} : vector<2x6xf32> to vector<2x2xf32>
    %806 = vector.extract_strided_slice %774 {offsets = [0, 0], sizes = [2, 2], strides = [1, 1]} : vector<2x6xf32> to vector<2x2xf32>
    %807 = arith.addf %805, %806 : vector<2x2xf32>
    %808 = arith.negf %807 : vector<2x2xf32>
    %809 = math.exp %808 : vector<2x2xf32>
    %cst_268 = arith.constant 1.000000e+00 : f32
    %810 = vector.broadcast %cst_268 : f32 to vector<2x2xf32>
    %811 = arith.addf %810, %809 : vector<2x2xf32>
    %812 = arith.divf %810, %811 : vector<2x2xf32>
    %813 = vector.extract_strided_slice %804 {offsets = [0, 2], sizes = [2, 2], strides = [1, 1]} : vector<2x6xf32> to vector<2x2xf32>
    %814 = vector.extract_strided_slice %774 {offsets = [0, 2], sizes = [2, 2], strides = [1, 1]} : vector<2x6xf32> to vector<2x2xf32>
    %815 = arith.addf %813, %814 : vector<2x2xf32>
    %816 = arith.negf %815 : vector<2x2xf32>
    %817 = math.exp %816 : vector<2x2xf32>
    %cst_269 = arith.constant 1.000000e+00 : f32
    %818 = vector.broadcast %cst_269 : f32 to vector<2x2xf32>
    %819 = arith.addf %818, %817 : vector<2x2xf32>
    %820 = arith.divf %818, %819 : vector<2x2xf32>
    %821 = vector.extract_strided_slice %804 {offsets = [0, 4], sizes = [2, 2], strides = [1, 1]} : vector<2x6xf32> to vector<2x2xf32>
    %822 = vector.extract_strided_slice %774 {offsets = [0, 4], sizes = [2, 2], strides = [1, 1]} : vector<2x6xf32> to vector<2x2xf32>
    %823 = arith.mulf %812, %822 : vector<2x2xf32>
    %824 = arith.addf %821, %823 : vector<2x2xf32>
    %825 = math.tanh %824 : vector<2x2xf32>
    %cst_270 = arith.constant 1.000000e+00 : f32
    %826 = vector.broadcast %cst_270 : f32 to vector<2x2xf32>
    %827 = arith.subf %826, %820 : vector<2x2xf32>
    %828 = arith.mulf %827, %825 : vector<2x2xf32>
    %829 = arith.mulf %820, %756 : vector<2x2xf32>
    %830 = arith.addf %828, %829 : vector<2x2xf32>
    %c2_271 = arith.constant 2 : index
    %c0_272 = arith.constant 0 : index
    %c0_273 = arith.constant 0 : index
    %831 = vector.load %arg19[%c2_271, %c0_272, %c0_273] : memref<8x2x50xf32, #tpu.memory_space<vmem>>, vector<1x2x50xf32>
    %832 = vector.shape_cast %831 : vector<1x2x50xf32> to vector<2x50xf32>
    %cst_274 = arith.constant dense<0.000000e+00> : vector<2x50xf32>
    %833 = tpu.matmul %802, %832, %cst_274 {dimension_numbers = #tpu.dot_dimension_numbers<[1], [0], [0], [1], [0, 0, 1, 1], [], []>} : vector<2x2xf32>, vector<2x50xf32>, vector<2x50xf32> -> vector<2x50xf32>
    %834 = arith.addf %764, %833 : vector<2x50xf32>
    %c5_275 = arith.constant 5 : index
    %c0_276 = arith.constant 0 : index
    %c0_277 = arith.constant 0 : index
    %835 = vector.load %arg20[%c5_275, %c0_276, %c0_277] : memref<8x2x50xf32, #tpu.memory_space<vmem>>, vector<1x2x50xf32>
    %836 = vector.shape_cast %835 : vector<1x2x50xf32> to vector<2x50xf32>
    %cst_278 = arith.constant dense<0.000000e+00> : vector<2x50xf32>
    %837 = tpu.matmul %830, %836, %cst_278 {dimension_numbers = #tpu.dot_dimension_numbers<[1], [0], [0], [1], [0, 0, 1, 1], [], []>} : vector<2x2xf32>, vector<2x50xf32>, vector<2x50xf32> -> vector<2x50xf32>
    %838 = arith.addf %834, %837 : vector<2x50xf32>
    %c0_279 = arith.constant 0 : index
    %c0_280 = arith.constant 0 : index
    %839 = vector.load %arg11[%c0_279, %c0_280] : memref<2x6xf32, #tpu.memory_space<vmem>>, vector<2x6xf32>
    %cst_281 = arith.constant dense<0.000000e+00> : vector<2x6xf32>
    %840 = tpu.matmul %802, %839, %cst_281 {dimension_numbers = #tpu.dot_dimension_numbers<[1], [0], [0], [1], [0, 0, 1, 1], [], []>} : vector<2x2xf32>, vector<2x6xf32>, vector<2x6xf32> -> vector<2x6xf32>
    %c0_282 = arith.constant 0 : index
    %c0_283 = arith.constant 0 : index
    %841 = vector.load %arg13[%c0_282, %c0_283] : memref<1x6xf32, #tpu.memory_space<vmem>>, vector<1x6xf32>
    %842 = vector.broadcast %841 : vector<1x6xf32> to vector<2x6xf32>
    %843 = arith.addf %840, %842 : vector<2x6xf32>
    %c0_284 = arith.constant 0 : index
    %c0_285 = arith.constant 0 : index
    %844 = vector.load %arg16[%c0_284, %c0_285] : memref<2x6xf32, #tpu.memory_space<vmem>>, vector<2x6xf32>
    %cst_286 = arith.constant dense<0.000000e+00> : vector<2x6xf32>
    %845 = tpu.matmul %830, %844, %cst_286 {dimension_numbers = #tpu.dot_dimension_numbers<[1], [0], [0], [1], [0, 0, 1, 1], [], []>} : vector<2x2xf32>, vector<2x6xf32>, vector<2x6xf32> -> vector<2x6xf32>
    %c0_287 = arith.constant 0 : index
    %c0_288 = arith.constant 0 : index
    %846 = vector.load %arg18[%c0_287, %c0_288] : memref<1x6xf32, #tpu.memory_space<vmem>>, vector<1x6xf32>
    %847 = vector.broadcast %846 : vector<1x6xf32> to vector<2x6xf32>
    %848 = arith.addf %845, %847 : vector<2x6xf32>
    %849 = vector.extract_strided_slice %604 {offsets = [3, 0, 0], sizes = [1, 2, 6], strides = [1, 1, 1]} : vector<8x2x6xf32> to vector<1x2x6xf32>
    %850 = vector.shape_cast %849 : vector<1x2x6xf32> to vector<2x6xf32>
    %851 = vector.extract_strided_slice %850 {offsets = [0, 0], sizes = [2, 2], strides = [1, 1]} : vector<2x6xf32> to vector<2x2xf32>
    %852 = vector.extract_strided_slice %843 {offsets = [0, 0], sizes = [2, 2], strides = [1, 1]} : vector<2x6xf32> to vector<2x2xf32>
    %853 = arith.addf %851, %852 : vector<2x2xf32>
    %854 = arith.negf %853 : vector<2x2xf32>
    %855 = math.exp %854 : vector<2x2xf32>
    %cst_289 = arith.constant 1.000000e+00 : f32
    %856 = vector.broadcast %cst_289 : f32 to vector<2x2xf32>
    %857 = arith.addf %856, %855 : vector<2x2xf32>
    %858 = arith.divf %856, %857 : vector<2x2xf32>
    %859 = vector.extract_strided_slice %850 {offsets = [0, 2], sizes = [2, 2], strides = [1, 1]} : vector<2x6xf32> to vector<2x2xf32>
    %860 = vector.extract_strided_slice %843 {offsets = [0, 2], sizes = [2, 2], strides = [1, 1]} : vector<2x6xf32> to vector<2x2xf32>
    %861 = arith.addf %859, %860 : vector<2x2xf32>
    %862 = arith.negf %861 : vector<2x2xf32>
    %863 = math.exp %862 : vector<2x2xf32>
    %cst_290 = arith.constant 1.000000e+00 : f32
    %864 = vector.broadcast %cst_290 : f32 to vector<2x2xf32>
    %865 = arith.addf %864, %863 : vector<2x2xf32>
    %866 = arith.divf %864, %865 : vector<2x2xf32>
    %867 = vector.extract_strided_slice %850 {offsets = [0, 4], sizes = [2, 2], strides = [1, 1]} : vector<2x6xf32> to vector<2x2xf32>
    %868 = vector.extract_strided_slice %843 {offsets = [0, 4], sizes = [2, 2], strides = [1, 1]} : vector<2x6xf32> to vector<2x2xf32>
    %869 = arith.mulf %858, %868 : vector<2x2xf32>
    %870 = arith.addf %867, %869 : vector<2x2xf32>
    %871 = math.tanh %870 : vector<2x2xf32>
    %cst_291 = arith.constant 1.000000e+00 : f32
    %872 = vector.broadcast %cst_291 : f32 to vector<2x2xf32>
    %873 = arith.subf %872, %866 : vector<2x2xf32>
    %874 = arith.mulf %873, %871 : vector<2x2xf32>
    %875 = arith.mulf %866, %802 : vector<2x2xf32>
    %876 = arith.addf %874, %875 : vector<2x2xf32>
    %877 = vector.extract_strided_slice %613 {offsets = [4, 0, 0], sizes = [1, 2, 6], strides = [1, 1, 1]} : vector<8x2x6xf32> to vector<1x2x6xf32>
    %878 = vector.shape_cast %877 : vector<1x2x6xf32> to vector<2x6xf32>
    %879 = vector.extract_strided_slice %878 {offsets = [0, 0], sizes = [2, 2], strides = [1, 1]} : vector<2x6xf32> to vector<2x2xf32>
    %880 = vector.extract_strided_slice %848 {offsets = [0, 0], sizes = [2, 2], strides = [1, 1]} : vector<2x6xf32> to vector<2x2xf32>
    %881 = arith.addf %879, %880 : vector<2x2xf32>
    %882 = arith.negf %881 : vector<2x2xf32>
    %883 = math.exp %882 : vector<2x2xf32>
    %cst_292 = arith.constant 1.000000e+00 : f32
    %884 = vector.broadcast %cst_292 : f32 to vector<2x2xf32>
    %885 = arith.addf %884, %883 : vector<2x2xf32>
    %886 = arith.divf %884, %885 : vector<2x2xf32>
    %887 = vector.extract_strided_slice %878 {offsets = [0, 2], sizes = [2, 2], strides = [1, 1]} : vector<2x6xf32> to vector<2x2xf32>
    %888 = vector.extract_strided_slice %848 {offsets = [0, 2], sizes = [2, 2], strides = [1, 1]} : vector<2x6xf32> to vector<2x2xf32>
    %889 = arith.addf %887, %888 : vector<2x2xf32>
    %890 = arith.negf %889 : vector<2x2xf32>
    %891 = math.exp %890 : vector<2x2xf32>
    %cst_293 = arith.constant 1.000000e+00 : f32
    %892 = vector.broadcast %cst_293 : f32 to vector<2x2xf32>
    %893 = arith.addf %892, %891 : vector<2x2xf32>
    %894 = arith.divf %892, %893 : vector<2x2xf32>
    %895 = vector.extract_strided_slice %878 {offsets = [0, 4], sizes = [2, 2], strides = [1, 1]} : vector<2x6xf32> to vector<2x2xf32>
    %896 = vector.extract_strided_slice %848 {offsets = [0, 4], sizes = [2, 2], strides = [1, 1]} : vector<2x6xf32> to vector<2x2xf32>
    %897 = arith.mulf %886, %896 : vector<2x2xf32>
    %898 = arith.addf %895, %897 : vector<2x2xf32>
    %899 = math.tanh %898 : vector<2x2xf32>
    %cst_294 = arith.constant 1.000000e+00 : f32
    %900 = vector.broadcast %cst_294 : f32 to vector<2x2xf32>
    %901 = arith.subf %900, %894 : vector<2x2xf32>
    %902 = arith.mulf %901, %899 : vector<2x2xf32>
    %903 = arith.mulf %894, %830 : vector<2x2xf32>
    %904 = arith.addf %902, %903 : vector<2x2xf32>
    %c3_295 = arith.constant 3 : index
    %c0_296 = arith.constant 0 : index
    %c0_297 = arith.constant 0 : index
    %905 = vector.load %arg19[%c3_295, %c0_296, %c0_297] : memref<8x2x50xf32, #tpu.memory_space<vmem>>, vector<1x2x50xf32>
    %906 = vector.shape_cast %905 : vector<1x2x50xf32> to vector<2x50xf32>
    %cst_298 = arith.constant dense<0.000000e+00> : vector<2x50xf32>
    %907 = tpu.matmul %876, %906, %cst_298 {dimension_numbers = #tpu.dot_dimension_numbers<[1], [0], [0], [1], [0, 0, 1, 1], [], []>} : vector<2x2xf32>, vector<2x50xf32>, vector<2x50xf32> -> vector<2x50xf32>
    %908 = arith.addf %838, %907 : vector<2x50xf32>
    %c4_299 = arith.constant 4 : index
    %c0_300 = arith.constant 0 : index
    %c0_301 = arith.constant 0 : index
    %909 = vector.load %arg20[%c4_299, %c0_300, %c0_301] : memref<8x2x50xf32, #tpu.memory_space<vmem>>, vector<1x2x50xf32>
    %910 = vector.shape_cast %909 : vector<1x2x50xf32> to vector<2x50xf32>
    %cst_302 = arith.constant dense<0.000000e+00> : vector<2x50xf32>
    %911 = tpu.matmul %904, %910, %cst_302 {dimension_numbers = #tpu.dot_dimension_numbers<[1], [0], [0], [1], [0, 0, 1, 1], [], []>} : vector<2x2xf32>, vector<2x50xf32>, vector<2x50xf32> -> vector<2x50xf32>
    %912 = arith.addf %908, %911 : vector<2x50xf32>
    %c0_303 = arith.constant 0 : index
    %c0_304 = arith.constant 0 : index
    %913 = vector.load %arg11[%c0_303, %c0_304] : memref<2x6xf32, #tpu.memory_space<vmem>>, vector<2x6xf32>
    %cst_305 = arith.constant dense<0.000000e+00> : vector<2x6xf32>
    %914 = tpu.matmul %876, %913, %cst_305 {dimension_numbers = #tpu.dot_dimension_numbers<[1], [0], [0], [1], [0, 0, 1, 1], [], []>} : vector<2x2xf32>, vector<2x6xf32>, vector<2x6xf32> -> vector<2x6xf32>
    %c0_306 = arith.constant 0 : index
    %c0_307 = arith.constant 0 : index
    %915 = vector.load %arg13[%c0_306, %c0_307] : memref<1x6xf32, #tpu.memory_space<vmem>>, vector<1x6xf32>
    %916 = vector.broadcast %915 : vector<1x6xf32> to vector<2x6xf32>
    %917 = arith.addf %914, %916 : vector<2x6xf32>
    %c0_308 = arith.constant 0 : index
    %c0_309 = arith.constant 0 : index
    %918 = vector.load %arg16[%c0_308, %c0_309] : memref<2x6xf32, #tpu.memory_space<vmem>>, vector<2x6xf32>
    %cst_310 = arith.constant dense<0.000000e+00> : vector<2x6xf32>
    %919 = tpu.matmul %904, %918, %cst_310 {dimension_numbers = #tpu.dot_dimension_numbers<[1], [0], [0], [1], [0, 0, 1, 1], [], []>} : vector<2x2xf32>, vector<2x6xf32>, vector<2x6xf32> -> vector<2x6xf32>
    %c0_311 = arith.constant 0 : index
    %c0_312 = arith.constant 0 : index
    %920 = vector.load %arg18[%c0_311, %c0_312] : memref<1x6xf32, #tpu.memory_space<vmem>>, vector<1x6xf32>
    %921 = vector.broadcast %920 : vector<1x6xf32> to vector<2x6xf32>
    %922 = arith.addf %919, %921 : vector<2x6xf32>
    %923 = vector.extract_strided_slice %604 {offsets = [4, 0, 0], sizes = [1, 2, 6], strides = [1, 1, 1]} : vector<8x2x6xf32> to vector<1x2x6xf32>
    %924 = vector.shape_cast %923 : vector<1x2x6xf32> to vector<2x6xf32>
    %925 = vector.extract_strided_slice %924 {offsets = [0, 0], sizes = [2, 2], strides = [1, 1]} : vector<2x6xf32> to vector<2x2xf32>
    %926 = vector.extract_strided_slice %917 {offsets = [0, 0], sizes = [2, 2], strides = [1, 1]} : vector<2x6xf32> to vector<2x2xf32>
    %927 = arith.addf %925, %926 : vector<2x2xf32>
    %928 = arith.negf %927 : vector<2x2xf32>
    %929 = math.exp %928 : vector<2x2xf32>
    %cst_313 = arith.constant 1.000000e+00 : f32
    %930 = vector.broadcast %cst_313 : f32 to vector<2x2xf32>
    %931 = arith.addf %930, %929 : vector<2x2xf32>
    %932 = arith.divf %930, %931 : vector<2x2xf32>
    %933 = vector.extract_strided_slice %924 {offsets = [0, 2], sizes = [2, 2], strides = [1, 1]} : vector<2x6xf32> to vector<2x2xf32>
    %934 = vector.extract_strided_slice %917 {offsets = [0, 2], sizes = [2, 2], strides = [1, 1]} : vector<2x6xf32> to vector<2x2xf32>
    %935 = arith.addf %933, %934 : vector<2x2xf32>
    %936 = arith.negf %935 : vector<2x2xf32>
    %937 = math.exp %936 : vector<2x2xf32>
    %cst_314 = arith.constant 1.000000e+00 : f32
    %938 = vector.broadcast %cst_314 : f32 to vector<2x2xf32>
    %939 = arith.addf %938, %937 : vector<2x2xf32>
    %940 = arith.divf %938, %939 : vector<2x2xf32>
    %941 = vector.extract_strided_slice %924 {offsets = [0, 4], sizes = [2, 2], strides = [1, 1]} : vector<2x6xf32> to vector<2x2xf32>
    %942 = vector.extract_strided_slice %917 {offsets = [0, 4], sizes = [2, 2], strides = [1, 1]} : vector<2x6xf32> to vector<2x2xf32>
    %943 = arith.mulf %932, %942 : vector<2x2xf32>
    %944 = arith.addf %941, %943 : vector<2x2xf32>
    %945 = math.tanh %944 : vector<2x2xf32>
    %cst_315 = arith.constant 1.000000e+00 : f32
    %946 = vector.broadcast %cst_315 : f32 to vector<2x2xf32>
    %947 = arith.subf %946, %940 : vector<2x2xf32>
    %948 = arith.mulf %947, %945 : vector<2x2xf32>
    %949 = arith.mulf %940, %876 : vector<2x2xf32>
    %950 = arith.addf %948, %949 : vector<2x2xf32>
    %951 = vector.extract_strided_slice %613 {offsets = [3, 0, 0], sizes = [1, 2, 6], strides = [1, 1, 1]} : vector<8x2x6xf32> to vector<1x2x6xf32>
    %952 = vector.shape_cast %951 : vector<1x2x6xf32> to vector<2x6xf32>
    %953 = vector.extract_strided_slice %952 {offsets = [0, 0], sizes = [2, 2], strides = [1, 1]} : vector<2x6xf32> to vector<2x2xf32>
    %954 = vector.extract_strided_slice %922 {offsets = [0, 0], sizes = [2, 2], strides = [1, 1]} : vector<2x6xf32> to vector<2x2xf32>
    %955 = arith.addf %953, %954 : vector<2x2xf32>
    %956 = arith.negf %955 : vector<2x2xf32>
    %957 = math.exp %956 : vector<2x2xf32>
    %cst_316 = arith.constant 1.000000e+00 : f32
    %958 = vector.broadcast %cst_316 : f32 to vector<2x2xf32>
    %959 = arith.addf %958, %957 : vector<2x2xf32>
    %960 = arith.divf %958, %959 : vector<2x2xf32>
    %961 = vector.extract_strided_slice %952 {offsets = [0, 2], sizes = [2, 2], strides = [1, 1]} : vector<2x6xf32> to vector<2x2xf32>
    %962 = vector.extract_strided_slice %922 {offsets = [0, 2], sizes = [2, 2], strides = [1, 1]} : vector<2x6xf32> to vector<2x2xf32>
    %963 = arith.addf %961, %962 : vector<2x2xf32>
    %964 = arith.negf %963 : vector<2x2xf32>
    %965 = math.exp %964 : vector<2x2xf32>
    %cst_317 = arith.constant 1.000000e+00 : f32
    %966 = vector.broadcast %cst_317 : f32 to vector<2x2xf32>
    %967 = arith.addf %966, %965 : vector<2x2xf32>
    %968 = arith.divf %966, %967 : vector<2x2xf32>
    %969 = vector.extract_strided_slice %952 {offsets = [0, 4], sizes = [2, 2], strides = [1, 1]} : vector<2x6xf32> to vector<2x2xf32>
    %970 = vector.extract_strided_slice %922 {offsets = [0, 4], sizes = [2, 2], strides = [1, 1]} : vector<2x6xf32> to vector<2x2xf32>
    %971 = arith.mulf %960, %970 : vector<2x2xf32>
    %972 = arith.addf %969, %971 : vector<2x2xf32>
    %973 = math.tanh %972 : vector<2x2xf32>
    %cst_318 = arith.constant 1.000000e+00 : f32
    %974 = vector.broadcast %cst_318 : f32 to vector<2x2xf32>
    %975 = arith.subf %974, %968 : vector<2x2xf32>
    %976 = arith.mulf %975, %973 : vector<2x2xf32>
    %977 = arith.mulf %968, %904 : vector<2x2xf32>
    %978 = arith.addf %976, %977 : vector<2x2xf32>
    %c4_319 = arith.constant 4 : index
    %c0_320 = arith.constant 0 : index
    %c0_321 = arith.constant 0 : index
    %979 = vector.load %arg19[%c4_319, %c0_320, %c0_321] : memref<8x2x50xf32, #tpu.memory_space<vmem>>, vector<1x2x50xf32>
    %980 = vector.shape_cast %979 : vector<1x2x50xf32> to vector<2x50xf32>
    %cst_322 = arith.constant dense<0.000000e+00> : vector<2x50xf32>
    %981 = tpu.matmul %950, %980, %cst_322 {dimension_numbers = #tpu.dot_dimension_numbers<[1], [0], [0], [1], [0, 0, 1, 1], [], []>} : vector<2x2xf32>, vector<2x50xf32>, vector<2x50xf32> -> vector<2x50xf32>
    %982 = arith.addf %912, %981 : vector<2x50xf32>
    %c3_323 = arith.constant 3 : index
    %c0_324 = arith.constant 0 : index
    %c0_325 = arith.constant 0 : index
    %983 = vector.load %arg20[%c3_323, %c0_324, %c0_325] : memref<8x2x50xf32, #tpu.memory_space<vmem>>, vector<1x2x50xf32>
    %984 = vector.shape_cast %983 : vector<1x2x50xf32> to vector<2x50xf32>
    %cst_326 = arith.constant dense<0.000000e+00> : vector<2x50xf32>
    %985 = tpu.matmul %978, %984, %cst_326 {dimension_numbers = #tpu.dot_dimension_numbers<[1], [0], [0], [1], [0, 0, 1, 1], [], []>} : vector<2x2xf32>, vector<2x50xf32>, vector<2x50xf32> -> vector<2x50xf32>
    %986 = arith.addf %982, %985 : vector<2x50xf32>
    %c0_327 = arith.constant 0 : index
    %c0_328 = arith.constant 0 : index
    %987 = vector.load %arg11[%c0_327, %c0_328] : memref<2x6xf32, #tpu.memory_space<vmem>>, vector<2x6xf32>
    %cst_329 = arith.constant dense<0.000000e+00> : vector<2x6xf32>
    %988 = tpu.matmul %950, %987, %cst_329 {dimension_numbers = #tpu.dot_dimension_numbers<[1], [0], [0], [1], [0, 0, 1, 1], [], []>} : vector<2x2xf32>, vector<2x6xf32>, vector<2x6xf32> -> vector<2x6xf32>
    %c0_330 = arith.constant 0 : index
    %c0_331 = arith.constant 0 : index
    %989 = vector.load %arg13[%c0_330, %c0_331] : memref<1x6xf32, #tpu.memory_space<vmem>>, vector<1x6xf32>
    %990 = vector.broadcast %989 : vector<1x6xf32> to vector<2x6xf32>
    %991 = arith.addf %988, %990 : vector<2x6xf32>
    %c0_332 = arith.constant 0 : index
    %c0_333 = arith.constant 0 : index
    %992 = vector.load %arg16[%c0_332, %c0_333] : memref<2x6xf32, #tpu.memory_space<vmem>>, vector<2x6xf32>
    %cst_334 = arith.constant dense<0.000000e+00> : vector<2x6xf32>
    %993 = tpu.matmul %978, %992, %cst_334 {dimension_numbers = #tpu.dot_dimension_numbers<[1], [0], [0], [1], [0, 0, 1, 1], [], []>} : vector<2x2xf32>, vector<2x6xf32>, vector<2x6xf32> -> vector<2x6xf32>
    %c0_335 = arith.constant 0 : index
    %c0_336 = arith.constant 0 : index
    %994 = vector.load %arg18[%c0_335, %c0_336] : memref<1x6xf32, #tpu.memory_space<vmem>>, vector<1x6xf32>
    %995 = vector.broadcast %994 : vector<1x6xf32> to vector<2x6xf32>
    %996 = arith.addf %993, %995 : vector<2x6xf32>
    %997 = vector.extract_strided_slice %604 {offsets = [5, 0, 0], sizes = [1, 2, 6], strides = [1, 1, 1]} : vector<8x2x6xf32> to vector<1x2x6xf32>
    %998 = vector.shape_cast %997 : vector<1x2x6xf32> to vector<2x6xf32>
    %999 = vector.extract_strided_slice %998 {offsets = [0, 0], sizes = [2, 2], strides = [1, 1]} : vector<2x6xf32> to vector<2x2xf32>
    %1000 = vector.extract_strided_slice %991 {offsets = [0, 0], sizes = [2, 2], strides = [1, 1]} : vector<2x6xf32> to vector<2x2xf32>
    %1001 = arith.addf %999, %1000 : vector<2x2xf32>
    %1002 = arith.negf %1001 : vector<2x2xf32>
    %1003 = math.exp %1002 : vector<2x2xf32>
    %cst_337 = arith.constant 1.000000e+00 : f32
    %1004 = vector.broadcast %cst_337 : f32 to vector<2x2xf32>
    %1005 = arith.addf %1004, %1003 : vector<2x2xf32>
    %1006 = arith.divf %1004, %1005 : vector<2x2xf32>
    %1007 = vector.extract_strided_slice %998 {offsets = [0, 2], sizes = [2, 2], strides = [1, 1]} : vector<2x6xf32> to vector<2x2xf32>
    %1008 = vector.extract_strided_slice %991 {offsets = [0, 2], sizes = [2, 2], strides = [1, 1]} : vector<2x6xf32> to vector<2x2xf32>
    %1009 = arith.addf %1007, %1008 : vector<2x2xf32>
    %1010 = arith.negf %1009 : vector<2x2xf32>
    %1011 = math.exp %1010 : vector<2x2xf32>
    %cst_338 = arith.constant 1.000000e+00 : f32
    %1012 = vector.broadcast %cst_338 : f32 to vector<2x2xf32>
    %1013 = arith.addf %1012, %1011 : vector<2x2xf32>
    %1014 = arith.divf %1012, %1013 : vector<2x2xf32>
    %1015 = vector.extract_strided_slice %998 {offsets = [0, 4], sizes = [2, 2], strides = [1, 1]} : vector<2x6xf32> to vector<2x2xf32>
    %1016 = vector.extract_strided_slice %991 {offsets = [0, 4], sizes = [2, 2], strides = [1, 1]} : vector<2x6xf32> to vector<2x2xf32>
    %1017 = arith.mulf %1006, %1016 : vector<2x2xf32>
    %1018 = arith.addf %1015, %1017 : vector<2x2xf32>
    %1019 = math.tanh %1018 : vector<2x2xf32>
    %cst_339 = arith.constant 1.000000e+00 : f32
    %1020 = vector.broadcast %cst_339 : f32 to vector<2x2xf32>
    %1021 = arith.subf %1020, %1014 : vector<2x2xf32>
    %1022 = arith.mulf %1021, %1019 : vector<2x2xf32>
    %1023 = arith.mulf %1014, %950 : vector<2x2xf32>
    %1024 = arith.addf %1022, %1023 : vector<2x2xf32>
    %1025 = vector.extract_strided_slice %613 {offsets = [2, 0, 0], sizes = [1, 2, 6], strides = [1, 1, 1]} : vector<8x2x6xf32> to vector<1x2x6xf32>
    %1026 = vector.shape_cast %1025 : vector<1x2x6xf32> to vector<2x6xf32>
    %1027 = vector.extract_strided_slice %1026 {offsets = [0, 0], sizes = [2, 2], strides = [1, 1]} : vector<2x6xf32> to vector<2x2xf32>
    %1028 = vector.extract_strided_slice %996 {offsets = [0, 0], sizes = [2, 2], strides = [1, 1]} : vector<2x6xf32> to vector<2x2xf32>
    %1029 = arith.addf %1027, %1028 : vector<2x2xf32>
    %1030 = arith.negf %1029 : vector<2x2xf32>
    %1031 = math.exp %1030 : vector<2x2xf32>
    %cst_340 = arith.constant 1.000000e+00 : f32
    %1032 = vector.broadcast %cst_340 : f32 to vector<2x2xf32>
    %1033 = arith.addf %1032, %1031 : vector<2x2xf32>
    %1034 = arith.divf %1032, %1033 : vector<2x2xf32>
    %1035 = vector.extract_strided_slice %1026 {offsets = [0, 2], sizes = [2, 2], strides = [1, 1]} : vector<2x6xf32> to vector<2x2xf32>
    %1036 = vector.extract_strided_slice %996 {offsets = [0, 2], sizes = [2, 2], strides = [1, 1]} : vector<2x6xf32> to vector<2x2xf32>
    %1037 = arith.addf %1035, %1036 : vector<2x2xf32>
    %1038 = arith.negf %1037 : vector<2x2xf32>
    %1039 = math.exp %1038 : vector<2x2xf32>
    %cst_341 = arith.constant 1.000000e+00 : f32
    %1040 = vector.broadcast %cst_341 : f32 to vector<2x2xf32>
    %1041 = arith.addf %1040, %1039 : vector<2x2xf32>
    %1042 = arith.divf %1040, %1041 : vector<2x2xf32>
    %1043 = vector.extract_strided_slice %1026 {offsets = [0, 4], sizes = [2, 2], strides = [1, 1]} : vector<2x6xf32> to vector<2x2xf32>
    %1044 = vector.extract_strided_slice %996 {offsets = [0, 4], sizes = [2, 2], strides = [1, 1]} : vector<2x6xf32> to vector<2x2xf32>
    %1045 = arith.mulf %1034, %1044 : vector<2x2xf32>
    %1046 = arith.addf %1043, %1045 : vector<2x2xf32>
    %1047 = math.tanh %1046 : vector<2x2xf32>
    %cst_342 = arith.constant 1.000000e+00 : f32
    %1048 = vector.broadcast %cst_342 : f32 to vector<2x2xf32>
    %1049 = arith.subf %1048, %1042 : vector<2x2xf32>
    %1050 = arith.mulf %1049, %1047 : vector<2x2xf32>
    %1051 = arith.mulf %1042, %978 : vector<2x2xf32>
    %1052 = arith.addf %1050, %1051 : vector<2x2xf32>
    %c5_343 = arith.constant 5 : index
    %c0_344 = arith.constant 0 : index
    %c0_345 = arith.constant 0 : index
    %1053 = vector.load %arg19[%c5_343, %c0_344, %c0_345] : memref<8x2x50xf32, #tpu.memory_space<vmem>>, vector<1x2x50xf32>
    %1054 = vector.shape_cast %1053 : vector<1x2x50xf32> to vector<2x50xf32>
    %cst_346 = arith.constant dense<0.000000e+00> : vector<2x50xf32>
    %1055 = tpu.matmul %1024, %1054, %cst_346 {dimension_numbers = #tpu.dot_dimension_numbers<[1], [0], [0], [1], [0, 0, 1, 1], [], []>} : vector<2x2xf32>, vector<2x50xf32>, vector<2x50xf32> -> vector<2x50xf32>
    %1056 = arith.addf %986, %1055 : vector<2x50xf32>
    %c2_347 = arith.constant 2 : index
    %c0_348 = arith.constant 0 : index
    %c0_349 = arith.constant 0 : index
    %1057 = vector.load %arg20[%c2_347, %c0_348, %c0_349] : memref<8x2x50xf32, #tpu.memory_space<vmem>>, vector<1x2x50xf32>
    %1058 = vector.shape_cast %1057 : vector<1x2x50xf32> to vector<2x50xf32>
    %cst_350 = arith.constant dense<0.000000e+00> : vector<2x50xf32>
    %1059 = tpu.matmul %1052, %1058, %cst_350 {dimension_numbers = #tpu.dot_dimension_numbers<[1], [0], [0], [1], [0, 0, 1, 1], [], []>} : vector<2x2xf32>, vector<2x50xf32>, vector<2x50xf32> -> vector<2x50xf32>
    %1060 = arith.addf %1056, %1059 : vector<2x50xf32>
    %c0_351 = arith.constant 0 : index
    %c0_352 = arith.constant 0 : index
    %1061 = vector.load %arg11[%c0_351, %c0_352] : memref<2x6xf32, #tpu.memory_space<vmem>>, vector<2x6xf32>
    %cst_353 = arith.constant dense<0.000000e+00> : vector<2x6xf32>
    %1062 = tpu.matmul %1024, %1061, %cst_353 {dimension_numbers = #tpu.dot_dimension_numbers<[1], [0], [0], [1], [0, 0, 1, 1], [], []>} : vector<2x2xf32>, vector<2x6xf32>, vector<2x6xf32> -> vector<2x6xf32>
    %c0_354 = arith.constant 0 : index
    %c0_355 = arith.constant 0 : index
    %1063 = vector.load %arg13[%c0_354, %c0_355] : memref<1x6xf32, #tpu.memory_space<vmem>>, vector<1x6xf32>
    %1064 = vector.broadcast %1063 : vector<1x6xf32> to vector<2x6xf32>
    %1065 = arith.addf %1062, %1064 : vector<2x6xf32>
    %c0_356 = arith.constant 0 : index
    %c0_357 = arith.constant 0 : index
    %1066 = vector.load %arg16[%c0_356, %c0_357] : memref<2x6xf32, #tpu.memory_space<vmem>>, vector<2x6xf32>
    %cst_358 = arith.constant dense<0.000000e+00> : vector<2x6xf32>
    %1067 = tpu.matmul %1052, %1066, %cst_358 {dimension_numbers = #tpu.dot_dimension_numbers<[1], [0], [0], [1], [0, 0, 1, 1], [], []>} : vector<2x2xf32>, vector<2x6xf32>, vector<2x6xf32> -> vector<2x6xf32>
    %c0_359 = arith.constant 0 : index
    %c0_360 = arith.constant 0 : index
    %1068 = vector.load %arg18[%c0_359, %c0_360] : memref<1x6xf32, #tpu.memory_space<vmem>>, vector<1x6xf32>
    %1069 = vector.broadcast %1068 : vector<1x6xf32> to vector<2x6xf32>
    %1070 = arith.addf %1067, %1069 : vector<2x6xf32>
    %1071 = vector.extract_strided_slice %604 {offsets = [6, 0, 0], sizes = [1, 2, 6], strides = [1, 1, 1]} : vector<8x2x6xf32> to vector<1x2x6xf32>
    %1072 = vector.shape_cast %1071 : vector<1x2x6xf32> to vector<2x6xf32>
    %1073 = vector.extract_strided_slice %1072 {offsets = [0, 0], sizes = [2, 2], strides = [1, 1]} : vector<2x6xf32> to vector<2x2xf32>
    %1074 = vector.extract_strided_slice %1065 {offsets = [0, 0], sizes = [2, 2], strides = [1, 1]} : vector<2x6xf32> to vector<2x2xf32>
    %1075 = arith.addf %1073, %1074 : vector<2x2xf32>
    %1076 = arith.negf %1075 : vector<2x2xf32>
    %1077 = math.exp %1076 : vector<2x2xf32>
    %cst_361 = arith.constant 1.000000e+00 : f32
    %1078 = vector.broadcast %cst_361 : f32 to vector<2x2xf32>
    %1079 = arith.addf %1078, %1077 : vector<2x2xf32>
    %1080 = arith.divf %1078, %1079 : vector<2x2xf32>
    %1081 = vector.extract_strided_slice %1072 {offsets = [0, 2], sizes = [2, 2], strides = [1, 1]} : vector<2x6xf32> to vector<2x2xf32>
    %1082 = vector.extract_strided_slice %1065 {offsets = [0, 2], sizes = [2, 2], strides = [1, 1]} : vector<2x6xf32> to vector<2x2xf32>
    %1083 = arith.addf %1081, %1082 : vector<2x2xf32>
    %1084 = arith.negf %1083 : vector<2x2xf32>
    %1085 = math.exp %1084 : vector<2x2xf32>
    %cst_362 = arith.constant 1.000000e+00 : f32
    %1086 = vector.broadcast %cst_362 : f32 to vector<2x2xf32>
    %1087 = arith.addf %1086, %1085 : vector<2x2xf32>
    %1088 = arith.divf %1086, %1087 : vector<2x2xf32>
    %1089 = vector.extract_strided_slice %1072 {offsets = [0, 4], sizes = [2, 2], strides = [1, 1]} : vector<2x6xf32> to vector<2x2xf32>
    %1090 = vector.extract_strided_slice %1065 {offsets = [0, 4], sizes = [2, 2], strides = [1, 1]} : vector<2x6xf32> to vector<2x2xf32>
    %1091 = arith.mulf %1080, %1090 : vector<2x2xf32>
    %1092 = arith.addf %1089, %1091 : vector<2x2xf32>
    %1093 = math.tanh %1092 : vector<2x2xf32>
    %cst_363 = arith.constant 1.000000e+00 : f32
    %1094 = vector.broadcast %cst_363 : f32 to vector<2x2xf32>
    %1095 = arith.subf %1094, %1088 : vector<2x2xf32>
    %1096 = arith.mulf %1095, %1093 : vector<2x2xf32>
    %1097 = arith.mulf %1088, %1024 : vector<2x2xf32>
    %1098 = arith.addf %1096, %1097 : vector<2x2xf32>
    %1099 = vector.extract_strided_slice %613 {offsets = [1, 0, 0], sizes = [1, 2, 6], strides = [1, 1, 1]} : vector<8x2x6xf32> to vector<1x2x6xf32>
    %1100 = vector.shape_cast %1099 : vector<1x2x6xf32> to vector<2x6xf32>
    %1101 = vector.extract_strided_slice %1100 {offsets = [0, 0], sizes = [2, 2], strides = [1, 1]} : vector<2x6xf32> to vector<2x2xf32>
    %1102 = vector.extract_strided_slice %1070 {offsets = [0, 0], sizes = [2, 2], strides = [1, 1]} : vector<2x6xf32> to vector<2x2xf32>
    %1103 = arith.addf %1101, %1102 : vector<2x2xf32>
    %1104 = arith.negf %1103 : vector<2x2xf32>
    %1105 = math.exp %1104 : vector<2x2xf32>
    %cst_364 = arith.constant 1.000000e+00 : f32
    %1106 = vector.broadcast %cst_364 : f32 to vector<2x2xf32>
    %1107 = arith.addf %1106, %1105 : vector<2x2xf32>
    %1108 = arith.divf %1106, %1107 : vector<2x2xf32>
    %1109 = vector.extract_strided_slice %1100 {offsets = [0, 2], sizes = [2, 2], strides = [1, 1]} : vector<2x6xf32> to vector<2x2xf32>
    %1110 = vector.extract_strided_slice %1070 {offsets = [0, 2], sizes = [2, 2], strides = [1, 1]} : vector<2x6xf32> to vector<2x2xf32>
    %1111 = arith.addf %1109, %1110 : vector<2x2xf32>
    %1112 = arith.negf %1111 : vector<2x2xf32>
    %1113 = math.exp %1112 : vector<2x2xf32>
    %cst_365 = arith.constant 1.000000e+00 : f32
    %1114 = vector.broadcast %cst_365 : f32 to vector<2x2xf32>
    %1115 = arith.addf %1114, %1113 : vector<2x2xf32>
    %1116 = arith.divf %1114, %1115 : vector<2x2xf32>
    %1117 = vector.extract_strided_slice %1100 {offsets = [0, 4], sizes = [2, 2], strides = [1, 1]} : vector<2x6xf32> to vector<2x2xf32>
    %1118 = vector.extract_strided_slice %1070 {offsets = [0, 4], sizes = [2, 2], strides = [1, 1]} : vector<2x6xf32> to vector<2x2xf32>
    %1119 = arith.mulf %1108, %1118 : vector<2x2xf32>
    %1120 = arith.addf %1117, %1119 : vector<2x2xf32>
    %1121 = math.tanh %1120 : vector<2x2xf32>
    %cst_366 = arith.constant 1.000000e+00 : f32
    %1122 = vector.broadcast %cst_366 : f32 to vector<2x2xf32>
    %1123 = arith.subf %1122, %1116 : vector<2x2xf32>
    %1124 = arith.mulf %1123, %1121 : vector<2x2xf32>
    %1125 = arith.mulf %1116, %1052 : vector<2x2xf32>
    %1126 = arith.addf %1124, %1125 : vector<2x2xf32>
    %c6_367 = arith.constant 6 : index
    %c0_368 = arith.constant 0 : index
    %c0_369 = arith.constant 0 : index
    %1127 = vector.load %arg19[%c6_367, %c0_368, %c0_369] : memref<8x2x50xf32, #tpu.memory_space<vmem>>, vector<1x2x50xf32>
    %1128 = vector.shape_cast %1127 : vector<1x2x50xf32> to vector<2x50xf32>
    %cst_370 = arith.constant dense<0.000000e+00> : vector<2x50xf32>
    %1129 = tpu.matmul %1098, %1128, %cst_370 {dimension_numbers = #tpu.dot_dimension_numbers<[1], [0], [0], [1], [0, 0, 1, 1], [], []>} : vector<2x2xf32>, vector<2x50xf32>, vector<2x50xf32> -> vector<2x50xf32>
    %1130 = arith.addf %1060, %1129 : vector<2x50xf32>
    %c1_371 = arith.constant 1 : index
    %c0_372 = arith.constant 0 : index
    %c0_373 = arith.constant 0 : index
    %1131 = vector.load %arg20[%c1_371, %c0_372, %c0_373] : memref<8x2x50xf32, #tpu.memory_space<vmem>>, vector<1x2x50xf32>
    %1132 = vector.shape_cast %1131 : vector<1x2x50xf32> to vector<2x50xf32>
    %cst_374 = arith.constant dense<0.000000e+00> : vector<2x50xf32>
    %1133 = tpu.matmul %1126, %1132, %cst_374 {dimension_numbers = #tpu.dot_dimension_numbers<[1], [0], [0], [1], [0, 0, 1, 1], [], []>} : vector<2x2xf32>, vector<2x50xf32>, vector<2x50xf32> -> vector<2x50xf32>
    %1134 = arith.addf %1130, %1133 : vector<2x50xf32>
    %c0_375 = arith.constant 0 : index
    %c0_376 = arith.constant 0 : index
    %1135 = vector.load %arg11[%c0_375, %c0_376] : memref<2x6xf32, #tpu.memory_space<vmem>>, vector<2x6xf32>
    %cst_377 = arith.constant dense<0.000000e+00> : vector<2x6xf32>
    %1136 = tpu.matmul %1098, %1135, %cst_377 {dimension_numbers = #tpu.dot_dimension_numbers<[1], [0], [0], [1], [0, 0, 1, 1], [], []>} : vector<2x2xf32>, vector<2x6xf32>, vector<2x6xf32> -> vector<2x6xf32>
    %c0_378 = arith.constant 0 : index
    %c0_379 = arith.constant 0 : index
    %1137 = vector.load %arg13[%c0_378, %c0_379] : memref<1x6xf32, #tpu.memory_space<vmem>>, vector<1x6xf32>
    %1138 = vector.broadcast %1137 : vector<1x6xf32> to vector<2x6xf32>
    %1139 = arith.addf %1136, %1138 : vector<2x6xf32>
    %c0_380 = arith.constant 0 : index
    %c0_381 = arith.constant 0 : index
    %1140 = vector.load %arg16[%c0_380, %c0_381] : memref<2x6xf32, #tpu.memory_space<vmem>>, vector<2x6xf32>
    %cst_382 = arith.constant dense<0.000000e+00> : vector<2x6xf32>
    %1141 = tpu.matmul %1126, %1140, %cst_382 {dimension_numbers = #tpu.dot_dimension_numbers<[1], [0], [0], [1], [0, 0, 1, 1], [], []>} : vector<2x2xf32>, vector<2x6xf32>, vector<2x6xf32> -> vector<2x6xf32>
    %c0_383 = arith.constant 0 : index
    %c0_384 = arith.constant 0 : index
    %1142 = vector.load %arg18[%c0_383, %c0_384] : memref<1x6xf32, #tpu.memory_space<vmem>>, vector<1x6xf32>
    %1143 = vector.broadcast %1142 : vector<1x6xf32> to vector<2x6xf32>
    %1144 = arith.addf %1141, %1143 : vector<2x6xf32>
    %1145 = vector.extract_strided_slice %604 {offsets = [7, 0, 0], sizes = [1, 2, 6], strides = [1, 1, 1]} : vector<8x2x6xf32> to vector<1x2x6xf32>
    %1146 = vector.shape_cast %1145 : vector<1x2x6xf32> to vector<2x6xf32>
    %1147 = vector.extract_strided_slice %1146 {offsets = [0, 0], sizes = [2, 2], strides = [1, 1]} : vector<2x6xf32> to vector<2x2xf32>
    %1148 = vector.extract_strided_slice %1139 {offsets = [0, 0], sizes = [2, 2], strides = [1, 1]} : vector<2x6xf32> to vector<2x2xf32>
    %1149 = arith.addf %1147, %1148 : vector<2x2xf32>
    %1150 = arith.negf %1149 : vector<2x2xf32>
    %1151 = math.exp %1150 : vector<2x2xf32>
    %cst_385 = arith.constant 1.000000e+00 : f32
    %1152 = vector.broadcast %cst_385 : f32 to vector<2x2xf32>
    %1153 = arith.addf %1152, %1151 : vector<2x2xf32>
    %1154 = arith.divf %1152, %1153 : vector<2x2xf32>
    %1155 = vector.extract_strided_slice %1146 {offsets = [0, 2], sizes = [2, 2], strides = [1, 1]} : vector<2x6xf32> to vector<2x2xf32>
    %1156 = vector.extract_strided_slice %1139 {offsets = [0, 2], sizes = [2, 2], strides = [1, 1]} : vector<2x6xf32> to vector<2x2xf32>
    %1157 = arith.addf %1155, %1156 : vector<2x2xf32>
    %1158 = arith.negf %1157 : vector<2x2xf32>
    %1159 = math.exp %1158 : vector<2x2xf32>
    %cst_386 = arith.constant 1.000000e+00 : f32
    %1160 = vector.broadcast %cst_386 : f32 to vector<2x2xf32>
    %1161 = arith.addf %1160, %1159 : vector<2x2xf32>
    %1162 = arith.divf %1160, %1161 : vector<2x2xf32>
    %1163 = vector.extract_strided_slice %1146 {offsets = [0, 4], sizes = [2, 2], strides = [1, 1]} : vector<2x6xf32> to vector<2x2xf32>
    %1164 = vector.extract_strided_slice %1139 {offsets = [0, 4], sizes = [2, 2], strides = [1, 1]} : vector<2x6xf32> to vector<2x2xf32>
    %1165 = arith.mulf %1154, %1164 : vector<2x2xf32>
    %1166 = arith.addf %1163, %1165 : vector<2x2xf32>
    %1167 = math.tanh %1166 : vector<2x2xf32>
    %cst_387 = arith.constant 1.000000e+00 : f32
    %1168 = vector.broadcast %cst_387 : f32 to vector<2x2xf32>
    %1169 = arith.subf %1168, %1162 : vector<2x2xf32>
    %1170 = arith.mulf %1169, %1167 : vector<2x2xf32>
    %1171 = arith.mulf %1162, %1098 : vector<2x2xf32>
    %1172 = arith.addf %1170, %1171 : vector<2x2xf32>
    %1173 = vector.extract_strided_slice %613 {offsets = [0, 0, 0], sizes = [1, 2, 6], strides = [1, 1, 1]} : vector<8x2x6xf32> to vector<1x2x6xf32>
    %1174 = vector.shape_cast %1173 : vector<1x2x6xf32> to vector<2x6xf32>
    %1175 = vector.extract_strided_slice %1174 {offsets = [0, 0], sizes = [2, 2], strides = [1, 1]} : vector<2x6xf32> to vector<2x2xf32>
    %1176 = vector.extract_strided_slice %1144 {offsets = [0, 0], sizes = [2, 2], strides = [1, 1]} : vector<2x6xf32> to vector<2x2xf32>
    %1177 = arith.addf %1175, %1176 : vector<2x2xf32>
    %1178 = arith.negf %1177 : vector<2x2xf32>
    %1179 = math.exp %1178 : vector<2x2xf32>
    %cst_388 = arith.constant 1.000000e+00 : f32
    %1180 = vector.broadcast %cst_388 : f32 to vector<2x2xf32>
    %1181 = arith.addf %1180, %1179 : vector<2x2xf32>
    %1182 = arith.divf %1180, %1181 : vector<2x2xf32>
    %1183 = vector.extract_strided_slice %1174 {offsets = [0, 2], sizes = [2, 2], strides = [1, 1]} : vector<2x6xf32> to vector<2x2xf32>
    %1184 = vector.extract_strided_slice %1144 {offsets = [0, 2], sizes = [2, 2], strides = [1, 1]} : vector<2x6xf32> to vector<2x2xf32>
    %1185 = arith.addf %1183, %1184 : vector<2x2xf32>
    %1186 = arith.negf %1185 : vector<2x2xf32>
    %1187 = math.exp %1186 : vector<2x2xf32>
    %cst_389 = arith.constant 1.000000e+00 : f32
    %1188 = vector.broadcast %cst_389 : f32 to vector<2x2xf32>
    %1189 = arith.addf %1188, %1187 : vector<2x2xf32>
    %1190 = arith.divf %1188, %1189 : vector<2x2xf32>
    %1191 = vector.extract_strided_slice %1174 {offsets = [0, 4], sizes = [2, 2], strides = [1, 1]} : vector<2x6xf32> to vector<2x2xf32>
    %1192 = vector.extract_strided_slice %1144 {offsets = [0, 4], sizes = [2, 2], strides = [1, 1]} : vector<2x6xf32> to vector<2x2xf32>
    %1193 = arith.mulf %1182, %1192 : vector<2x2xf32>
    %1194 = arith.addf %1191, %1193 : vector<2x2xf32>
    %1195 = math.tanh %1194 : vector<2x2xf32>
    %cst_390 = arith.constant 1.000000e+00 : f32
    %1196 = vector.broadcast %cst_390 : f32 to vector<2x2xf32>
    %1197 = arith.subf %1196, %1190 : vector<2x2xf32>
    %1198 = arith.mulf %1197, %1195 : vector<2x2xf32>
    %1199 = arith.mulf %1190, %1126 : vector<2x2xf32>
    %1200 = arith.addf %1198, %1199 : vector<2x2xf32>
    %c7_391 = arith.constant 7 : index
    %c0_392 = arith.constant 0 : index
    %c0_393 = arith.constant 0 : index
    %1201 = vector.load %arg19[%c7_391, %c0_392, %c0_393] : memref<8x2x50xf32, #tpu.memory_space<vmem>>, vector<1x2x50xf32>
    %1202 = vector.shape_cast %1201 : vector<1x2x50xf32> to vector<2x50xf32>
    %cst_394 = arith.constant dense<0.000000e+00> : vector<2x50xf32>
    %1203 = tpu.matmul %1172, %1202, %cst_394 {dimension_numbers = #tpu.dot_dimension_numbers<[1], [0], [0], [1], [0, 0, 1, 1], [], []>} : vector<2x2xf32>, vector<2x50xf32>, vector<2x50xf32> -> vector<2x50xf32>
    %1204 = arith.addf %1134, %1203 : vector<2x50xf32>
    %c0_395 = arith.constant 0 : index
    %c0_396 = arith.constant 0 : index
    %c0_397 = arith.constant 0 : index
    %1205 = vector.load %arg20[%c0_395, %c0_396, %c0_397] : memref<8x2x50xf32, #tpu.memory_space<vmem>>, vector<1x2x50xf32>
    %1206 = vector.shape_cast %1205 : vector<1x2x50xf32> to vector<2x50xf32>
    %cst_398 = arith.constant dense<0.000000e+00> : vector<2x50xf32>
    %1207 = tpu.matmul %1200, %1206, %cst_398 {dimension_numbers = #tpu.dot_dimension_numbers<[1], [0], [0], [1], [0, 0, 1, 1], [], []>} : vector<2x2xf32>, vector<2x50xf32>, vector<2x50xf32> -> vector<2x50xf32>
    %1208 = arith.addf %1204, %1207 : vector<2x50xf32>
    %c0_399 = arith.constant 0 : index
    %c0_400 = arith.constant 0 : index
    %1209 = vector.load %arg21[%c0_399, %c0_400] : memref<1x50xf32, #tpu.memory_space<vmem>>, vector<1x50xf32>
    %1210 = vector.broadcast %1209 : vector<1x50xf32> to vector<2x50xf32>
    %1211 = arith.addf %1208, %1210 : vector<2x50xf32>
    %cst_401 = arith.constant 0.000000e+00 : f32
    %1212 = vector.broadcast %cst_401 : f32 to vector<2x50xf32>
    %1213 = arith.maximumf %1211, %1212 : vector<2x50xf32>
    %c0_402 = arith.constant 0 : index
    %c0_403 = arith.constant 0 : index
    %1214 = vector.load %arg22[%c0_402, %c0_403] : memref<50x50xf32, #tpu.memory_space<vmem>>, vector<50x50xf32>
    %cst_404 = arith.constant dense<0.000000e+00> : vector<2x50xf32>
    %1215 = tpu.matmul %1213, %1214, %cst_404 {dimension_numbers = #tpu.dot_dimension_numbers<[1], [0], [0], [1], [0, 0, 1, 1], [], []>} : vector<2x50xf32>, vector<50x50xf32>, vector<2x50xf32> -> vector<2x50xf32>
    %c0_405 = arith.constant 0 : index
    %c0_406 = arith.constant 0 : index
    %1216 = vector.load %arg23[%c0_405, %c0_406] : memref<1x50xf32, #tpu.memory_space<vmem>>, vector<1x50xf32>
    %1217 = vector.broadcast %1216 : vector<1x50xf32> to vector<2x50xf32>
    %1218 = arith.addf %1215, %1217 : vector<2x50xf32>
    %cst_407 = arith.constant 0.000000e+00 : f32
    %1219 = vector.broadcast %cst_407 : f32 to vector<2x50xf32>
    %1220 = arith.maximumf %1218, %1219 : vector<2x50xf32>
    %c0_408 = arith.constant 0 : index
    %c0_409 = arith.constant 0 : index
    %1221 = vector.load %arg24[%c0_408, %c0_409] : memref<50x3xf32, #tpu.memory_space<vmem>>, vector<50x3xf32>
    %cst_410 = arith.constant dense<0.000000e+00> : vector<2x3xf32>
    %1222 = tpu.matmul %1220, %1221, %cst_410 {dimension_numbers = #tpu.dot_dimension_numbers<[1], [0], [0], [1], [0, 0, 1, 1], [], []>} : vector<2x50xf32>, vector<50x3xf32>, vector<2x3xf32> -> vector<2x3xf32>
    %c0_411 = arith.constant 0 : index
    %c0_412 = arith.constant 0 : index
    %1223 = vector.load %arg25[%c0_411, %c0_412] : memref<1x3xf32, #tpu.memory_space<vmem>>, vector<1x3xf32>
    %1224 = vector.broadcast %1223 : vector<1x3xf32> to vector<2x3xf32>
    %1225 = arith.addf %1222, %1224 : vector<2x3xf32>
    %cst_413 = arith.constant dense<0xFF800000> : vector<2xf32>
    %1226 = vector.multi_reduction <maximumf>, %1225, %cst_413 [1] : vector<2x3xf32> to vector<2xf32>
    %1227 = vector.shape_cast %1226 : vector<2xf32> to vector<2x1xf32>
    %1228 = vector.broadcast %1227 : vector<2x1xf32> to vector<2x3xf32>
    %1229 = arith.subf %1225, %1228 : vector<2x3xf32>
    %1230 = math.exp %1229 : vector<2x3xf32>
    %cst_414 = arith.constant dense<0.000000e+00> : vector<2xf32>
    %1231 = vector.multi_reduction <add>, %1230, %cst_414 [1] : vector<2x3xf32> to vector<2xf32>
    %1232 = vector.shape_cast %1231 : vector<2xf32> to vector<2x1xf32>
    %1233 = tpu.reciprocal %1232 : vector<2x1xf32> -> vector<2x1xf32>
    %1234 = vector.broadcast %1233 : vector<2x1xf32> to vector<2x3xf32>
    %1235 = arith.mulf %1230, %1234 : vector<2x3xf32>
    %c0_415 = arith.constant 0 : index
    %c0_416 = arith.constant 0 : index
    %1236 = vector.load %arg26[%c0_415, %c0_416] : memref<2x3xf32, #tpu.memory_space<vmem>>, vector<2x3xf32>
    tpu.vector_store %arg26[%c0_415, %c0_416], %1235 {strides = array<i32>} : memref<2x3xf32, #tpu.memory_space<vmem>>, vector<2x3xf32>,
    return
  }
}

</mosaic_0001>

<bundles_post_ra>
// kernel: forward.1
= control target key start
LH: loop header
LB: loop body
LE: loop exit
PB: predicated region body
PF: predicated region fallthrough
CT: control target
= control target key end

     0   :  { %s8379_s0 = inlined_call_operand.vmem [shape: f32[8,2,5], index: 0, kind: input, shape index: {}]   ;;  %s8380_s1 = inlined_call_operand.vmem [shape: f32[5,6], index: 1, kind: input, shape index: {}]   ;;  %s8381_s2 = inlined_call_operand.vmem [shape: f32[2,6], index: 2, kind: input, shape index: {}]   ;;  %s8382_s3 = inlined_call_operand.vmem [shape: f32[1,6], index: 3, kind: input, shape index: {}]   ;;  %s8383_s4 = inlined_call_operand.vmem [shape: f32[1,6], index: 4, kind: input, shape index: {}]   ;;  %s8384_s5 = inlined_call_operand.vmem [shape: f32[5,6], index: 5, kind: input, shape index: {}]   ;;  %s8385_s6 = inlined_call_operand.vmem [shape: f32[2,6], index: 6, kind: input, shape index: {}]   ;;  %s8386_s7 = inlined_call_operand.vmem [shape: f32[1,6], index: 7, kind: input, shape index: {}]   ;;  %s8387_s8 = inlined_call_operand.vmem [shape: f32[1,6], index: 8, kind: input, shape index: {}]   ;;  %s8388_s9 = inlined_call_operand.vmem [shape: f32[2,6], index: 9, kind: input, shape index: {}]   ;;  %s8389_s10 = inlined_call_operand.vmem [shape: f32[2,6], index: 10, kind: input, shape index: {}]   ;;  %s8390_s11 = inlined_call_operand.vmem [shape: f32[2,6], index: 11, kind: input, shape index: {}]   ;;  %s8391_s12 = inlined_call_operand.vmem [shape: f32[1,6], index: 12, kind: input, shape index: {}]   ;;  %s8392_s13 = inlined_call_operand.vmem [shape: f32[1,6], index: 13, kind: input, shape index: {}]   ;;  %s8393_s14 = inlined_call_operand.vmem [shape: f32[2,6], index: 14, kind: input, shape index: {}]   ;;  %s8394_s15 = inlined_call_operand.vmem [shape: f32[2,6], index: 15, kind: input, shape index: {}]   ;;  %s8395_s16 = inlined_call_operand.vmem [shape: f32[2,6], index: 16, kind: input, shape index: {}]   ;;  %s8396_s17 = inlined_call_operand.vmem [shape: f32[1,6], index: 17, kind: input, shape index: {}]   ;;  %s8397_s18 = inlined_call_operand.vmem [shape: f32[1,6], index: 18, kind: input, shape index: {}]   ;;  %s8398_s19 = inlined_call_operand.vmem [shape: f32[8,2,50], index: 19, kind: input, shape index: {}]   ;;  %s8399_s20 = inlined_call_operand.vmem [shape: f32[8,2,50], index: 20, kind: input, shape index: {}]   ;;  %s8400_s21 = inlined_call_operand.vmem [shape: f32[1,50], index: 21, kind: input, shape index: {}]   ;;  %s8401_s22 = inlined_call_operand.vmem [shape: f32[50,50], index: 22, kind: input, shape index: {}]   ;;  %s8402_s23 = inlined_call_operand.vmem [shape: f32[1,50], index: 23, kind: input, shape index: {}]   ;;  %s8403_s24 = inlined_call_operand.vmem [shape: f32[50,3], index: 24, kind: input, shape index: {}]   ;;  %s8404_s25 = inlined_call_operand.vmem [shape: f32[1,3], index: 25, kind: input, shape index: {}]   ;;  %s8405_s26 = inlined_call_operand.hbm [shape: f32[2,3], index: 26, kind: output, shape index: {}]  }
   0x1   :  { %8409 = sst [smem:[#allocation7_spill]] %s8379_s0 }
   0x2   :  { %8410 = sst [smem:[#allocation8_spill]] %s8380_s1 }
   0x3   :  { %8411 = sst [smem:[#allocation9_spill]] %s8381_s2 }
   0x4   :  { %8412 = sst [smem:[#allocation10_spill]] %s8382_s3 }
   0x5   :  { %8413 = sst [smem:[#allocation11_spill]] %s8383_s4 }
   0x6   :  { %8414 = sst [smem:[#allocation12_spill]] %s8384_s5 }
   0x7   :  { %8415 = sst [smem:[#allocation13_spill]] %s8385_s6 }
   0x8   :  { %8416 = sst [smem:[#allocation14_spill]] %s8386_s7 }
   0x9   :  { %8417 = sst [smem:[#allocation15_spill]] %s8387_s8 }
   0xa   :  { %8418 = sst [smem:[#allocation16_spill]] %s8388_s9 }
   0xb   :  { %8419 = sst [smem:[#allocation17_spill]] %s8389_s10 }
   0xc   :  { %vm147_vm0 = vcmask 1044480   ;;  %s8420_s7 = sld [smem:[#allocation12_spill]]  ;;  %v113_v1 = vlaneseq  ;;  %s8421_s4 = sld [smem:[#allocation7_spill]]  ;;  %v7159_v7 = vmov 1983009808   ;;  %v7160_v13 = vmov 0.0  }
   0xd   :  { %v111_v8 = vunpack.c.l.s4 %v7159_v7  ;;  %s8422_s9 = sld [smem:[#allocation8_spill]] }
   0xe   :  { %v114_v9 = vshrl.u32 %v113_v1, 7 }
   0xf   :  { %v112_v17 = vunpack.c.0.s8 %v111_v8 }
  0x12   :  { %v270_v0 = vld [vmem:[%s8420_s7] sm:$0x1f]  ;;  %v87_v5 = vld [vmem:[%s8421_s4 + $0x6] sm:$0x3]  ;;  %v88_v6 = vld [vmem:[%s8421_s4 + $0x8] sm:$0x3] }
  0x13   :  { %6606 = vmatprep.subr.msk.mxu1 %vm147_vm0, %v270_v0  ;;  %v84_v2 = vld [vmem:[%s8421_s4] sm:$0x3]  ;;  %v85_v3 = vld [vmem:[%s8421_s4 + $0x2] sm:$0x3]  ;;  %v86_v4 = vld [vmem:[%s8421_s4 + $0x4] sm:$0x3] }
  0x14   :  { %6607 = vmatpush3.msk.msra.mxu1 %vm147_vm0, %v270_v0  ;;  %v89_v10 = vld [vmem:[%s8421_s4 + $0xa] sm:$0x3]  ;;  %v90_v11 = vld [vmem:[%s8421_s4 + $0xc] sm:$0x3]  ;;  %v108_v12 = vcombine.low %v84_v2, %v85_v3  ;;  %v91_v14 = vld [vmem:[%s8421_s4 + $0xe] sm:$0x3]  ;;  %v109_v16 = vcombine.low %v86_v4, %v87_v5 }
  0x15   :  { %6616 = vmatprep.subr.mxu1 %v7160_v13  ;;  %v92_v15 = vld [vmem:[%s8422_s9] sm:$0x1f]  ;;  %v125_v18 = vcombine.low %v88_v6, %v89_v10  ;;  %v126_v19 = vcombine.low %v90_v11, %v91_v14 }
  0x16   :  { %6601 = vmatprep.subr.msk.mxu0 %vm147_vm0, %v92_v15 }
  0x17   :  { %31 = vsyncpa [#allocation5], 0  ;;  %6602 = vmatpush3.msk.msra.mxu0 %vm147_vm0, %v92_v15  ;;  %v7337_v20 = vsub.s32 %v112_v17, %v114_v9  ;;  %vm142_vm1 = vcmask 39936   ;;  %vm412_vm2 = vcmask 1041408   ;;  %s8423_s2 = sld [smem:[#allocation13_spill]]  ;;  %s8424_s6 = sld [smem:[#allocation9_spill]] }
  0x18   :  { %6611 = vmatprep.subr.mxu0 %v7160_v13  ;;  %vm7161_vm3 = vmmov 0   ;;  %s8425_s3 = sld [smem:[#allocation10_spill]]  ;;  %s8426_s8 = sld [smem:[#allocation14_spill]]  ;;  %vm644_vm4 = vcmask 9216   ;;  %vm408_vm5 = vcmask 15360   ;;  %vm6091_vm6 = vcmask 408576  }
  0x19   :  { %v116_v21 = vrot.slane %v108_v12, %v7337_v20  ;;  %v123_v22 = vrot.slane %v109_v16, %v7337_v20  ;;  %v133_v23 = vrot.slane %v125_v18, %v7337_v20  ;;  %v140_v24 = vrot.slane %v126_v19, %v7337_v20  ;;  %s8427_s9 = sld [smem:[#allocation15_spill]]  ;;  %s8428_s5 = sld [smem:[#allocation11_spill]] }
  0x1a   :  { %s7162_s10 = smov 124   ;;  %s7163_s1 = smov 4   ;;  %vm6259_vm7 = vcmask 17408  }
  0x1b   :  { %v124_v25 = vcombine.low %v116_v21, %v123_v22  ;;  %v141_v26 = vcombine.low %v133_v23, %v140_v24  ;;  %s7164_s7 = smov 126   ;;  %s8429_s27 = sld [smem:[#allocation17_spill]] }
  0x1c   :  { %s8430_s29 = sld [smem:[#allocation16_spill]] }
  0x1d   :  { %v486_v27 = vld [vmem:[%s8423_s2] sm:$0x3]  ;;  %6608 = vmatprep.mubr.msk.f32.mxu1 %vm142_vm1, %v124_v25  ;;  %6603 = vmatprep.mubr.msk.f32.mxu0 %vm142_vm1, %v124_v25 }
  0x1e   :  { %v400_v28 = vld [vmem:[%s8424_s6] sm:$0x3]  ;;  %6609 = vmatmul.mubr.msk.f32.vlgmr.msra.gmra.mrb[0].mxu1 %vm142_vm1, %v141_v26  ;;  %6604 = vmatmul.mubr.msk.f32.vlgmr.msra.gmra.mrb[0].mxu0 %vm142_vm1, %v141_v26 }
  0x1f   :  { %6617 = vmatpush3.msk.msra.mxu1 %vm412_vm2, %v486_v27  ;;  %6618 = vmatprep.mubr.msk.f32.mxu1 %vm7161_vm3, %v7160_v13  ;;  %v6286_v29 = vld [vmem:[%s8425_s3] ss:$0 sm:$0xff] }
  0x20   :  { %6612 = vmatpush3.msk.msra.mxu0 %vm412_vm2, %v400_v28  ;;  %6613 = vmatprep.mubr.msk.f32.mxu0 %vm7161_vm3, %v7160_v13  ;;  %v6290_v30 = vld [vmem:[%s8426_s8] ss:$0 sm:$0xff] }
  0x21   :  { %6626 = vmatprep.subr.mxu1 %v7160_v13  ;;  %6621 = vmatprep.subr.mxu0 %v7160_v13  ;;  %v7377_v37 = vld [vmem:[%s8427_s9] ss:$0 sm:$0xff] }
  0x22   :  { %6619 = vmatmul.mubr.f32.vlgmr.msra.gmra.mrb[2].mxu1 %v7160_v13  ;;  %6614 = vmatmul.mubr.f32.vlgmr.msra.gmra.mrb[2].mxu0 %v7160_v13  ;;  %v7382_v38 = vld [vmem:[%s8428_s5] ss:$0 sm:$0xff] }
  0x23   :  { %6628 = vmatprep.mubr.msk.f32.mxu1 %vm7161_vm3, %v7160_v13  ;;  %6623 = vmatprep.mubr.msk.f32.mxu0 %vm7161_vm3, %v7160_v13  ;;  %v742_v7 = vld [vmem:[%s8423_s2] sm:$0x3] }
  0x24   :  { %6627 = vmatpush3.msk.msra.mxu1 %vm412_vm2, %v742_v7  ;;  %v659_v10 = vld [vmem:[%s8424_s6] sm:$0x3] }
  0x25   :  { %6636 = vmatprep.subr.mxu1 %v7160_v13  ;;  %6622 = vmatpush3.msk.msra.mxu0 %vm412_vm2, %v659_v10 }
  0x26   :  { %6631 = vmatprep.subr.mxu0 %v7160_v13 }
  0xf1   :  { %v6610_v31 = vpop.f32.mrb[0].mxu1  ;;  %v6605_v32 = vpop.f32.mrb[0].mxu0 }
  0xf2   :  { %v347_v33 = vpop.f32.mrb[1].mxu1  ;;  %v7370_v34 = vadd.f32 %v6605_v32, %v6286_v29  ;;  %v217_v35 = vpop.f32.mrb[1].mxu0  ;;  %v7390_v47 = vadd.f32 %v6610_v31, %v6290_v30 }
  0xf3   :  { %v7372_v36 = vadd.f32 %v6290_v30, %v347_v33  ;;  %v7399_v51 = vadd.f32 %v6286_v29, %v217_v35 }
  0xf4   :  { %v375_v48 = vcombine.high %v7390_v47, %v7390_v47 }
  0xf5   :  { %v563_v39 = vpop.f32.mrb[2].mxu1  ;;  %v482_v40 = vpop.f32.mrb[2].mxu0  ;;  %v7403_v53 = vrot.slane %v7399_v51, %v7337_v20 }
  0xf6   :  { %v564_v41 = vadd.f32 %v7377_v37, %v563_v39  ;;  %v6620_v42 = vpop.f32.mrb[3].mxu1  ;;  %v483_v43 = vadd.f32 %v7382_v38, %v482_v40  ;;  %v6615_v44 = vpop.f32.mrb[3].mxu0  ;;  %v7395_v49 = vrot.slane %v375_v48, %v7337_v20 }
  0xf7   :  { %v243_v40 = vcombine.high %v7403_v53, %v7403_v53 }
  0xf8   :  { %v614_v45 = vrot.slane %v564_v41, %v7337_v20  ;;  %v581_v46 = vrot.slane %v483_v43, %v7337_v20  ;;  %v391_v50 = vcombine.high %v7395_v49, %v7395_v49  ;;  %v567_v55 = vadd.f32 %v483_v43, %v7403_v53 }
  0xfa   :  { %615 = vrot.lane.b32.xlu0 %v614_v45, %s7162_s10  ;;  %v600_v52 = vadd.f32 %v564_v41, %v391_v50  ;;  %v6298_v56 = vmul.f32 -1.442695, %v567_v55 }
  0xfc   :  { %v6299_v54 = vmul.f32 -1.442695, %v600_v52 }
  0xfe   :  { %582 = vrot.lane.b32.xlu0 %v581_v46, %s7162_s10  ;;  %6935 = vpow2.f32 %v6299_v54 }
  0xff   :  { %6937 = vpow2.f32 %v6298_v56 }
 0x108   :  { %v6936_v57 = vpop.eup %6935 }
 0x109   :  { %v604_v58 = vadd.f32 1.0, %v6936_v57  ;;  %v6938_v59 = vpop.eup %6937 }
 0x10a   :  { %v571_v60 = vadd.f32 1.0, %v6938_v59 }
 0x10b   :  { %6939 = vrcp.f32 %v604_v58 }
 0x10c   :  { %6941 = vrcp.f32 %v571_v60 }
 0x115   :  { %v6940_v61 = vpop.eup %6939 }
 0x116   :  { %v6942_v0 = vpop.eup %6941  ;;  %v625_v11 = vsub.f32 1.0, %v6940_v61  ;;  %v631_v14 = vmul.f32 0.0, %v6940_v61 }
 0x117   :  { %v592_v17 = vsub.f32 1.0, %v6942_v0  ;;  %v598_v19 = vmul.f32 0.0, %v6942_v0 }
 0x16c   :  { %v616_v62 = vpop.permute.xlu0 %615 }
 0x16d   :  { %v618_v63 = vmul.f32 %v6940_v61, %v616_v62  ;;  %v1000_v61 = vld [vmem:[%s8423_s2] sm:$0x3] }
 0x16f   :  { %620 = vrot.lane.b32.xlu1 %v618_v63, %s7163_s1 }
 0x170   :  { %v583_v1 = vpop.permute.xlu0 %582 }
 0x171   :  { %v585_v2 = vmul.f32 %v6942_v0, %v583_v1 }
 0x173   :  { %587 = vrot.lane.b32.xlu1 %v585_v2, %s7163_s1 }
 0x1e1   :  { %v621_v3 = vpop.permute.xlu1 %620 }
 0x1e2   :  { %v623_v4 = vadd.f32 %v621_v3, %v391_v50 }
 0x1e4   :  { %6943 = vtanh.f32 %v623_v4 }
 0x1e5   :  { %v588_v5 = vpop.permute.xlu1 %587 }
 0x1e6   :  { %v590_v6 = vadd.f32 %v588_v5, %v7403_v53 }
 0x1e8   :  { %6945 = vtanh.f32 %v590_v6 }
 0x1ee   :  { %v6944_v8 = vpop.eup %6943 }
 0x1ef   :  { %627 = vrot.lane.b32.xlu0 %v6944_v8, %s7164_s7 }
 0x1f2   :  { %v6946_v9 = vpop.eup %6945 }
 0x1f3   :  { %594 = vrot.lane.b32.xlu1 %v6946_v9, %s7164_s7 }
 0x261   :  { %v628_v12 = vpop.permute.xlu0 %627 }
 0x262   :  { %v630_v15 = vmul.f32 %v628_v12, %v625_v11 }
 0x264   :  { %v7421_v16 = vadd.f32 %v631_v14, %v630_v15 }
 0x265   :  { %v595_v18 = vpop.permute.xlu1 %594 }
 0x266   :  { %v597_v21 = vmul.f32 %v595_v18, %v592_v17  ;;  %v653_v22 = vrot.slane %v7421_v16, %v7337_v20 }
 0x268   :  { %v7425_v23 = vadd.f32 %v598_v19, %v597_v21  ;;  %654 = vrot.lane.b32.xlu0 %v653_v22, %s7164_s7 }
 0x26a   :  { %v640_v24 = vrot.slane %v7425_v23, %v7337_v20 }
 0x26c   :  { %641 = vrot.lane.b32.xlu1 %v640_v24, %s7164_s7  ;;  %v7491_v24 = vrot.slane %v7390_v47, %v7337_v20 }
 0x2da   :  { %v655_v25 = vpop.permute.xlu0 %654 }
 0x2db   :  { %658 = vst.msk [vmem:[#allocation3 + $0xe] sm:$0x3] %vm644_vm4, %v655_v25  ;;  %6629 = vmatmul.mubr.msk.f32.vlgmr.msra.gmra.mrb[4].mxu1 %vm408_vm5, %v655_v25  ;;  %v228_v25 = vcombine.high %v7399_v51, %v7399_v51 }
 0x2dc   :  { %6638 = vmatprep.mubr.msk.f32.mxu1 %vm7161_vm3, %v7160_v13  ;;  %6637 = vmatpush3.msk.msra.mxu1 %vm412_vm2, %v1000_v61 }
 0x2dd   :  { %6646 = vmatprep.subr.mxu1 %v7160_v13 }
 0x2de   :  { %v642_v26 = vpop.permute.xlu1 %641 }
 0x2df   :  { %645 = vst.msk [vmem:[#allocation2] sm:$0x3] %vm644_vm4, %v642_v26  ;;  %6624 = vmatmul.mubr.msk.f32.vlgmr.msra.gmra.mrb[4].mxu0 %vm408_vm5, %v642_v26  ;;  %v390_v26 = vcombine.high %v7491_v24, %v7491_v24 }
 0x2e0   :  { %6633 = vmatprep.mubr.msk.f32.mxu0 %vm7161_vm3, %v7160_v13 }
 0x3ae   :  { %v821_v27 = vpop.f32.mrb[4].mxu1 }
 0x3af   :  { %v822_v28 = vadd.f32 %v7377_v37, %v821_v27  ;;  %v6630_v29 = vpop.f32.mrb[5].mxu1 }
 0x3b1   :  { %v872_v30 = vrot.slane %v822_v28, %v7337_v20  ;;  %v858_v39 = vadd.f32 %v822_v28, %v7395_v49  ;;  %v7498_v28 = vrot.slane %v228_v25, %v7337_v20 }
 0x3b2   :  { %v738_v31 = vpop.f32.mrb[4].mxu0 }
 0x3b3   :  { %v739_v32 = vadd.f32 %v7382_v38, %v738_v31  ;;  %873 = vrot.lane.b32.xlu0 %v872_v30, %s7162_s10  ;;  %v6625_v33 = vpop.f32.mrb[5].mxu0  ;;  %v6307_v41 = vmul.f32 -1.442695, %v858_v39 }
 0x3b5   :  { %v839_v35 = vrot.slane %v739_v32, %v7337_v20  ;;  %v825_v42 = vadd.f32 %v739_v32, %v243_v40  ;;  %6947 = vpow2.f32 %v6307_v41 }
 0x3b7   :  { %840 = vrot.lane.b32.xlu1 %v839_v35, %s7162_s10  ;;  %v6306_v43 = vmul.f32 -1.442695, %v825_v42 }
 0x3b9   :  { %6949 = vpow2.f32 %v6306_v43 }
 0x3bf   :  { %v6948_v44 = vpop.eup %6947 }
 0x3c0   :  { %v862_v45 = vadd.f32 1.0, %v6948_v44 }
 0x3c2   :  { %6951 = vrcp.f32 %v862_v45 }
 0x3c3   :  { %v6950_v46 = vpop.eup %6949 }
 0x3c4   :  { %v829_v48 = vadd.f32 1.0, %v6950_v46 }
 0x3c6   :  { %6953 = vrcp.f32 %v829_v48 }
 0x3cc   :  { %v6952_v50 = vpop.eup %6951 }
 0x3cd   :  { %v883_v0 = vsub.f32 1.0, %v6952_v50  ;;  %v889_v2 = vmul.f32 %v6952_v50, %v7421_v16 }
 0x3d0   :  { %v6954_v55 = vpop.eup %6953 }
 0x3d1   :  { %v850_v5 = vsub.f32 1.0, %v6954_v55  ;;  %v856_v7 = vmul.f32 %v6954_v55, %v7425_v23 }
 0x425   :  { %v874_v52 = vpop.permute.xlu0 %873 }
 0x426   :  { %v876_v54 = vmul.f32 %v6952_v50, %v874_v52  ;;  %v1258_v50 = vld [vmem:[%s8423_s2] sm:$0x3] }
 0x428   :  { %878 = vrot.lane.b32.xlu0 %v876_v54, %s7163_s1 }
 0x429   :  { %v841_v56 = vpop.permute.xlu1 %840 }
 0x42a   :  { %v843_v57 = vmul.f32 %v6954_v55, %v841_v56  ;;  %v1175_v55 = vld [vmem:[%s8424_s6] sm:$0x3] }
 0x42c   :  { %845 = vrot.lane.b32.xlu1 %v843_v57, %s7163_s1 }
 0x49a   :  { %v879_v53 = vpop.permute.xlu0 %878 }
 0x49b   :  { %v881_v58 = vadd.f32 %v879_v53, %v7395_v49  ;;  %v917_v49 = vld [vmem:[%s8424_s6] sm:$0x3] }
 0x49c   :  { %6632 = vmatpush3.msk.msra.mxu0 %vm412_vm2, %v917_v49 }
 0x49d   :  { %6955 = vtanh.f32 %v881_v58  ;;  %6641 = vmatprep.subr.mxu0 %v7160_v13 }
 0x49e   :  { %v846_v59 = vpop.permute.xlu1 %845 }
 0x49f   :  { %v848_v60 = vadd.f32 %v846_v59, %v243_v40 }
 0x4a1   :  { %6957 = vtanh.f32 %v848_v60 }
 0x4a7   :  { %v6956_v62 = vpop.eup %6955 }
 0x4a8   :  { %885 = vrot.lane.b32.xlu0 %v6956_v62, %s7164_s7 }
 0x4ab   :  { %v6958_v63 = vpop.eup %6957 }
 0x4ac   :  { %852 = vrot.lane.b32.xlu1 %v6958_v63, %s7164_s7 }
 0x51a   :  { %v886_v1 = vpop.permute.xlu0 %885 }
 0x51b   :  { %v888_v3 = vmul.f32 %v886_v1, %v883_v0 }
 0x51d   :  { %v7464_v4 = vadd.f32 %v889_v2, %v888_v3 }
 0x51e   :  { %v853_v6 = vpop.permute.xlu1 %852 }
 0x51f   :  { %v855_v8 = vmul.f32 %v853_v6, %v850_v5  ;;  %v911_v9 = vrot.slane %v7464_v4, %v7337_v20 }
 0x521   :  { %v7469_v10 = vadd.f32 %v856_v7, %v855_v8  ;;  %912 = vrot.lane.b32.xlu0 %v911_v9, %s7164_s7 }
 0x523   :  { %v898_v11 = vrot.slane %v7469_v10, %v7337_v20 }
 0x525   :  { %899 = vrot.lane.b32.xlu1 %v898_v11, %s7164_s7 }
 0x593   :  { %v913_v12 = vpop.permute.xlu0 %912 }
 0x594   :  { %916 = vst.msk [vmem:[#allocation3 + $0xc] sm:$0x3] %vm644_vm4, %v913_v12  ;;  %6639 = vmatmul.mubr.msk.f32.vlgmr.msra.gmra.mrb[6].mxu1 %vm408_vm5, %v913_v12 }
 0x595   :  { %6648 = vmatprep.mubr.msk.f32.mxu1 %vm7161_vm3, %v7160_v13  ;;  %6647 = vmatpush3.msk.msra.mxu1 %vm412_vm2, %v1258_v50 }
 0x596   :  { %6656 = vmatprep.subr.mxu1 %v7160_v13 }
 0x597   :  { %v900_v14 = vpop.permute.xlu1 %899 }
 0x598   :  { %903 = vst.msk [vmem:[#allocation2 + $0x2] sm:$0x3] %vm644_vm4, %v900_v14  ;;  %6634 = vmatmul.mubr.msk.f32.vlgmr.msra.gmra.mrb[6].mxu0 %vm408_vm5, %v900_v14  ;;  %v244_v14 = vcombine.high %v7498_v28, %v7498_v28 }
 0x599   :  { %6643 = vmatprep.mubr.msk.f32.mxu0 %vm7161_vm3, %v7160_v13  ;;  %6642 = vmatpush3.msk.msra.mxu0 %vm412_vm2, %v1175_v55 }
 0x59a   :  { %6651 = vmatprep.subr.mxu0 %v7160_v13 }
 0x667   :  { %v1079_v15 = vpop.f32.mrb[6].mxu1 }
 0x668   :  { %v1080_v16 = vadd.f32 %v7377_v37, %v1079_v15  ;;  %v6640_v17 = vpop.f32.mrb[7].mxu1 }
 0x66a   :  { %v1130_v18 = vrot.slane %v1080_v16, %v7337_v20  ;;  %v1116_v27 = vadd.f32 %v1080_v16, %v390_v26 }
 0x66b   :  { %v996_v19 = vpop.f32.mrb[6].mxu0 }
 0x66c   :  { %v997_v21 = vadd.f32 %v7382_v38, %v996_v19  ;;  %1131 = vrot.lane.b32.xlu0 %v1130_v18, %s7162_s10  ;;  %v6635_v22 = vpop.f32.mrb[7].mxu0  ;;  %v6315_v29 = vmul.f32 -1.442695, %v1116_v27 }
 0x66e   :  { %v1097_v23 = vrot.slane %v997_v21, %v7337_v20  ;;  %v1083_v30 = vadd.f32 %v997_v21, %v7498_v28  ;;  %6959 = vpow2.f32 %v6315_v29 }
 0x670   :  { %1098 = vrot.lane.b32.xlu1 %v1097_v23, %s7162_s10  ;;  %v6314_v31 = vmul.f32 -1.442695, %v1083_v30 }
 0x672   :  { %6961 = vpow2.f32 %v6314_v31 }
 0x678   :  { %v6960_v32 = vpop.eup %6959 }
 0x679   :  { %v1120_v33 = vadd.f32 1.0, %v6960_v32 }
 0x67b   :  { %6963 = vrcp.f32 %v1120_v33 }
 0x67c   :  { %v6962_v47 = vpop.eup %6961 }
 0x67d   :  { %v1087_v35 = vadd.f32 1.0, %v6962_v47  ;;  %v1516_v47 = vld [vmem:[%s8423_s2] sm:$0x3] }
 0x67f   :  { %6965 = vrcp.f32 %v1087_v35 }
 0x685   :  { %v6964_v51 = vpop.eup %6963 }
 0x686   :  { %v1141_v56 = vsub.f32 1.0, %v6964_v51  ;;  %v1147_v53 = vmul.f32 %v6964_v51, %v7464_v4 }
 0x689   :  { %v6966_v41 = vpop.eup %6965 }
 0x68a   :  { %v1108_v60 = vsub.f32 1.0, %v6966_v41  ;;  %v1114_v62 = vmul.f32 %v6966_v41, %v7469_v10 }
 0x6de   :  { %v1132_v39 = vpop.permute.xlu0 %1131 }
 0x6df   :  { %v1134_v40 = vmul.f32 %v6964_v51, %v1132_v39 }
 0x6e1   :  { %1136 = vrot.lane.b32.xlu0 %v1134_v40, %s7163_s1 }
 0x6e2   :  { %v1099_v42 = vpop.permute.xlu1 %1098 }
 0x6e3   :  { %v1101_v43 = vmul.f32 %v6966_v41, %v1099_v42 }
 0x6e5   :  { %1103 = vrot.lane.b32.xlu1 %v1101_v43, %s7163_s1 }
 0x753   :  { %v1137_v44 = vpop.permute.xlu0 %1136 }
 0x754   :  { %v1139_v45 = vadd.f32 %v1137_v44, %v390_v26 }
 0x756   :  { %6967 = vtanh.f32 %v1139_v45 }
 0x757   :  { %v1104_v46 = vpop.permute.xlu1 %1103 }
 0x758   :  { %v1106_v48 = vadd.f32 %v1104_v46, %v7498_v28 }
 0x75a   :  { %6969 = vtanh.f32 %v1106_v48 }
 0x760   :  { %v6968_v52 = vpop.eup %6967 }
 0x761   :  { %1143 = vrot.lane.b32.xlu0 %v6968_v52, %s7164_s7 }
 0x764   :  { %v6970_v54 = vpop.eup %6969 }
 0x765   :  { %1110 = vrot.lane.b32.xlu1 %v6970_v54, %s7164_s7 }
 0x7d3   :  { %v1144_v57 = vpop.permute.xlu0 %1143 }
 0x7d4   :  { %v1146_v58 = vmul.f32 %v1144_v57, %v1141_v56 }
 0x7d6   :  { %v7517_v59 = vadd.f32 %v1147_v53, %v1146_v58 }
 0x7d7   :  { %v1111_v61 = vpop.permute.xlu1 %1110 }
 0x7d8   :  { %v1113_v63 = vmul.f32 %v1111_v61, %v1108_v60  ;;  %v1169_v49 = vrot.slane %v7517_v59, %v7337_v20 }
 0x7da   :  { %v7522_v0 = vadd.f32 %v1114_v62, %v1113_v63  ;;  %1170 = vrot.lane.b32.xlu0 %v1169_v49, %s7164_s7  ;;  %v358_v49 = vcombine.high %v7372_v36, %v7372_v36 }
 0x7dc   :  { %v1156_v1 = vrot.slane %v7522_v0, %v7337_v20 }
 0x7de   :  { %1157 = vrot.lane.b32.xlu1 %v1156_v1, %s7164_s7 }
 0x84c   :  { %v1171_v2 = vpop.permute.xlu0 %1170 }
 0x84d   :  { %1174 = vst.msk [vmem:[#allocation3 + $0xa] sm:$0x3] %vm644_vm4, %v1171_v2  ;;  %6649 = vmatmul.mubr.msk.f32.vlgmr.msra.gmra.mrb[8].mxu1 %vm408_vm5, %v1171_v2 }
 0x84e   :  { %6658 = vmatprep.mubr.msk.f32.mxu1 %vm7161_vm3, %v7160_v13  ;;  %6657 = vmatpush3.msk.msra.mxu1 %vm412_vm2, %v1516_v47 }
 0x84f   :  { %6666 = vmatprep.subr.mxu1 %v7160_v13 }
 0x850   :  { %v1158_v3 = vpop.permute.xlu1 %1157 }
 0x851   :  { %1161 = vst.msk [vmem:[#allocation2 + $0x4] sm:$0x3] %vm644_vm4, %v1158_v3  ;;  %6644 = vmatmul.mubr.msk.f32.vlgmr.msra.gmra.mrb[8].mxu0 %vm408_vm5, %v1158_v3  ;;  %v7595_v3 = vrot.slane %v7370_v34, %v7337_v20 }
 0x852   :  { %6653 = vmatprep.mubr.msk.f32.mxu0 %vm7161_vm3, %v7160_v13 }
 0x920   :  { %v1337_v4 = vpop.f32.mrb[8].mxu1 }
 0x921   :  { %v1338_v5 = vadd.f32 %v7377_v37, %v1337_v4  ;;  %v6650_v6 = vpop.f32.mrb[9].mxu1 }
 0x923   :  { %v1388_v7 = vrot.slane %v1338_v5, %v7337_v20  ;;  %v1374_v12 = vadd.f32 %v1338_v5, %v7491_v24 }
 0x924   :  { %v1254_v8 = vpop.f32.mrb[8].mxu0 }
 0x925   :  { %v1255_v9 = vadd.f32 %v7382_v38, %v1254_v8  ;;  %1389 = vrot.lane.b32.xlu0 %v1388_v7, %s7162_s10  ;;  %v6645_v10 = vpop.f32.mrb[9].mxu0  ;;  %v6323_v15 = vmul.f32 -1.442695, %v1374_v12 }
 0x927   :  { %v1355_v11 = vrot.slane %v1255_v9, %v7337_v20  ;;  %v1341_v16 = vadd.f32 %v1255_v9, %v244_v14  ;;  %6971 = vpow2.f32 %v6323_v15 }
 0x929   :  { %1356 = vrot.lane.b32.xlu1 %v1355_v11, %s7162_s10  ;;  %v6322_v17 = vmul.f32 -1.442695, %v1341_v16 }
 0x92b   :  { %6973 = vpow2.f32 %v6322_v17 }
 0x931   :  { %v6972_v18 = vpop.eup %6971 }
 0x932   :  { %v1378_v19 = vadd.f32 1.0, %v6972_v18 }
 0x934   :  { %6975 = vrcp.f32 %v1378_v19 }
 0x935   :  { %v6974_v21 = vpop.eup %6973 }
 0x936   :  { %v1345_v22 = vadd.f32 1.0, %v6974_v21 }
 0x938   :  { %6977 = vrcp.f32 %v1345_v22 }
 0x93e   :  { %v6976_v23 = vpop.eup %6975 }
 0x93f   :  { %v1399_v39 = vsub.f32 1.0, %v6976_v23  ;;  %v1405_v41 = vmul.f32 %v6976_v23, %v7517_v59 }
 0x942   :  { %v6978_v27 = vpop.eup %6977 }
 0x943   :  { %v1366_v44 = vsub.f32 1.0, %v6978_v27  ;;  %v1372_v46 = vmul.f32 %v6978_v27, %v7522_v0  ;;  %v7589_v0 = vrot.slane %v358_v49, %v7337_v20 }
 0x945   :  { %v374_v1 = vcombine.high %v7589_v0, %v7589_v0 }
 0x997   :  { %v1390_v25 = vpop.permute.xlu0 %1389 }
 0x998   :  { %v1392_v26 = vmul.f32 %v6976_v23, %v1390_v25  ;;  %v1774_v23 = vld [vmem:[%s8423_s2] sm:$0x3] }
 0x99a   :  { %1394 = vrot.lane.b32.xlu0 %v1392_v26, %s7163_s1 }
 0x99b   :  { %v1357_v29 = vpop.permute.xlu1 %1356 }
 0x99c   :  { %v1359_v30 = vmul.f32 %v6978_v27, %v1357_v29  ;;  %v1691_v27 = vld [vmem:[%s8424_s6] sm:$0x3] }
 0x99e   :  { %1361 = vrot.lane.b32.xlu1 %v1359_v30, %s7163_s1 }
 0xa0c   :  { %v1395_v28 = vpop.permute.xlu0 %1394 }
 0xa0d   :  { %v1397_v31 = vadd.f32 %v1395_v28, %v7491_v24  ;;  %v1433_v24 = vld [vmem:[%s8424_s6] sm:$0x3] }
 0xa0e   :  { %6652 = vmatpush3.msk.msra.mxu0 %vm412_vm2, %v1433_v24 }
 0xa0f   :  { %6979 = vtanh.f32 %v1397_v31  ;;  %6661 = vmatprep.subr.mxu0 %v7160_v13 }
 0xa10   :  { %v1362_v32 = vpop.permute.xlu1 %1361 }
 0xa11   :  { %v1364_v33 = vadd.f32 %v1362_v32, %v244_v14 }
 0xa13   :  { %6981 = vtanh.f32 %v1364_v33 }
 0xa19   :  { %v6980_v35 = vpop.eup %6979 }
 0xa1a   :  { %1401 = vrot.lane.b32.xlu0 %v6980_v35, %s7164_s7 }
 0xa1d   :  { %v6982_v51 = vpop.eup %6981 }
 0xa1e   :  { %1368 = vrot.lane.b32.xlu1 %v6982_v51, %s7164_s7 }
 0xa8c   :  { %v1402_v40 = vpop.permute.xlu0 %1401 }
 0xa8d   :  { %v1404_v42 = vmul.f32 %v1402_v40, %v1399_v39 }
 0xa8f   :  { %v7561_v43 = vadd.f32 %v1405_v41, %v1404_v42 }
 0xa90   :  { %v1369_v45 = vpop.permute.xlu1 %1368 }
 0xa91   :  { %v1371_v48 = vmul.f32 %v1369_v45, %v1366_v44  ;;  %v1427_v50 = vrot.slane %v7561_v43, %v7337_v20 }
 0xa93   :  { %v7566_v52 = vadd.f32 %v1372_v46, %v1371_v48  ;;  %1428 = vrot.lane.b32.xlu0 %v1427_v50, %s7164_s7 }
 0xa95   :  { %v1414_v54 = vrot.slane %v7566_v52, %v7337_v20 }
 0xa97   :  { %1415 = vrot.lane.b32.xlu1 %v1414_v54, %s7164_s7 }
 0xb05   :  { %v1429_v55 = vpop.permute.xlu0 %1428 }
 0xb06   :  { %1432 = vst.msk [vmem:[#allocation3 + $0x8] sm:$0x3] %vm644_vm4, %v1429_v55  ;;  %6659 = vmatmul.mubr.msk.f32.vlgmr.msra.gmra.mrb[10].mxu1 %vm408_vm5, %v1429_v55 }
 0xb07   :  { %6668 = vmatprep.mubr.msk.f32.mxu1 %vm7161_vm3, %v7160_v13  ;;  %6667 = vmatpush3.msk.msra.mxu1 %vm412_vm2, %v1774_v23 }
 0xb08   :  { %6676 = vmatprep.subr.mxu1 %v7160_v13 }
 0xb09   :  { %v1416_v56 = vpop.permute.xlu1 %1415 }
 0xb0a   :  { %1419 = vst.msk [vmem:[#allocation2 + $0x6] sm:$0x3] %vm644_vm4, %v1416_v56  ;;  %6654 = vmatmul.mubr.msk.f32.vlgmr.msra.gmra.mrb[10].mxu0 %vm408_vm5, %v1416_v56  ;;  %v260_v56 = vcombine.high %v7595_v3, %v7595_v3 }
 0xb0b   :  { %6663 = vmatprep.mubr.msk.f32.mxu0 %vm7161_vm3, %v7160_v13  ;;  %6662 = vmatpush3.msk.msra.mxu0 %vm412_vm2, %v1691_v27 }
 0xb0c   :  { %6671 = vmatprep.subr.mxu0 %v7160_v13 }
 0xbd9   :  { %v1595_v57 = vpop.f32.mrb[10].mxu1 }
 0xbda   :  { %v1596_v53 = vadd.f32 %v7377_v37, %v1595_v57  ;;  %v6660_v58 = vpop.f32.mrb[11].mxu1 }
 0xbdc   :  { %v1646_v59 = vrot.slane %v1596_v53, %v7337_v20  ;;  %v1632_v2 = vadd.f32 %v1596_v53, %v374_v1 }
 0xbdd   :  { %v1512_v60 = vpop.f32.mrb[10].mxu0 }
 0xbde   :  { %v1513_v61 = vadd.f32 %v7382_v38, %v1512_v60  ;;  %1647 = vrot.lane.b32.xlu0 %v1646_v59, %s7162_s10  ;;  %v6655_v62 = vpop.f32.mrb[11].mxu0  ;;  %v6331_v4 = vmul.f32 -1.442695, %v1632_v2 }
 0xbe0   :  { %v1613_v63 = vrot.slane %v1513_v61, %v7337_v20  ;;  %v1599_v5 = vadd.f32 %v1513_v61, %v7595_v3  ;;  %6983 = vpow2.f32 %v6331_v4 }
 0xbe2   :  { %1614 = vrot.lane.b32.xlu1 %v1613_v63, %s7162_s10  ;;  %v6330_v6 = vmul.f32 -1.442695, %v1599_v5 }
 0xbe4   :  { %6985 = vpow2.f32 %v6330_v6 }
 0xbea   :  { %v6984_v7 = vpop.eup %6983 }
 0xbeb   :  { %v1636_v8 = vadd.f32 1.0, %v6984_v7 }
 0xbed   :  { %6987 = vrcp.f32 %v1636_v8 }
 0xbee   :  { %v6986_v9 = vpop.eup %6985 }
 0xbef   :  { %v1603_v10 = vadd.f32 1.0, %v6986_v9  ;;  %v2032_v9 = vld [vmem:[%s8423_s2] sm:$0x3] }
 0xbf1   :  { %6989 = vrcp.f32 %v1603_v10 }
 0xbf7   :  { %v6988_v11 = vpop.eup %6987 }
 0xbf8   :  { %v1657_v29 = vsub.f32 1.0, %v6988_v11  ;;  %v1663_v28 = vmul.f32 %v6988_v11, %v7561_v43 }
 0xbfb   :  { %v6990_v15 = vpop.eup %6989 }
 0xbfc   :  { %v1624_v33 = vsub.f32 1.0, %v6990_v15  ;;  %v1630_v35 = vmul.f32 %v6990_v15, %v7566_v52 }
 0xc50   :  { %v1648_v12 = vpop.permute.xlu0 %1647 }
 0xc51   :  { %v1650_v14 = vmul.f32 %v6988_v11, %v1648_v12 }
 0xc53   :  { %1652 = vrot.lane.b32.xlu0 %v1650_v14, %s7163_s1 }
 0xc54   :  { %v1615_v16 = vpop.permute.xlu1 %1614 }
 0xc55   :  { %v1617_v17 = vmul.f32 %v6990_v15, %v1615_v16 }
 0xc57   :  { %1619 = vrot.lane.b32.xlu1 %v1617_v17, %s7163_s1 }
 0xcc5   :  { %v1653_v18 = vpop.permute.xlu0 %1652 }
 0xcc6   :  { %v1655_v19 = vadd.f32 %v1653_v18, %v374_v1 }
 0xcc8   :  { %6991 = vtanh.f32 %v1655_v19 }
 0xcc9   :  { %v1620_v21 = vpop.permute.xlu1 %1619 }
 0xcca   :  { %v1622_v22 = vadd.f32 %v1620_v21, %v7595_v3 }
 0xccc   :  { %6993 = vtanh.f32 %v1622_v22 }
 0xcd2   :  { %v6992_v25 = vpop.eup %6991 }
 0xcd3   :  { %1659 = vrot.lane.b32.xlu0 %v6992_v25, %s7164_s7 }
 0xcd6   :  { %v6994_v26 = vpop.eup %6993 }
 0xcd7   :  { %1626 = vrot.lane.b32.xlu1 %v6994_v26, %s7164_s7 }
 0xd45   :  { %v1660_v30 = vpop.permute.xlu0 %1659 }
 0xd46   :  { %v1662_v31 = vmul.f32 %v1660_v30, %v1657_v29 }
 0xd48   :  { %v7614_v32 = vadd.f32 %v1663_v28, %v1662_v31 }
 0xd49   :  { %v1627_v47 = vpop.permute.xlu1 %1626 }
 0xd4a   :  { %v1629_v51 = vmul.f32 %v1627_v47, %v1624_v33  ;;  %v1685_v24 = vrot.slane %v7614_v32, %v7337_v20 }
 0xd4c   :  { %v7619_v39 = vadd.f32 %v1630_v35, %v1629_v51  ;;  %1686 = vrot.lane.b32.xlu0 %v1685_v24, %s7164_s7  ;;  %v7685_v24 = vrot.slane %v7372_v36, %v7337_v20 }
 0xd4e   :  { %v1672_v40 = vrot.slane %v7619_v39, %v7337_v20 }
 0xd50   :  { %1673 = vrot.lane.b32.xlu1 %v1672_v40, %s7164_s7  ;;  %v373_v40 = vcombine.high %v7685_v24, %v7685_v24 }
 0xdbe   :  { %v1687_v41 = vpop.permute.xlu0 %1686 }
 0xdbf   :  { %1690 = vst.msk [vmem:[#allocation3 + $0x6] sm:$0x3] %vm644_vm4, %v1687_v41  ;;  %6669 = vmatmul.mubr.msk.f32.vlgmr.msra.gmra.mrb[12].mxu1 %vm408_vm5, %v1687_v41 }
 0xdc0   :  { %6678 = vmatprep.mubr.msk.f32.mxu1 %vm7161_vm3, %v7160_v13  ;;  %6677 = vmatpush3.msk.msra.mxu1 %vm412_vm2, %v2032_v9 }
 0xdc1   :  { %6686 = vmatprep.subr.mxu1 %v7160_v13 }
 0xdc2   :  { %v1674_v42 = vpop.permute.xlu1 %1673 }
 0xdc3   :  { %1677 = vst.msk [vmem:[#allocation2 + $0x8] sm:$0x3] %vm644_vm4, %v1674_v42  ;;  %6664 = vmatmul.mubr.msk.f32.vlgmr.msra.gmra.mrb[12].mxu0 %vm408_vm5, %v1674_v42 }
 0xdc4   :  { %6673 = vmatprep.mubr.msk.f32.mxu0 %vm7161_vm3, %v7160_v13 }
 0xe92   :  { %v1853_v43 = vpop.f32.mrb[12].mxu1 }
 0xe93   :  { %v1854_v44 = vadd.f32 %v7377_v37, %v1853_v43  ;;  %v6670_v45 = vpop.f32.mrb[13].mxu1 }
 0xe95   :  { %v1904_v46 = vrot.slane %v1854_v44, %v7337_v20  ;;  %v1890_v55 = vadd.f32 %v1854_v44, %v7589_v0 }
 0xe96   :  { %v1770_v48 = vpop.f32.mrb[12].mxu0 }
 0xe97   :  { %v1771_v50 = vadd.f32 %v7382_v38, %v1770_v48  ;;  %1905 = vrot.lane.b32.xlu0 %v1904_v46, %s7162_s10  ;;  %v6665_v52 = vpop.f32.mrb[13].mxu0  ;;  %v6339_v57 = vmul.f32 -1.442695, %v1890_v55 }
 0xe99   :  { %v1871_v54 = vrot.slane %v1771_v50, %v7337_v20  ;;  %v1857_v53 = vadd.f32 %v1771_v50, %v260_v56  ;;  %6995 = vpow2.f32 %v6339_v57 }
 0xe9b   :  { %1872 = vrot.lane.b32.xlu1 %v1871_v54, %s7162_s10  ;;  %v6338_v58 = vmul.f32 -1.442695, %v1857_v53 }
 0xe9d   :  { %6997 = vpow2.f32 %v6338_v58 }
 0xea3   :  { %v6996_v59 = vpop.eup %6995 }
 0xea4   :  { %v1894_v60 = vadd.f32 1.0, %v6996_v59 }
 0xea6   :  { %6999 = vrcp.f32 %v1894_v60 }
 0xea7   :  { %v6998_v61 = vpop.eup %6997 }
 0xea8   :  { %v1861_v62 = vadd.f32 1.0, %v6998_v61  ;;  %v2290_v61 = vld [vmem:[%s8423_s2] sm:$0x3] }
 0xeaa   :  { %7001 = vrcp.f32 %v1861_v62 }
 0xeb0   :  { %v7000_v63 = vpop.eup %6999 }
 0xeb1   :  { %v1915_v12 = vsub.f32 1.0, %v7000_v63  ;;  %v1921_v15 = vmul.f32 %v7000_v63, %v7614_v32 }
 0xeb4   :  { %v7002_v2 = vpop.eup %7001 }
 0xeb5   :  { %v1882_v18 = vsub.f32 1.0, %v7002_v2  ;;  %v1888_v21 = vmul.f32 %v7002_v2, %v7619_v39  ;;  %v245_v39 = vcombine.high %v7370_v34, %v7370_v34 }
 0xeb7   :  { %v7692_v42 = vrot.slane %v245_v39, %v7337_v20 }
 0xf09   :  { %v1906_v49 = vpop.permute.xlu0 %1905 }
 0xf0a   :  { %v1908_v1 = vmul.f32 %v7000_v63, %v1906_v49  ;;  %v2207_v49 = vld [vmem:[%s8424_s6] sm:$0x3] }
 0xf0c   :  { %1910 = vrot.lane.b32.xlu0 %v1908_v1, %s7163_s1 }
 0xf0d   :  { %v1873_v4 = vpop.permute.xlu1 %1872 }
 0xf0e   :  { %v1875_v5 = vmul.f32 %v7002_v2, %v1873_v4 }
 0xf10   :  { %1877 = vrot.lane.b32.xlu1 %v1875_v5, %s7163_s1 }
 0xf7e   :  { %v1911_v3 = vpop.permute.xlu0 %1910 }
 0xf7f   :  { %v1913_v6 = vadd.f32 %v1911_v3, %v7589_v0  ;;  %v1949_v0 = vld [vmem:[%s8424_s6] sm:$0x3] }
 0xf80   :  { %6672 = vmatpush3.msk.msra.mxu0 %vm412_vm2, %v1949_v0 }
 0xf81   :  { %7003 = vtanh.f32 %v1913_v6  ;;  %6681 = vmatprep.subr.mxu0 %v7160_v13 }
 0xf82   :  { %v1878_v7 = vpop.permute.xlu1 %1877 }
 0xf83   :  { %v1880_v8 = vadd.f32 %v1878_v7, %v260_v56 }
 0xf85   :  { %7005 = vtanh.f32 %v1880_v8 }
 0xf8b   :  { %v7004_v10 = vpop.eup %7003 }
 0xf8c   :  { %1917 = vrot.lane.b32.xlu0 %v7004_v10, %s7164_s7 }
 0xf8f   :  { %v7006_v11 = vpop.eup %7005 }
 0xf90   :  { %1884 = vrot.lane.b32.xlu1 %v7006_v11, %s7164_s7 }
 0xffe   :  { %v1918_v14 = vpop.permute.xlu0 %1917 }
 0xfff   :  { %v1920_v16 = vmul.f32 %v1918_v14, %v1915_v12 }
0x1001   :  { %v7658_v17 = vadd.f32 %v1921_v15, %v1920_v16 }
0x1002   :  { %v1885_v19 = vpop.permute.xlu1 %1884 }
0x1003   :  { %v1887_v22 = vmul.f32 %v1885_v19, %v1882_v18  ;;  %v1943_v23 = vrot.slane %v7658_v17, %v7337_v20 }
0x1005   :  { %v7663_v25 = vadd.f32 %v1888_v21, %v1887_v22  ;;  %1944 = vrot.lane.b32.xlu0 %v1943_v23, %s7164_s7 }
0x1007   :  { %v1930_v26 = vrot.slane %v7663_v25, %v7337_v20 }
0x1009   :  { %1931 = vrot.lane.b32.xlu1 %v1930_v26, %s7164_s7  ;;  %v261_v26 = vcombine.high %v7692_v42, %v7692_v42 }
0x1077   :  { %v1945_v27 = vpop.permute.xlu0 %1944 }
0x1078   :  { %1948 = vst.msk [vmem:[#allocation3 + $0x4] sm:$0x3] %vm644_vm4, %v1945_v27  ;;  %6679 = vmatmul.mubr.msk.f32.vlgmr.msra.gmra.mrb[14].mxu1 %vm408_vm5, %v1945_v27 }
0x1079   :  { %6688 = vmatprep.mubr.msk.f32.mxu1 %vm7161_vm3, %v7160_v13  ;;  %6687 = vmatpush3.msk.msra.mxu1 %vm412_vm2, %v2290_v61  ;;  %v2480_v61 = vld [vmem:[%s8430_s29] sm:$0x3] }
0x107b   :  { %v1932_v29 = vpop.permute.xlu1 %1931 }
0x107c   :  { %1935 = vst.msk [vmem:[#allocation2 + $0xa] sm:$0x3] %vm644_vm4, %v1932_v29  ;;  %6674 = vmatmul.mubr.msk.f32.vlgmr.msra.gmra.mrb[14].mxu0 %vm408_vm5, %v1932_v29 }
0x107d   :  { %6683 = vmatprep.mubr.msk.f32.mxu0 %vm7161_vm3, %v7160_v13  ;;  %6682 = vmatpush3.msk.msra.mxu0 %vm412_vm2, %v2207_v49 }
0x114b   :  { %v2111_v30 = vpop.f32.mrb[14].mxu1 }
0x114c   :  { %v2112_v28 = vadd.f32 %v7377_v37, %v2111_v30  ;;  %v6680_v31 = vpop.f32.mrb[15].mxu1 }
0x114e   :  { %v2162_v32 = vrot.slane %v2112_v28, %v7337_v20  ;;  %v2148_v41 = vadd.f32 %v2112_v28, %v373_v40 }
0x114f   :  { %v2028_v33 = vpop.f32.mrb[14].mxu0 }
0x1150   :  { %v2029_v47 = vadd.f32 %v7382_v38, %v2028_v33  ;;  %2163 = vrot.lane.b32.xlu0 %v2162_v32, %s7162_s10  ;;  %v6675_v35 = vpop.f32.mrb[15].mxu0  ;;  %v6347_v43 = vmul.f32 -1.442695, %v2148_v41 }
0x1152   :  { %v2129_v51 = vrot.slane %v2029_v47, %v7337_v20  ;;  %v2115_v44 = vadd.f32 %v2029_v47, %v7692_v42  ;;  %7007 = vpow2.f32 %v6347_v43 }
0x1154   :  { %2130 = vrot.lane.b32.xlu1 %v2129_v51, %s7162_s10  ;;  %v6346_v45 = vmul.f32 -1.442695, %v2115_v44 }
0x1156   :  { %7009 = vpow2.f32 %v6346_v45 }
0x115c   :  { %v7008_v46 = vpop.eup %7007 }
0x115d   :  { %v2152_v48 = vadd.f32 1.0, %v7008_v46  ;;  %v2784_v46 = vld [vmem:[%s8394_s15] sm:$0x3] }
0x115e   :  { %6701 = vmatprep.subr.msk.mxu1 %vm412_vm2, %v2784_v46 }
0x115f   :  { %7011 = vrcp.f32 %v2152_v48  ;;  %v2481_v48 = vld [vmem:[%s8429_s27] sm:$0x3] }
0x1160   :  { %v7010_v36 = vpop.eup %7009  ;;  %6691 = vmatprep.subr.msk.mxu0 %vm412_vm2, %v2481_v48 }
0x1161   :  { %v2119_v50 = vadd.f32 1.0, %v7010_v36 }
0x1163   :  { %7013 = vrcp.f32 %v2119_v50 }
0x1169   :  { %v7012_v34 = vpop.eup %7011 }
0x116a   :  { %v2173_v1 = vsub.f32 1.0, %v7012_v34  ;;  %v2179_v4 = vmul.f32 %v7012_v34, %v7658_v17 }
0x116d   :  { %v7014_v55 = vpop.eup %7013 }
0x116e   :  { %v2140_v6 = vsub.f32 1.0, %v7014_v55  ;;  %v2146_v8 = vmul.f32 %v7014_v55, %v7663_v25 }
0x11c2   :  { %v2164_v52 = vpop.permute.xlu0 %2163 }
0x11c3   :  { %v2166_v54 = vmul.f32 %v7012_v34, %v2164_v52 }
0x11c5   :  { %2168 = vrot.lane.b32.xlu0 %v2166_v54, %s7163_s1 }
0x11c6   :  { %v2131_v56 = vpop.permute.xlu1 %2130 }
0x11c7   :  { %v2133_v57 = vmul.f32 %v7014_v55, %v2131_v56 }
0x11c9   :  { %2135 = vrot.lane.b32.xlu1 %v2133_v57, %s7163_s1 }
0x1237   :  { %v2169_v53 = vpop.permute.xlu0 %2168 }
0x1238   :  { %v2171_v58 = vadd.f32 %v2169_v53, %v373_v40 }
0x123a   :  { %7015 = vtanh.f32 %v2171_v58 }
0x123b   :  { %v2136_v59 = vpop.permute.xlu1 %2135 }
0x123c   :  { %v2138_v60 = vadd.f32 %v2136_v59, %v7692_v42  ;;  %v2783_v59 = vld [vmem:[%s8393_s14] sm:$0x3] }
0x123e   :  { %7017 = vtanh.f32 %v2138_v60 }
0x1244   :  { %v7016_v62 = vpop.eup %7015 }
0x1245   :  { %2175 = vrot.lane.b32.xlu0 %v7016_v62, %s7164_s7 }
0x1248   :  { %v7018_v63 = vpop.eup %7017 }
0x1249   :  { %2142 = vrot.lane.b32.xlu1 %v7018_v63, %s7164_s7  ;;  %v2476_v63 = vld [vmem:[#allocation3 + $0x8] sm:$0x3] }
0x12b7   :  { %v2176_v2 = vpop.permute.xlu0 %2175 }
0x12b8   :  { %v2178_v5 = vmul.f32 %v2176_v2, %v2173_v1  ;;  %v2474_v1 = vld [vmem:[#allocation3 + $0x4] sm:$0x3]  ;;  %v2467_v2 = vld [vmem:[#allocation2 + $0x6] sm:$0x3] }
0x12ba   :  { %v7709_v3 = vadd.f32 %v2179_v4, %v2178_v5  ;;  %v2477_v4 = vld [vmem:[#allocation3 + $0xa] sm:$0x3]  ;;  %v2478_v5 = vld [vmem:[#allocation3 + $0xc] sm:$0x3] }
0x12bb   :  { %v2143_v7 = vpop.permute.xlu1 %2142 }
0x12bc   :  { %v2145_v9 = vmul.f32 %v2143_v7, %v2140_v6  ;;  %v2201_v10 = vrot.slane %v7709_v3, %v7337_v20  ;;  %v2507_v6 = vcombine.low %v2476_v63, %v2477_v4  ;;  %v2465_v7 = vld [vmem:[#allocation2 + $0x2] sm:$0x3] }
0x12be   :  { %v7714_v11 = vadd.f32 %v2146_v8, %v2145_v9  ;;  %2202 = vrot.lane.b32.xlu0 %v2201_v10, %s7164_s7  ;;  %v2466_v8 = vld [vmem:[#allocation2 + $0x4] sm:$0x3]  ;;  %v2479_v10 = vld [vmem:[#allocation3 + $0xe] sm:$0x3] }
0x12c0   :  { %v2188_v0 = vrot.slane %v7714_v11, %v7337_v20 }
0x12c2   :  { %2189 = vrot.lane.b32.xlu1 %v2188_v0, %s7164_s7 }
0x1330   :  { %v2203_v12 = vpop.permute.xlu0 %2202 }
0x1331   :  { %2206 = vst.msk [vmem:[#allocation3 + $0x2] sm:$0x3] %vm644_vm4, %v2203_v12  ;;  %6689 = vmatmul.mubr.msk.f32.vlgmr.msra.gmra.mrb[16].mxu1 %vm408_vm5, %v2203_v12 }
0x1332   :  { %6702 = vmatpush3.msk.msra.mxu1 %vm412_vm2, %v2784_v46 }
0x1333   :  { %6706 = vmatprep.subr.msk.mxu1 %vm412_vm2, %v2783_v59 }
0x1334   :  { %v2190_v14 = vpop.permute.xlu1 %2189 }
0x1335   :  { %2193 = vst.msk [vmem:[#allocation2 + $0xc] sm:$0x3] %vm644_vm4, %v2190_v14  ;;  %6684 = vmatmul.mubr.msk.f32.vlgmr.msra.gmra.mrb[16].mxu0 %vm408_vm5, %v2190_v14  ;;  %v2508_v14 = vcombine.low %v2478_v5, %v2479_v10 }
0x1336   :  { %6692 = vmatpush3.msk.msra.mxu0 %vm412_vm2, %v2481_v48 }
0x1337   :  { %6696 = vmatprep.subr.msk.mxu0 %vm412_vm2, %v2480_v61 }
0x1338   :  { %v2473_v12 = vld [vmem:[#allocation3 + $0x2] sm:$0x3] }
0x1404   :  { %v2369_v15 = vpop.f32.mrb[16].mxu1 }
0x1405   :  { %v2370_v16 = vadd.f32 %v7377_v37, %v2369_v15  ;;  %v6690_v17 = vpop.f32.mrb[17].mxu1  ;;  %v2464_v15 = vld [vmem:[#allocation2] sm:$0x3] }
0x1406   :  { %v2614_v17 = vcombine.low %v2464_v15, %v2465_v7 }
0x1407   :  { %v2420_v18 = vrot.slane %v2370_v16, %v7337_v20  ;;  %v2406_v25 = vadd.f32 %v2370_v16, %v7685_v24 }
0x1408   :  { %v2286_v19 = vpop.f32.mrb[16].mxu0 }
0x1409   :  { %v2287_v21 = vadd.f32 %v7382_v38, %v2286_v19  ;;  %2421 = vrot.lane.b32.xlu0 %v2420_v18, %s7162_s10  ;;  %v6685_v22 = vpop.f32.mrb[17].mxu0  ;;  %v6355_v27 = vmul.f32 -1.442695, %v2406_v25  ;;  %v2515_v18 = vrot.slane %v2507_v6, %v7337_v20 }
0x140b   :  { %v2387_v23 = vrot.slane %v2287_v21, %v7337_v20  ;;  %v2373_v37 = vadd.f32 %v2287_v21, %v261_v26  ;;  %7019 = vpow2.f32 %v6355_v27  ;;  %v2622_v27 = vrot.slane %v2614_v17, %v7337_v20 }
0x140d   :  { %2388 = vrot.lane.b32.xlu1 %v2387_v23, %s7162_s10  ;;  %v6354_v29 = vmul.f32 -1.442695, %v2373_v37  ;;  %v2522_v23 = vrot.slane %v2508_v14, %v7337_v20  ;;  %v2469_v37 = vld [vmem:[#allocation2 + $0xa] sm:$0x3] }
0x140f   :  { %7021 = vpow2.f32 %v6354_v29  ;;  %v2470_v29 = vld [vmem:[#allocation2 + $0xc] sm:$0x3] }
0x1415   :  { %v7020_v30 = vpop.eup %7019 }
0x1416   :  { %v2410_v28 = vadd.f32 1.0, %v7020_v30  ;;  %v2523_v30 = vcombine.low %v2515_v18, %v2522_v23  ;;  %v6376_v18 = vld [vmem:[%s8399_s20 + $0xe] sm:$0x3] }
0x1418   :  { %7023 = vrcp.f32 %v2410_v28 }
0x1419   :  { %v7022_v38 = vpop.eup %7021 }
0x141a   :  { %v2377_v31 = vadd.f32 1.0, %v7022_v38 }
0x141c   :  { %7025 = vrcp.f32 %v2377_v31  ;;  %v2468_v31 = vld [vmem:[#allocation2 + $0x8] sm:$0x3] }
0x1422   :  { %v7024_v32 = vpop.eup %7023 }
0x1423   :  { %v2431_v36 = vsub.f32 1.0, %v7024_v32  ;;  %v2437_v50 = vmul.f32 %v7024_v32, %v7709_v3  ;;  %v2475_v3 = vld [vmem:[#allocation3 + $0x6] sm:$0x3] }
0x1424   :  { %v2491_v9 = vcombine.low %v2474_v1, %v2475_v3 }
0x1426   :  { %v7026_v35 = vpop.eup %7025  ;;  %v2505_v21 = vrot.slane %v2491_v9, %v7337_v20 }
0x1427   :  { %v2398_v54 = vsub.f32 1.0, %v7026_v35  ;;  %v2404_v56 = vmul.f32 %v7026_v35, %v7714_v11  ;;  %v2615_v11 = vcombine.low %v2466_v8, %v2467_v2 }
0x1429   :  { %v2629_v22 = vrot.slane %v2615_v11, %v7337_v20 }
0x142b   :  { %v2630_v38 = vcombine.low %v2622_v27, %v2629_v22 }
0x147b   :  { %v2422_v33 = vpop.permute.xlu0 %2421 }
0x147c   :  { %v2424_v47 = vmul.f32 %v7024_v32, %v2422_v33  ;;  %v2631_v32 = vcombine.low %v2468_v31, %v2469_v37 }
0x147e   :  { %2426 = vrot.lane.b32.xlu0 %v2424_v47, %s7163_s1  ;;  %v2639_v47 = vrot.slane %v2631_v32, %v7337_v20 }
0x147f   :  { %v2389_v51 = vpop.permute.xlu1 %2388 }
0x1480   :  { %v2391_v39 = vmul.f32 %v7026_v35, %v2389_v51  ;;  %v7785_v51 = vld [vmem:[%s8395_s16] sm:$0x3] }
0x1482   :  { %2393 = vrot.lane.b32.xlu1 %v2391_v39, %s7163_s1  ;;  %v7790_v39 = vld [vmem:[%s8390_s11] sm:$0x3] }
0x14f0   :  { %v2427_v40 = vpop.permute.xlu0 %2426 }
0x14f1   :  { %v2429_v41 = vadd.f32 %v2427_v40, %v7685_v24  ;;  %v6362_v40 = vld [vmem:[%s8391_s12] ss:$0 sm:$0xff] }
0x14f3   :  { %7027 = vtanh.f32 %v2429_v41  ;;  %v6369_v41 = vld [vmem:[%s8396_s17] ss:$0 sm:$0xff] }
0x14f4   :  { %v2394_v42 = vpop.permute.xlu1 %2393 }
0x14f5   :  { %v2396_v43 = vadd.f32 %v2394_v42, %v261_v26 }
0x14f7   :  { %7029 = vtanh.f32 %v2396_v43 }
0x14fd   :  { %v7028_v44 = vpop.eup %7027 }
0x14fe   :  { %2433 = vrot.lane.b32.xlu0 %v7028_v44, %s7164_s7 }
0x1501   :  { %v7030_v45 = vpop.eup %7029 }
0x1502   :  { %2400 = vrot.lane.b32.xlu1 %v7030_v45, %s7164_s7 }
0x1570   :  { %v2434_v24 = vpop.permute.xlu0 %2433 }
0x1571   :  { %v2436_v34 = vmul.f32 %v2434_v24, %v2431_v36  ;;  %v7823_v36 = vld [vmem:[%s8392_s13] ss:$0 sm:$0xff] }
0x1572   :  { %v7828_v24 = vld [vmem:[%s8397_s18] ss:$0 sm:$0xff] }
0x1573   :  { %v2438_v52 = vadd.f32 %v2437_v50, %v2436_v34 }
0x1574   :  { %v2401_v55 = vpop.permute.xlu1 %2400 }
0x1575   :  { %v2403_v57 = vmul.f32 %v2401_v55, %v2398_v54  ;;  %v2459_v53 = vrot.slane %v2438_v52, %v7337_v20 }
0x1577   :  { %v2405_v58 = vadd.f32 %v2404_v56, %v2403_v57  ;;  %2460 = vrot.lane.b32.xlu0 %v2459_v53, %s7164_s7 }
0x1579   :  { %v2446_v60 = vrot.slane %v2405_v58, %v7337_v20 }
0x157b   :  { %2447 = vrot.lane.b32.xlu1 %v2446_v60, %s7164_s7 }
0x15e9   :  { %v2461_v62 = vpop.permute.xlu0 %2460 }
0x15ea   :  { %2463 = vst.msk [vmem:[#allocation3] sm:$0x3] %vm644_vm4, %v2461_v62 }
0x15ed   :  { %v2448_v49 = vpop.permute.xlu1 %2447 }
0x15ee   :  { %2451 = vst.msk [vmem:[#allocation2 + $0xe] sm:$0x3] %vm644_vm4, %v2448_v49 }
0x15f1   :  { %v2472_v0 = vld [vmem:[#allocation3] sm:$0x3] }
0x15f2   :  { %v2490_v16 = vcombine.low %v2472_v0, %v2473_v12 }
0x15f4   :  { %v2498_v19 = vrot.slane %v2490_v16, %v7337_v20 }
0x15f5   :  { %v2471_v25 = vld [vmem:[#allocation2 + $0xe] sm:$0x3] }
0x15f6   :  { %v2506_v26 = vcombine.low %v2498_v19, %v2505_v21  ;;  %v2632_v28 = vcombine.low %v2470_v29, %v2471_v25  ;;  %v3222_v19 = vld [vmem:[%s8398_s19] sm:$0x3] }
0x15f8   :  { %6693 = vmatprep.mubr.msk.f32.mxu0 %vm408_vm5, %v2506_v26  ;;  %6703 = vmatprep.mubr.msk.f32.mxu1 %vm408_vm5, %v2506_v26  ;;  %v2646_v33 = vrot.slane %v2632_v28, %v7337_v20 }
0x15f9   :  { %6694 = vmatmul.mubr.msk.f32.vlgmr.msra.gmra.mrb[18].mxu0 %vm408_vm5, %v2523_v30  ;;  %6704 = vmatmul.mubr.msk.f32.vlgmr.msra.gmra.mrb[18].mxu1 %vm408_vm5, %v2523_v30 }
0x15fa   :  { %6707 = vmatpush3.msk.msra.mxu1 %vm412_vm2, %v2783_v59  ;;  %6698 = vmatprep.mubr.msk.f32.mxu0 %vm408_vm5, %v2630_v38  ;;  %v2647_v35 = vcombine.low %v2639_v47, %v2646_v33 }
0x15fb   :  { %6708 = vmatprep.mubr.msk.f32.mxu1 %vm408_vm5, %v2630_v38  ;;  %6697 = vmatpush3.msk.msra.mxu0 %vm412_vm2, %v2480_v61 }
0x15fc   :  { %6716 = vmatprep.subr.mxu1 %v7160_v13  ;;  %6711 = vmatprep.subr.mxu0 %v7160_v13 }
0x1601   :  { %6699 = vmatmul.mubr.msk.f32.vlgmr.msra.gmra.mrb[18].mxu0 %vm408_vm5, %v2647_v35  ;;  %6709 = vmatmul.mubr.msk.f32.vlgmr.msra.gmra.mrb[18].mxu1 %vm408_vm5, %v2647_v35 }
0x1602   :  { %6717 = vmatpush3.msk.msra.mxu1 %vm412_vm2, %v7785_v51  ;;  %6712 = vmatpush3.msk.msra.mxu0 %vm412_vm2, %v7790_v39 }
0x1603   :  { %6713 = vmatprep.mubr.msk.f32.mxu0 %vm7161_vm3, %v7160_v13  ;;  %6718 = vmatprep.mubr.msk.f32.mxu1 %vm7161_vm3, %v7160_v13 }
0x1604   :  { %6721 = vmatprep.subr.mxu0 %v7160_v13  ;;  %6726 = vmatprep.subr.mxu1 %v7160_v13 }
0x1605   :  { %6714 = vmatmul.mubr.f32.vlgmr.msra.gmra.mrb[20].mxu0 %v7160_v13  ;;  %6719 = vmatmul.mubr.f32.vlgmr.msra.gmra.mrb[20].mxu1 %v7160_v13 }
0x1606   :  { %6728 = vmatprep.mubr.msk.f32.mxu1 %vm7161_vm3, %v7160_v13  ;;  %6723 = vmatprep.mubr.msk.f32.mxu0 %vm7161_vm3, %v7160_v13 }
0x1607   :  { %6722 = vmatpush3.msk.msra.mxu0 %vm412_vm2, %v6376_v18  ;;  %6727 = vmatpush3.msk.msra.mxu1 %vm412_vm2, %v3222_v19 }
0x1608   :  { %6731 = vmatprep.subr.mxu0 %v7160_v13  ;;  %6736 = vmatprep.subr.mxu1 %v7160_v13 }
0x16d4   :  { %v6700_v42 = vpop.f32.mrb[18].mxu0  ;;  %v6710_v43 = vpop.f32.mrb[18].mxu1 }
0x16d5   :  { %v7816_v44 = vadd.f32 %v6700_v42, %v6362_v40  ;;  %v2721_v45 = vpop.f32.mrb[19].mxu0  ;;  %v2932_v46 = vpop.f32.mrb[19].mxu1  ;;  %v7836_v58 = vadd.f32 %v6710_v43, %v6369_v41 }
0x16d6   :  { %v7818_v48 = vadd.f32 %v6369_v41, %v2932_v46  ;;  %v7840_v60 = vadd.f32 %v6362_v40, %v2721_v45 }
0x16d7   :  { %v2969_v59 = vcombine.high %v7836_v58, %v7836_v58 }
0x16d8   :  { %v3071_v50 = vpop.f32.mrb[20].mxu0  ;;  %v3152_v34 = vpop.f32.mrb[20].mxu1  ;;  %v7847_v62 = vrot.slane %v7840_v60, %v7337_v20 }
0x16d9   :  { %v3072_v52 = vadd.f32 %v7823_v36, %v3071_v50  ;;  %v3153_v54 = vadd.f32 %v7828_v24, %v3152_v34  ;;  %v6720_v55 = vpop.f32.mrb[21].mxu1  ;;  %v6715_v56 = vpop.f32.mrb[21].mxu0  ;;  %v7843_v61 = vrot.slane %v2969_v59, %v7337_v20 }
0x16db   :  { %v3170_v57 = vrot.slane %v3072_v52, %v7337_v20  ;;  %v3203_v53 = vrot.slane %v3153_v54, %v7337_v20  ;;  %v2985_v63 = vcombine.high %v7843_v61, %v7843_v61  ;;  %v3156_v49 = vadd.f32 %v3072_v52, %v7847_v62 }
0x16dd   :  { %3204 = vrot.lane.b32.xlu0 %v3203_v53, %s7162_s10  ;;  %3171 = vrot.lane.b32.xlu1 %v3170_v57, %s7162_s10  ;;  %v3189_v1 = vadd.f32 %v3153_v54, %v2985_v63  ;;  %v6374_v2 = vmul.f32 -1.442695, %v3156_v49  ;;  %v2756_v53 = vcombine.high %v7847_v62, %v7847_v62 }
0x16df   :  { %v6375_v4 = vmul.f32 -1.442695, %v3189_v1  ;;  %7031 = vpow2.f32 %v6374_v2 }
0x16e1   :  { %7033 = vpow2.f32 %v6375_v4 }
0x16e9   :  { %v7032_v5 = vpop.eup %7031 }
0x16ea   :  { %v3160_v6 = vadd.f32 1.0, %v7032_v5 }
0x16eb   :  { %v7034_v3 = vpop.eup %7033 }
0x16ec   :  { %v3193_v7 = vadd.f32 1.0, %v7034_v3  ;;  %7035 = vrcp.f32 %v3160_v6 }
0x16ee   :  { %7037 = vrcp.f32 %v3193_v7 }
0x16f6   :  { %v7036_v8 = vpop.eup %7035 }
0x16f7   :  { %v3181_v26 = vsub.f32 1.0, %v7036_v8  ;;  %v3187_v30 = vmul.f32 0.0, %v7036_v8 }
0x16f8   :  { %v7038_v9 = vpop.eup %7037 }
0x16f9   :  { %v3214_v23 = vsub.f32 1.0, %v7038_v9  ;;  %v3220_v27 = vmul.f32 0.0, %v7038_v9 }
0x174f   :  { %v3205_v10 = vpop.permute.xlu0 %3204  ;;  %v3172_v11 = vpop.permute.xlu1 %3171 }
0x1750   :  { %v3207_v0 = vmul.f32 %v7038_v9, %v3205_v10  ;;  %v3174_v12 = vmul.f32 %v7036_v8, %v3172_v11 }
0x1752   :  { %3209 = vrot.lane.b32.xlu0 %v3207_v0, %s7163_s1  ;;  %3176 = vrot.lane.b32.xlu1 %v3174_v12, %s7163_s1 }
0x17c4   :  { %v3210_v14 = vpop.permute.xlu0 %3209  ;;  %v3177_v15 = vpop.permute.xlu1 %3176 }
0x17c5   :  { %v3212_v16 = vadd.f32 %v3210_v14, %v2985_v63  ;;  %v3179_v17 = vadd.f32 %v3177_v15, %v7847_v62  ;;  %v6387_v15 = vld [vmem:[%s8398_s19 + $0x2] sm:$0x3] }
0x17c7   :  { %7039 = vtanh.f32 %v3212_v16  ;;  %v6390_v16 = vld [vmem:[%s8399_s20 + $0xc] sm:$0x3] }
0x17c8   :  { %7041 = vtanh.f32 %v3179_v17 }
0x17d1   :  { %v7040_v21 = vpop.eup %7039 }
0x17d2   :  { %v7042_v22 = vpop.eup %7041  ;;  %3216 = vrot.lane.b32.xlu0 %v7040_v21, %s7164_s7 }
0x17d3   :  { %3183 = vrot.lane.b32.xlu1 %v7042_v22, %s7164_s7 }
0x1844   :  { %v3217_v25 = vpop.permute.xlu0 %3216 }
0x1845   :  { %v3219_v37 = vmul.f32 %v3217_v25, %v3214_v23  ;;  %v3184_v29 = vpop.permute.xlu1 %3183 }
0x1846   :  { %v3186_v28 = vmul.f32 %v3184_v29, %v3181_v26 }
0x1847   :  { %v7867_v38 = vadd.f32 %v3220_v27, %v3219_v37 }
0x1848   :  { %v7869_v31 = vadd.f32 %v3187_v30, %v3186_v28 }
0x1849   :  { %v3232_v32 = vrot.slane %v7867_v38, %v7337_v20 }
0x184a   :  { %v3317_v33 = vrot.slane %v7869_v31, %v7337_v20 }
0x184b   :  { %3233 = vrot.lane.b32.xlu0 %v3232_v32, %s7164_s7 }
0x184c   :  { %3318 = vrot.lane.b32.xlu1 %v3317_v33, %s7164_s7 }
0x18bd   :  { %v3234_v47 = vpop.permute.xlu0 %3233 }
0x18be   :  { %v3319_v35 = vpop.permute.xlu1 %3318  ;;  %6724 = vmatmul.mubr.msk.f32.vlgmr.msra.gmra.mrb[22].mxu0 %vm408_vm5, %v3234_v47 }
0x18bf   :  { %6729 = vmatmul.mubr.msk.f32.vlgmr.msra.gmra.mrb[22].mxu1 %vm408_vm5, %v3319_v35  ;;  %6732 = vmatpush3.msk.msra.mxu0 %vm412_vm2, %v7790_v39 }
0x18c0   :  { %6737 = vmatpush3.msk.msra.mxu1 %vm412_vm2, %v7785_v51  ;;  %6733 = vmatprep.mubr.msk.f32.mxu0 %vm7161_vm3, %v7160_v13 }
0x18c1   :  { %6738 = vmatprep.mubr.msk.f32.mxu1 %vm7161_vm3, %v7160_v13  ;;  %6741 = vmatprep.subr.mxu0 %v7160_v13 }
0x18c2   :  { %6734 = vmatmul.mubr.msk.f32.vlgmr.msra.gmra.mrb[24].mxu0 %vm408_vm5, %v3319_v35  ;;  %6746 = vmatprep.subr.mxu1 %v7160_v13 }
0x18c3   :  { %6739 = vmatmul.mubr.msk.f32.vlgmr.msra.gmra.mrb[24].mxu1 %vm408_vm5, %v3234_v47  ;;  %6743 = vmatprep.mubr.msk.f32.mxu0 %vm7161_vm3, %v7160_v13 }
0x18c4   :  { %6748 = vmatprep.mubr.msk.f32.mxu1 %vm7161_vm3, %v7160_v13  ;;  %6742 = vmatpush3.msk.msra.mxu0 %vm412_vm2, %v6387_v15 }
0x18c5   :  { %6747 = vmatpush3.msk.msra.mxu1 %vm412_vm2, %v6390_v16  ;;  %6751 = vmatprep.subr.mxu0 %v7160_v13 }
0x18c6   :  { %6756 = vmatprep.subr.mxu1 %v7160_v13 }
0x1991   :  { %v3306_v40 = vpop.f32.mrb[22].mxu0 }
0x1992   :  { %v3391_v41 = vpop.f32.mrb[22].mxu1  ;;  %v6725_v42 = vpop.f32.mrb[23].mxu0 }
0x1993   :  { %v7895_v43 = vadd.f32 %v3391_v41, %v3306_v40  ;;  %v6730_v45 = vpop.f32.mrb[23].mxu1 }
0x1995   :  { %v3461_v46 = vpop.f32.mrb[24].mxu0 }
0x1996   :  { %v3462_v50 = vadd.f32 %v7823_v36, %v3461_v46  ;;  %v3531_v34 = vpop.f32.mrb[24].mxu1  ;;  %v6735_v52 = vpop.f32.mrb[25].mxu0 }
0x1997   :  { %v3532_v54 = vadd.f32 %v7828_v24, %v3531_v34  ;;  %v6740_v55 = vpop.f32.mrb[25].mxu1 }
0x1998   :  { %v3549_v56 = vrot.slane %v3462_v50, %v7337_v20  ;;  %v3535_v59 = vadd.f32 %v3462_v50, %v2756_v53 }
0x1999   :  { %v3582_v57 = vrot.slane %v3532_v54, %v7337_v20  ;;  %v3568_v63 = vadd.f32 %v3532_v54, %v7843_v61 }
0x199a   :  { %3550 = vrot.lane.b32.xlu0 %v3549_v56, %s7162_s10  ;;  %v6385_v49 = vmul.f32 -1.442695, %v3535_v59  ;;  %v7964_v56 = vrot.slane %v7836_v58, %v7337_v20 }
0x199b   :  { %3583 = vrot.lane.b32.xlu1 %v3582_v57, %s7162_s10  ;;  %v6386_v1 = vmul.f32 -1.442695, %v3568_v63 }
0x199c   :  { %7043 = vpow2.f32 %v6385_v49 }
0x199d   :  { %7045 = vpow2.f32 %v6386_v1 }
0x19a6   :  { %v7044_v2 = vpop.eup %7043 }
0x19a7   :  { %v7046_v4 = vpop.eup %7045  ;;  %v3539_v5 = vadd.f32 1.0, %v7044_v2 }
0x19a8   :  { %v3572_v3 = vadd.f32 1.0, %v7046_v4 }
0x19a9   :  { %7047 = vrcp.f32 %v3539_v5 }
0x19aa   :  { %7049 = vrcp.f32 %v3572_v3 }
0x19b3   :  { %v7048_v6 = vpop.eup %7047 }
0x19b4   :  { %v7050_v8 = vpop.eup %7049  ;;  %v3560_v18 = vsub.f32 1.0, %v7048_v6  ;;  %v3566_v23 = vmul.f32 %v7048_v6, %v7869_v31 }
0x19b5   :  { %v3593_v19 = vsub.f32 1.0, %v7050_v8  ;;  %v3599_v26 = vmul.f32 %v7050_v8, %v7867_v38 }
0x1a0c   :  { %v3551_v7 = vpop.permute.xlu0 %3550 }
0x1a0d   :  { %v3553_v9 = vmul.f32 %v7048_v6, %v3551_v7  ;;  %v3584_v10 = vpop.permute.xlu1 %3583 }
0x1a0e   :  { %v3586_v11 = vmul.f32 %v7050_v8, %v3584_v10 }
0x1a0f   :  { %3555 = vrot.lane.b32.xlu0 %v3553_v9, %s7163_s1 }
0x1a10   :  { %3588 = vrot.lane.b32.xlu1 %v3586_v11, %s7163_s1 }
0x1a81   :  { %v3556_v62 = vpop.permute.xlu0 %3555 }
0x1a82   :  { %v3589_v0 = vpop.permute.xlu1 %3588  ;;  %v3558_v12 = vadd.f32 %v3556_v62, %v2756_v53  ;;  %v2984_v53 = vcombine.high %v7964_v56, %v7964_v56 }
0x1a83   :  { %v3591_v14 = vadd.f32 %v3589_v0, %v7843_v61 }
0x1a84   :  { %7051 = vtanh.f32 %v3558_v12  ;;  %v6399_v12 = vld [vmem:[%s8398_s19 + $0x4] sm:$0x3] }
0x1a85   :  { %7053 = vtanh.f32 %v3591_v14  ;;  %v6402_v14 = vld [vmem:[%s8399_s20 + $0xa] sm:$0x3] }
0x1a8e   :  { %v7052_v17 = vpop.eup %7051 }
0x1a8f   :  { %v7054_v61 = vpop.eup %7053  ;;  %3562 = vrot.lane.b32.xlu0 %v7052_v17, %s7164_s7 }
0x1a90   :  { %3595 = vrot.lane.b32.xlu1 %v7054_v61, %s7164_s7 }
0x1b01   :  { %v3563_v21 = vpop.permute.xlu0 %3562 }
0x1b02   :  { %v3596_v22 = vpop.permute.xlu1 %3595  ;;  %v3565_v25 = vmul.f32 %v3563_v21, %v3560_v18 }
0x1b03   :  { %v3598_v27 = vmul.f32 %v3596_v22, %v3593_v19 }
0x1b04   :  { %v7923_v37 = vadd.f32 %v3566_v23, %v3565_v25 }
0x1b05   :  { %v7925_v29 = vadd.f32 %v3599_v26, %v3598_v27 }
0x1b06   :  { %v3610_v30 = vrot.slane %v7923_v37, %v7337_v20 }
0x1b07   :  { %v3698_v28 = vrot.slane %v7925_v29, %v7337_v20 }
0x1b08   :  { %3611 = vrot.lane.b32.xlu0 %v3610_v30, %s7164_s7 }
0x1b09   :  { %3699 = vrot.lane.b32.xlu1 %v3698_v28, %s7164_s7 }
0x1b7a   :  { %v3612_v32 = vpop.permute.xlu0 %3611 }
0x1b7b   :  { %v3700_v31 = vpop.permute.xlu1 %3699  ;;  %6744 = vmatmul.mubr.msk.f32.vlgmr.msra.gmra.mrb[26].mxu0 %vm408_vm5, %v3612_v32 }
0x1b7c   :  { %6749 = vmatmul.mubr.msk.f32.vlgmr.msra.gmra.mrb[26].mxu1 %vm408_vm5, %v3700_v31  ;;  %6752 = vmatpush3.msk.msra.mxu0 %vm412_vm2, %v7790_v39 }
0x1b7d   :  { %6757 = vmatpush3.msk.msra.mxu1 %vm412_vm2, %v7785_v51  ;;  %6753 = vmatprep.mubr.msk.f32.mxu0 %vm7161_vm3, %v7160_v13 }
0x1b7e   :  { %6758 = vmatprep.mubr.msk.f32.mxu1 %vm7161_vm3, %v7160_v13  ;;  %6761 = vmatprep.subr.mxu0 %v7160_v13 }
0x1b7f   :  { %6754 = vmatmul.mubr.msk.f32.vlgmr.msra.gmra.mrb[28].mxu0 %vm408_vm5, %v3612_v32  ;;  %6766 = vmatprep.subr.mxu1 %v7160_v13 }
0x1b80   :  { %6759 = vmatmul.mubr.msk.f32.vlgmr.msra.gmra.mrb[28].mxu1 %vm408_vm5, %v3700_v31  ;;  %6763 = vmatprep.mubr.msk.f32.mxu0 %vm7161_vm3, %v7160_v13 }
0x1b81   :  { %6768 = vmatprep.mubr.msk.f32.mxu1 %vm7161_vm3, %v7160_v13  ;;  %6762 = vmatpush3.msk.msra.mxu0 %vm412_vm2, %v6399_v12 }
0x1b82   :  { %6767 = vmatpush3.msk.msra.mxu1 %vm412_vm2, %v6402_v14  ;;  %6771 = vmatprep.subr.mxu0 %v7160_v13 }
0x1b83   :  { %6776 = vmatprep.subr.mxu1 %v7160_v13 }
0x1c4e   :  { %v3684_v38 = vpop.f32.mrb[26].mxu0 }
0x1c4f   :  { %v3688_v33 = vadd.f32 %v3684_v38, %v7895_v43  ;;  %v3772_v47 = vpop.f32.mrb[26].mxu1  ;;  %v6745_v35 = vpop.f32.mrb[27].mxu0  ;;  %v2741_v43 = vcombine.high %v7840_v60, %v7840_v60 }
0x1c50   :  { %v6750_v40 = vpop.f32.mrb[27].mxu1 }
0x1c51   :  { %v7952_v41 = vadd.f32 %v3772_v47, %v3688_v33  ;;  %v7967_v57 = vrot.slane %v2741_v43, %v7337_v20 }
0x1c52   :  { %v3843_v42 = vpop.f32.mrb[28].mxu0 }
0x1c53   :  { %v3844_v45 = vadd.f32 %v7823_v36, %v3843_v42  ;;  %v3913_v46 = vpop.f32.mrb[28].mxu1  ;;  %v6755_v50 = vpop.f32.mrb[29].mxu0 }
0x1c54   :  { %v3914_v34 = vadd.f32 %v7828_v24, %v3913_v46  ;;  %v6760_v52 = vpop.f32.mrb[29].mxu1 }
0x1c55   :  { %v3931_v54 = vrot.slane %v3844_v45, %v7337_v20  ;;  %v3917_v59 = vadd.f32 %v3844_v45, %v7967_v57 }
0x1c56   :  { %v3964_v55 = vrot.slane %v3914_v34, %v7337_v20  ;;  %v3950_v63 = vadd.f32 %v3914_v34, %v2984_v53 }
0x1c57   :  { %3932 = vrot.lane.b32.xlu0 %v3931_v54, %s7162_s10  ;;  %v6397_v49 = vmul.f32 -1.442695, %v3917_v59 }
0x1c58   :  { %3965 = vrot.lane.b32.xlu1 %v3964_v55, %s7162_s10  ;;  %v6398_v1 = vmul.f32 -1.442695, %v3950_v63 }
0x1c59   :  { %7055 = vpow2.f32 %v6397_v49 }
0x1c5a   :  { %7057 = vpow2.f32 %v6398_v1 }
0x1c63   :  { %v7056_v2 = vpop.eup %7055 }
0x1c64   :  { %v7058_v4 = vpop.eup %7057  ;;  %v3921_v60 = vadd.f32 1.0, %v7056_v2 }
0x1c65   :  { %v3954_v5 = vadd.f32 1.0, %v7058_v4 }
0x1c66   :  { %7059 = vrcp.f32 %v3921_v60 }
0x1c67   :  { %7061 = vrcp.f32 %v3954_v5 }
0x1c70   :  { %v7060_v58 = vpop.eup %7059 }
0x1c71   :  { %v7062_v6 = vpop.eup %7061  ;;  %v3942_v17 = vsub.f32 1.0, %v7060_v58  ;;  %v3948_v21 = vmul.f32 %v7060_v58, %v7923_v37 }
0x1c72   :  { %v3975_v61 = vsub.f32 1.0, %v7062_v6  ;;  %v3981_v23 = vmul.f32 %v7062_v6, %v7925_v29 }
0x1cc9   :  { %v3933_v3 = vpop.permute.xlu0 %3932 }
0x1cca   :  { %v3966_v7 = vpop.permute.xlu1 %3965  ;;  %v3935_v8 = vmul.f32 %v7060_v58, %v3933_v3 }
0x1ccb   :  { %v3968_v9 = vmul.f32 %v7062_v6, %v3966_v7 }
0x1ccc   :  { %3937 = vrot.lane.b32.xlu0 %v3935_v8, %s7163_s1 }
0x1ccd   :  { %3970 = vrot.lane.b32.xlu1 %v3968_v9, %s7163_s1 }
0x1d3e   :  { %v3938_v10 = vpop.permute.xlu0 %3937 }
0x1d3f   :  { %v3971_v11 = vpop.permute.xlu1 %3970  ;;  %v3940_v62 = vadd.f32 %v3938_v10, %v7967_v57  ;;  %v6411_v10 = vld [vmem:[%s8398_s19 + $0x6] sm:$0x3] }
0x1d40   :  { %v3973_v0 = vadd.f32 %v3971_v11, %v2984_v53  ;;  %v6414_v11 = vld [vmem:[%s8399_s20 + $0x8] sm:$0x3] }
0x1d41   :  { %7063 = vtanh.f32 %v3940_v62 }
0x1d42   :  { %7065 = vtanh.f32 %v3973_v0 }
0x1d4b   :  { %v7064_v15 = vpop.eup %7063 }
0x1d4c   :  { %v7066_v16 = vpop.eup %7065  ;;  %3944 = vrot.lane.b32.xlu0 %v7064_v15, %s7164_s7 }
0x1d4d   :  { %3977 = vrot.lane.b32.xlu1 %v7066_v16, %s7164_s7 }
0x1dbe   :  { %v3945_v18 = vpop.permute.xlu0 %3944 }
0x1dbf   :  { %v3978_v19 = vpop.permute.xlu1 %3977  ;;  %v3947_v22 = vmul.f32 %v3945_v18, %v3942_v17 }
0x1dc0   :  { %v3980_v25 = vmul.f32 %v3978_v19, %v3975_v61 }
0x1dc1   :  { %v7989_v26 = vadd.f32 %v3948_v21, %v3947_v22 }
0x1dc2   :  { %v7991_v27 = vadd.f32 %v3981_v23, %v3980_v25 }
0x1dc3   :  { %v3992_v30 = vrot.slane %v7989_v26, %v7337_v20 }
0x1dc4   :  { %v4080_v28 = vrot.slane %v7991_v27, %v7337_v20 }
0x1dc5   :  { %3993 = vrot.lane.b32.xlu0 %v3992_v30, %s7164_s7 }
0x1dc6   :  { %4081 = vrot.lane.b32.xlu1 %v4080_v28, %s7164_s7 }
0x1e37   :  { %v3994_v32 = vpop.permute.xlu0 %3993 }
0x1e38   :  { %v4082_v37 = vpop.permute.xlu1 %4081  ;;  %6764 = vmatmul.mubr.msk.f32.vlgmr.msra.gmra.mrb[30].mxu0 %vm408_vm5, %v3994_v32 }
0x1e39   :  { %6769 = vmatmul.mubr.msk.f32.vlgmr.msra.gmra.mrb[30].mxu1 %vm408_vm5, %v4082_v37  ;;  %6772 = vmatpush3.msk.msra.mxu0 %vm412_vm2, %v7790_v39 }
0x1e3a   :  { %6777 = vmatpush3.msk.msra.mxu1 %vm412_vm2, %v7785_v51  ;;  %6773 = vmatprep.mubr.msk.f32.mxu0 %vm7161_vm3, %v7160_v13 }
0x1e3b   :  { %6778 = vmatprep.mubr.msk.f32.mxu1 %vm7161_vm3, %v7160_v13  ;;  %6781 = vmatprep.subr.mxu0 %v7160_v13 }
0x1e3c   :  { %6774 = vmatmul.mubr.msk.f32.vlgmr.msra.gmra.mrb[32].mxu0 %vm408_vm5, %v3994_v32  ;;  %6786 = vmatprep.subr.mxu1 %v7160_v13 }
0x1e3d   :  { %6779 = vmatmul.mubr.msk.f32.vlgmr.msra.gmra.mrb[32].mxu1 %vm408_vm5, %v4082_v37  ;;  %6783 = vmatprep.mubr.msk.f32.mxu0 %vm7161_vm3, %v7160_v13 }
0x1e3e   :  { %6788 = vmatprep.mubr.msk.f32.mxu1 %vm7161_vm3, %v7160_v13  ;;  %6782 = vmatpush3.msk.msra.mxu0 %vm412_vm2, %v6411_v10 }
0x1e3f   :  { %6787 = vmatpush3.msk.msra.mxu1 %vm412_vm2, %v6414_v11  ;;  %6791 = vmatprep.subr.mxu0 %v7160_v13 }
0x1e40   :  { %6796 = vmatprep.subr.mxu1 %v7160_v13 }
0x1f0b   :  { %v4066_v29 = vpop.f32.mrb[30].mxu0 }
0x1f0c   :  { %v4070_v31 = vadd.f32 %v4066_v29, %v7952_v41  ;;  %v4154_v38 = vpop.f32.mrb[30].mxu1  ;;  %v6765_v33 = vpop.f32.mrb[31].mxu0  ;;  %v2757_v41 = vcombine.high %v7967_v57, %v7967_v57 }
0x1f0d   :  { %v6770_v47 = vpop.f32.mrb[31].mxu1 }
0x1f0e   :  { %v8018_v35 = vadd.f32 %v4154_v38, %v4070_v31 }
0x1f0f   :  { %v4225_v40 = vpop.f32.mrb[32].mxu0 }
0x1f10   :  { %v4226_v42 = vadd.f32 %v7823_v36, %v4225_v40  ;;  %v4295_v45 = vpop.f32.mrb[32].mxu1  ;;  %v6775_v46 = vpop.f32.mrb[33].mxu0 }
0x1f11   :  { %v4296_v50 = vadd.f32 %v7828_v24, %v4295_v45  ;;  %v6780_v34 = vpop.f32.mrb[33].mxu1 }
0x1f12   :  { %v4313_v52 = vrot.slane %v4226_v42, %v7337_v20  ;;  %v4299_v55 = vadd.f32 %v4226_v42, %v2757_v41  ;;  %v8090_v34 = vrot.slane %v7816_v44, %v7337_v20 }
0x1f13   :  { %v4346_v54 = vrot.slane %v4296_v50, %v7337_v20  ;;  %v4332_v43 = vadd.f32 %v4296_v50, %v7964_v56 }
0x1f14   :  { %4314 = vrot.lane.b32.xlu0 %v4313_v52, %s7162_s10  ;;  %v6409_v53 = vmul.f32 -1.442695, %v4299_v55 }
0x1f15   :  { %4347 = vrot.lane.b32.xlu1 %v4346_v54, %s7162_s10  ;;  %v6410_v59 = vmul.f32 -1.442695, %v4332_v43 }
0x1f16   :  { %7067 = vpow2.f32 %v6409_v53 }
0x1f17   :  { %7069 = vpow2.f32 %v6410_v59 }
0x1f20   :  { %v7068_v63 = vpop.eup %7067 }
0x1f21   :  { %v7070_v49 = vpop.eup %7069  ;;  %v4303_v1 = vadd.f32 1.0, %v7068_v63 }
0x1f22   :  { %v4336_v2 = vadd.f32 1.0, %v7070_v49 }
0x1f23   :  { %7071 = vrcp.f32 %v4303_v1 }
0x1f24   :  { %7073 = vrcp.f32 %v4336_v2 }
0x1f2d   :  { %v7072_v4 = vpop.eup %7071 }
0x1f2e   :  { %v7074_v5 = vpop.eup %7073  ;;  %v4324_v0 = vsub.f32 1.0, %v7072_v4  ;;  %v4330_v16 = vmul.f32 %v7072_v4, %v7989_v26 }
0x1f2f   :  { %v4357_v12 = vsub.f32 1.0, %v7074_v5  ;;  %v4363_v61 = vmul.f32 %v7074_v5, %v7991_v27 }
0x1f86   :  { %v4315_v60 = vpop.permute.xlu0 %4314 }
0x1f87   :  { %v4348_v58 = vpop.permute.xlu1 %4347  ;;  %v4317_v3 = vmul.f32 %v7072_v4, %v4315_v60 }
0x1f88   :  { %v4350_v6 = vmul.f32 %v7074_v5, %v4348_v58 }
0x1f89   :  { %4319 = vrot.lane.b32.xlu0 %v4317_v3, %s7163_s1 }
0x1f8a   :  { %4352 = vrot.lane.b32.xlu1 %v4350_v6, %s7163_s1 }
0x1ffb   :  { %v4320_v57 = vpop.permute.xlu0 %4319 }
0x1ffc   :  { %v4353_v7 = vpop.permute.xlu1 %4352  ;;  %v4322_v8 = vadd.f32 %v4320_v57, %v2757_v41 }
0x1ffd   :  { %v4355_v9 = vadd.f32 %v4353_v7, %v7964_v56 }
0x1ffe   :  { %7075 = vtanh.f32 %v4322_v8  ;;  %v6423_v8 = vld [vmem:[%s8398_s19 + $0x8] sm:$0x3] }
0x1fff   :  { %7077 = vtanh.f32 %v4355_v9  ;;  %v6426_v9 = vld [vmem:[%s8399_s20 + $0x6] sm:$0x3] }
0x2008   :  { %v7076_v62 = vpop.eup %7075 }
0x2009   :  { %v7078_v56 = vpop.eup %7077  ;;  %4326 = vrot.lane.b32.xlu0 %v7076_v62, %s7164_s7 }
0x200a   :  { %4359 = vrot.lane.b32.xlu1 %v7078_v56, %s7164_s7 }
0x207b   :  { %v4327_v14 = vpop.permute.xlu0 %4326 }
0x207c   :  { %v4360_v15 = vpop.permute.xlu1 %4359  ;;  %v4329_v17 = vmul.f32 %v4327_v14, %v4324_v0 }
0x207d   :  { %v4362_v18 = vmul.f32 %v4360_v15, %v4357_v12 }
0x207e   :  { %v8046_v19 = vadd.f32 %v4330_v16, %v4329_v17 }
0x207f   :  { %v8048_v21 = vadd.f32 %v4363_v61, %v4362_v18 }
0x2080   :  { %v4374_v22 = vrot.slane %v8046_v19, %v7337_v20 }
0x2081   :  { %v4462_v23 = vrot.slane %v8048_v21, %v7337_v20 }
0x2082   :  { %4375 = vrot.lane.b32.xlu0 %v4374_v22, %s7164_s7 }
0x2083   :  { %4463 = vrot.lane.b32.xlu1 %v4462_v23, %s7164_s7 }
0x20f4   :  { %v4376_v25 = vpop.permute.xlu0 %4375 }
0x20f5   :  { %v4464_v26 = vpop.permute.xlu1 %4463  ;;  %6784 = vmatmul.mubr.msk.f32.vlgmr.msra.gmra.mrb[34].mxu0 %vm408_vm5, %v4376_v25 }
0x20f6   :  { %6789 = vmatmul.mubr.msk.f32.vlgmr.msra.gmra.mrb[34].mxu1 %vm408_vm5, %v4464_v26  ;;  %6792 = vmatpush3.msk.msra.mxu0 %vm412_vm2, %v7790_v39 }
0x20f7   :  { %6797 = vmatpush3.msk.msra.mxu1 %vm412_vm2, %v7785_v51  ;;  %6793 = vmatprep.mubr.msk.f32.mxu0 %vm7161_vm3, %v7160_v13 }
0x20f8   :  { %6798 = vmatprep.mubr.msk.f32.mxu1 %vm7161_vm3, %v7160_v13  ;;  %6801 = vmatprep.subr.mxu0 %v7160_v13 }
0x20f9   :  { %6794 = vmatmul.mubr.msk.f32.vlgmr.msra.gmra.mrb[36].mxu0 %vm408_vm5, %v4376_v25  ;;  %6806 = vmatprep.subr.mxu1 %v7160_v13 }
0x20fa   :  { %6799 = vmatmul.mubr.msk.f32.vlgmr.msra.gmra.mrb[36].mxu1 %vm408_vm5, %v4464_v26  ;;  %6803 = vmatprep.mubr.msk.f32.mxu0 %vm7161_vm3, %v7160_v13 }
0x20fb   :  { %6808 = vmatprep.mubr.msk.f32.mxu1 %vm7161_vm3, %v7160_v13  ;;  %6802 = vmatpush3.msk.msra.mxu0 %vm412_vm2, %v6423_v8 }
0x20fc   :  { %6807 = vmatpush3.msk.msra.mxu1 %vm412_vm2, %v6426_v9  ;;  %6811 = vmatprep.subr.mxu0 %v7160_v13 }
0x20fd   :  { %6816 = vmatprep.subr.mxu1 %v7160_v13 }
0x21c8   :  { %v4448_v27 = vpop.f32.mrb[34].mxu0 }
0x21c9   :  { %v4452_v30 = vadd.f32 %v4448_v27, %v8018_v35  ;;  %v4536_v28 = vpop.f32.mrb[34].mxu1  ;;  %v6785_v32 = vpop.f32.mrb[35].mxu0  ;;  %v2952_v35 = vcombine.high %v7818_v48, %v7818_v48 }
0x21ca   :  { %v6790_v37 = vpop.f32.mrb[35].mxu1 }
0x21cb   :  { %v8075_v29 = vadd.f32 %v4536_v28, %v4452_v30  ;;  %v8086_v50 = vrot.slane %v2952_v35, %v7337_v20 }
0x21cc   :  { %v4607_v31 = vpop.f32.mrb[36].mxu0 }
0x21cd   :  { %v4608_v38 = vadd.f32 %v7823_v36, %v4607_v31  ;;  %v4677_v33 = vpop.f32.mrb[36].mxu1  ;;  %v6795_v47 = vpop.f32.mrb[37].mxu0  ;;  %v2968_v52 = vcombine.high %v8086_v50, %v8086_v50 }
0x21ce   :  { %v4678_v40 = vadd.f32 %v7828_v24, %v4677_v33  ;;  %v6800_v42 = vpop.f32.mrb[37].mxu1 }
0x21cf   :  { %v4695_v45 = vrot.slane %v4608_v38, %v7337_v20  ;;  %v4681_v54 = vadd.f32 %v4608_v38, %v8090_v34 }
0x21d0   :  { %v4728_v46 = vrot.slane %v4678_v40, %v7337_v20  ;;  %v4714_v41 = vadd.f32 %v4678_v40, %v2968_v52 }
0x21d1   :  { %4696 = vrot.lane.b32.xlu0 %v4695_v45, %s7162_s10  ;;  %v6421_v55 = vmul.f32 -1.442695, %v4681_v54 }
0x21d2   :  { %4729 = vrot.lane.b32.xlu1 %v4728_v46, %s7162_s10  ;;  %v6422_v43 = vmul.f32 -1.442695, %v4714_v41 }
0x21d3   :  { %7079 = vpow2.f32 %v6421_v55 }
0x21d4   :  { %7081 = vpow2.f32 %v6422_v43 }
0x21dd   :  { %v7080_v53 = vpop.eup %7079 }
0x21de   :  { %v7082_v59 = vpop.eup %7081  ;;  %v4685_v63 = vadd.f32 1.0, %v7080_v53 }
0x21df   :  { %v4718_v49 = vadd.f32 1.0, %v7082_v59 }
0x21e0   :  { %7083 = vrcp.f32 %v4685_v63 }
0x21e1   :  { %7085 = vrcp.f32 %v4718_v49 }
0x21ea   :  { %v7084_v1 = vpop.eup %7083 }
0x21eb   :  { %v7086_v4 = vpop.eup %7085  ;;  %v4706_v62 = vsub.f32 1.0, %v7084_v1  ;;  %v4712_v14 = vmul.f32 %v7084_v1, %v8046_v19 }
0x21ec   :  { %v4739_v56 = vsub.f32 1.0, %v7086_v4  ;;  %v4745_v16 = vmul.f32 %v7086_v4, %v8048_v21 }
0x2243   :  { %v4697_v2 = vpop.permute.xlu0 %4696 }
0x2244   :  { %v4730_v60 = vpop.permute.xlu1 %4729  ;;  %v4699_v5 = vmul.f32 %v7084_v1, %v4697_v2 }
0x2245   :  { %v4732_v58 = vmul.f32 %v7086_v4, %v4730_v60 }
0x2246   :  { %4701 = vrot.lane.b32.xlu0 %v4699_v5, %s7163_s1 }
0x2247   :  { %4734 = vrot.lane.b32.xlu1 %v4732_v58, %s7163_s1 }
0x22b8   :  { %v4702_v3 = vpop.permute.xlu0 %4701 }
0x22b9   :  { %v4735_v6 = vpop.permute.xlu1 %4734  ;;  %v4704_v57 = vadd.f32 %v4702_v3, %v8090_v34  ;;  %v6435_v3 = vld [vmem:[%s8398_s19 + $0xa] sm:$0x3] }
0x22ba   :  { %v4737_v7 = vadd.f32 %v4735_v6, %v2968_v52  ;;  %v6438_v6 = vld [vmem:[%s8399_s20 + $0x4] sm:$0x3] }
0x22bb   :  { %7087 = vtanh.f32 %v4704_v57 }
0x22bc   :  { %7089 = vtanh.f32 %v4737_v7 }
0x22c5   :  { %v7088_v10 = vpop.eup %7087 }
0x22c6   :  { %v7090_v11 = vpop.eup %7089  ;;  %4708 = vrot.lane.b32.xlu0 %v7088_v10, %s7164_s7 }
0x22c7   :  { %4741 = vrot.lane.b32.xlu1 %v7090_v11, %s7164_s7 }
0x2338   :  { %v4709_v0 = vpop.permute.xlu0 %4708 }
0x2339   :  { %v4742_v12 = vpop.permute.xlu1 %4741  ;;  %v4711_v15 = vmul.f32 %v4709_v0, %v4706_v62 }
0x233a   :  { %v4744_v17 = vmul.f32 %v4742_v12, %v4739_v56 }
0x233b   :  { %v8112_v61 = vadd.f32 %v4712_v14, %v4711_v15 }
0x233c   :  { %v8114_v18 = vadd.f32 %v4745_v16, %v4744_v17 }
0x233d   :  { %v4756_v22 = vrot.slane %v8112_v61, %v7337_v20 }
0x233e   :  { %v4844_v23 = vrot.slane %v8114_v18, %v7337_v20 }
0x233f   :  { %4757 = vrot.lane.b32.xlu0 %v4756_v22, %s7164_s7 }
0x2340   :  { %4845 = vrot.lane.b32.xlu1 %v4844_v23, %s7164_s7 }
0x23b1   :  { %v4758_v25 = vpop.permute.xlu0 %4757 }
0x23b2   :  { %v4846_v19 = vpop.permute.xlu1 %4845  ;;  %6804 = vmatmul.mubr.msk.f32.vlgmr.msra.gmra.mrb[38].mxu0 %vm408_vm5, %v4758_v25 }
0x23b3   :  { %6809 = vmatmul.mubr.msk.f32.vlgmr.msra.gmra.mrb[38].mxu1 %vm408_vm5, %v4846_v19  ;;  %6812 = vmatpush3.msk.msra.mxu0 %vm412_vm2, %v7790_v39 }
0x23b4   :  { %6817 = vmatpush3.msk.msra.mxu1 %vm412_vm2, %v7785_v51  ;;  %6813 = vmatprep.mubr.msk.f32.mxu0 %vm7161_vm3, %v7160_v13 }
0x23b5   :  { %6818 = vmatprep.mubr.msk.f32.mxu1 %vm7161_vm3, %v7160_v13  ;;  %6821 = vmatprep.subr.mxu0 %v7160_v13 }
0x23b6   :  { %6814 = vmatmul.mubr.msk.f32.vlgmr.msra.gmra.mrb[40].mxu0 %vm408_vm5, %v4758_v25  ;;  %6826 = vmatprep.subr.mxu1 %v7160_v13 }
0x23b7   :  { %6819 = vmatmul.mubr.msk.f32.vlgmr.msra.gmra.mrb[40].mxu1 %vm408_vm5, %v4846_v19  ;;  %6823 = vmatprep.mubr.msk.f32.mxu0 %vm7161_vm3, %v7160_v13 }
0x23b8   :  { %6828 = vmatprep.mubr.msk.f32.mxu1 %vm7161_vm3, %v7160_v13  ;;  %6822 = vmatpush3.msk.msra.mxu0 %vm412_vm2, %v6435_v3 }
0x23b9   :  { %6827 = vmatpush3.msk.msra.mxu1 %vm412_vm2, %v6438_v6  ;;  %6831 = vmatprep.subr.mxu0 %v7160_v13 }
0x23ba   :  { %6836 = vmatprep.subr.mxu1 %v7160_v13 }
0x2485   :  { %v4830_v21 = vpop.f32.mrb[38].mxu0 }
0x2486   :  { %v4834_v26 = vadd.f32 %v4830_v21, %v8075_v29  ;;  %v4918_v27 = vpop.f32.mrb[38].mxu1  ;;  %v6805_v30 = vpop.f32.mrb[39].mxu0  ;;  %v2773_v29 = vcombine.high %v8090_v34, %v8090_v34 }
0x2487   :  { %v6810_v28 = vpop.f32.mrb[39].mxu1 }
0x2488   :  { %v8141_v32 = vadd.f32 %v4918_v27, %v4834_v26 }
0x2489   :  { %v4989_v37 = vpop.f32.mrb[40].mxu0 }
0x248a   :  { %v4990_v31 = vadd.f32 %v7823_v36, %v4989_v37  ;;  %v5059_v38 = vpop.f32.mrb[40].mxu1  ;;  %v6815_v33 = vpop.f32.mrb[41].mxu0 }
0x248b   :  { %v5060_v47 = vadd.f32 %v7828_v24, %v5059_v38  ;;  %v6820_v40 = vpop.f32.mrb[41].mxu1  ;;  %v8210_v38 = vrot.slane %v7818_v48, %v7337_v20 }
0x248c   :  { %v5077_v42 = vrot.slane %v4990_v31, %v7337_v20  ;;  %v5063_v46 = vadd.f32 %v4990_v31, %v2773_v29 }
0x248d   :  { %v5110_v45 = vrot.slane %v5060_v47, %v7337_v20  ;;  %v5096_v35 = vadd.f32 %v5060_v47, %v8086_v50 }
0x248e   :  { %5078 = vrot.lane.b32.xlu0 %v5077_v42, %s7162_s10  ;;  %v6433_v52 = vmul.f32 -1.442695, %v5063_v46 }
0x248f   :  { %5111 = vrot.lane.b32.xlu1 %v5110_v45, %s7162_s10  ;;  %v6434_v54 = vmul.f32 -1.442695, %v5096_v35 }
0x2490   :  { %7091 = vpow2.f32 %v6433_v52 }
0x2491   :  { %7093 = vpow2.f32 %v6434_v54 }
0x249a   :  { %v7092_v41 = vpop.eup %7091 }
0x249b   :  { %v7094_v55 = vpop.eup %7093  ;;  %v5067_v43 = vadd.f32 1.0, %v7092_v41 }
0x249c   :  { %v5100_v53 = vadd.f32 1.0, %v7094_v55 }
0x249d   :  { %7095 = vrcp.f32 %v5067_v43 }
0x249e   :  { %7097 = vrcp.f32 %v5100_v53 }
0x24a7   :  { %v7096_v59 = vpop.eup %7095 }
0x24a8   :  { %v7098_v49 = vpop.eup %7097  ;;  %v5088_v7 = vsub.f32 1.0, %v7096_v59  ;;  %v5094_v11 = vmul.f32 %v7096_v59, %v8112_v61 }
0x24a9   :  { %v5121_v8 = vsub.f32 1.0, %v7098_v49  ;;  %v5127_v56 = vmul.f32 %v7098_v49, %v8114_v18 }
0x2500   :  { %v5079_v63 = vpop.permute.xlu0 %5078 }
0x2501   :  { %v5112_v1 = vpop.permute.xlu1 %5111  ;;  %v5081_v2 = vmul.f32 %v7096_v59, %v5079_v63 }
0x2502   :  { %v5114_v4 = vmul.f32 %v7098_v49, %v5112_v1  ;;  %v6447_v49 = vld [vmem:[%s8398_s19 + $0xc] sm:$0x3]  ;;  %v6450_v1 = vld [vmem:[%s8399_s20 + $0x2] sm:$0x3] }
0x2503   :  { %5083 = vrot.lane.b32.xlu0 %v5081_v2, %s7163_s1 }
0x2504   :  { %5116 = vrot.lane.b32.xlu1 %v5114_v4, %s7163_s1 }
0x2575   :  { %v5084_v34 = vpop.permute.xlu0 %5083 }
0x2576   :  { %v5117_v60 = vpop.permute.xlu1 %5116  ;;  %v5086_v5 = vadd.f32 %v5084_v34, %v2773_v29 }
0x2577   :  { %v5119_v58 = vadd.f32 %v5117_v60, %v8086_v50 }
0x2578   :  { %7099 = vtanh.f32 %v5086_v5 }
0x2579   :  { %7101 = vtanh.f32 %v5119_v58 }
0x2582   :  { %v7100_v57 = vpop.eup %7099 }
0x2583   :  { %v7102_v50 = vpop.eup %7101  ;;  %5090 = vrot.lane.b32.xlu0 %v7100_v57, %s7164_s7 }
0x2584   :  { %5123 = vrot.lane.b32.xlu1 %v7102_v50, %s7164_s7 }
0x25f5   :  { %v5091_v9 = vpop.permute.xlu0 %5090 }
0x25f6   :  { %v5124_v10 = vpop.permute.xlu1 %5123  ;;  %v5093_v62 = vmul.f32 %v5091_v9, %v5088_v7 }
0x25f7   :  { %v5126_v0 = vmul.f32 %v5124_v10, %v5121_v8 }
0x25f8   :  { %v8169_v12 = vadd.f32 %v5094_v11, %v5093_v62 }
0x25f9   :  { %v8171_v14 = vadd.f32 %v5127_v56, %v5126_v0  ;;  %v7131_v56 = vld [vmem:[%s8390_s11] sm:$0x3] }
0x25fa   :  { %v5138_v15 = vrot.slane %v8169_v12, %v7337_v20  ;;  %v7132_v0 = vld [vmem:[%s8395_s16] sm:$0x3] }
0x25fb   :  { %v5226_v16 = vrot.slane %v8171_v14, %v7337_v20 }
0x25fc   :  { %5139 = vrot.lane.b32.xlu0 %v5138_v15, %s7164_s7 }
0x25fd   :  { %5227 = vrot.lane.b32.xlu1 %v5226_v16, %s7164_s7 }
0x266e   :  { %v5140_v17 = vpop.permute.xlu0 %5139 }
0x266f   :  { %v5228_v61 = vpop.permute.xlu1 %5227  ;;  %6824 = vmatmul.mubr.msk.f32.vlgmr.msra.gmra.mrb[42].mxu0 %vm408_vm5, %v5140_v17 }
0x2670   :  { %6829 = vmatmul.mubr.msk.f32.vlgmr.msra.gmra.mrb[42].mxu1 %vm408_vm5, %v5228_v61  ;;  %6832 = vmatpush3.msk.msra.mxu0 %vm412_vm2, %v7790_v39 }
0x2671   :  { %6837 = vmatpush3.msk.msra.mxu1 %vm412_vm2, %v7785_v51  ;;  %6833 = vmatprep.mubr.msk.f32.mxu0 %vm7161_vm3, %v7160_v13 }
0x2672   :  { %6838 = vmatprep.mubr.msk.f32.mxu1 %vm7161_vm3, %v7160_v13  ;;  %6841 = vmatprep.subr.mxu0 %v7160_v13 }
0x2673   :  { %6834 = vmatmul.mubr.msk.f32.vlgmr.msra.gmra.mrb[44].mxu0 %vm408_vm5, %v5140_v17  ;;  %6846 = vmatprep.subr.mxu1 %v7160_v13 }
0x2674   :  { %6839 = vmatmul.mubr.msk.f32.vlgmr.msra.gmra.mrb[44].mxu1 %vm408_vm5, %v5228_v61  ;;  %6843 = vmatprep.mubr.msk.f32.mxu0 %vm7161_vm3, %v7160_v13 }
0x2675   :  { %6848 = vmatprep.mubr.msk.f32.mxu1 %vm7161_vm3, %v7160_v13  ;;  %6842 = vmatpush3.msk.msra.mxu0 %vm412_vm2, %v6447_v49 }
0x2676   :  { %6847 = vmatpush3.msk.msra.mxu1 %vm412_vm2, %v6450_v1  ;;  %6851 = vmatprep.subr.mxu0 %v7160_v13 }
0x2677   :  { %6856 = vmatprep.subr.mxu1 %v7160_v13 }
0x2742   :  { %v5212_v51 = vpop.f32.mrb[42].mxu0 }
0x2743   :  { %v5216_v39 = vadd.f32 %v5212_v51, %v8141_v32  ;;  %v5300_v18 = vpop.f32.mrb[42].mxu1  ;;  %v6825_v22 = vpop.f32.mrb[43].mxu0  ;;  %v2758_v32 = vcombine.high %v7816_v44, %v7816_v44 }
0x2744   :  { %v6830_v23 = vpop.f32.mrb[43].mxu1 }
0x2745   :  { %v8198_v25 = vadd.f32 %v5300_v18, %v5216_v39  ;;  %v7133_v39 = vld [vmem:[%s8392_s13] ss:$0 sm:$0xff] }
0x2746   :  { %v5371_v19 = vpop.f32.mrb[44].mxu0 }
0x2747   :  { %v5372_v21 = vadd.f32 %v7823_v36, %v5371_v19  ;;  %v5441_v26 = vpop.f32.mrb[44].mxu1  ;;  %v6835_v27 = vpop.f32.mrb[45].mxu0  ;;  %v8213_v36 = vrot.slane %v2758_v32, %v7337_v20  ;;  %v7134_v19 = vld [vmem:[%s8397_s18] ss:$0 sm:$0xff] }
0x2748   :  { %v5442_v30 = vadd.f32 %v7828_v24, %v5441_v26  ;;  %v6840_v28 = vpop.f32.mrb[45].mxu1  ;;  %v2967_v24 = vcombine.high %v8210_v38, %v8210_v38 }
0x2749   :  { %v5459_v37 = vrot.slane %v5372_v21, %v7337_v20  ;;  %v5445_v33 = vadd.f32 %v5372_v21, %v8213_v36 }
0x274a   :  { %v5492_v31 = vrot.slane %v5442_v30, %v7337_v20  ;;  %v5478_v47 = vadd.f32 %v5442_v30, %v2967_v24  ;;  %v2774_v30 = vcombine.high %v8213_v36, %v8213_v36 }
0x274b   :  { %5460 = vrot.lane.b32.xlu0 %v5459_v37, %s7162_s10  ;;  %v6445_v40 = vmul.f32 -1.442695, %v5445_v33 }
0x274c   :  { %5493 = vrot.lane.b32.xlu1 %v5492_v31, %s7162_s10  ;;  %v6446_v42 = vmul.f32 -1.442695, %v5478_v47 }
0x274d   :  { %7103 = vpow2.f32 %v6445_v40 }
0x274e   :  { %7105 = vpow2.f32 %v6446_v42 }
0x2757   :  { %v7104_v45 = vpop.eup %7103 }
0x2758   :  { %v7106_v29 = vpop.eup %7105  ;;  %v5449_v44 = vadd.f32 1.0, %v7104_v45 }
0x2759   :  { %v5482_v46 = vadd.f32 1.0, %v7106_v29 }
0x275a   :  { %7107 = vrcp.f32 %v5449_v44 }
0x275b   :  { %7109 = vrcp.f32 %v5482_v46 }
0x2764   :  { %v7108_v48 = vpop.eup %7107 }
0x2765   :  { %v7110_v52 = vpop.eup %7109  ;;  %v5470_v34 = vsub.f32 1.0, %v7108_v48  ;;  %v5476_v3 = vmul.f32 %v7108_v48, %v8169_v12 }
0x2766   :  { %v5503_v60 = vsub.f32 1.0, %v7110_v52  ;;  %v5509_v57 = vmul.f32 %v7110_v52, %v8171_v14 }
0x27bd   :  { %v5461_v35 = vpop.permute.xlu0 %5460 }
0x27be   :  { %v5494_v54 = vpop.permute.xlu1 %5493  ;;  %v5463_v41 = vmul.f32 %v7108_v48, %v5461_v35 }
0x27bf   :  { %v5496_v55 = vmul.f32 %v7110_v52, %v5494_v54 }
0x27c0   :  { %5465 = vrot.lane.b32.xlu0 %v5463_v41, %s7163_s1  ;;  %v6459_v41 = vld [vmem:[%s8398_s19 + $0xe] sm:$0x3] }
0x27c1   :  { %5498 = vrot.lane.b32.xlu1 %v5496_v55, %s7163_s1  ;;  %v5981_v55 = vld [vmem:[%s8399_s20] sm:$0x3] }
0x2832   :  { %v5466_v43 = vpop.permute.xlu0 %5465 }
0x2833   :  { %v5499_v53 = vpop.permute.xlu1 %5498  ;;  %v5468_v59 = vadd.f32 %v5466_v43, %v8213_v36 }
0x2834   :  { %v5501_v63 = vadd.f32 %v5499_v53, %v2967_v24 }
0x2835   :  { %7111 = vtanh.f32 %v5468_v59 }
0x2836   :  { %7113 = vtanh.f32 %v5501_v63 }
0x283f   :  { %v7112_v2 = vpop.eup %7111 }
0x2840   :  { %v7114_v4 = vpop.eup %7113  ;;  %5472 = vrot.lane.b32.xlu0 %v7112_v2, %s7164_s7 }
0x2841   :  { %5505 = vrot.lane.b32.xlu1 %v7114_v4, %s7164_s7 }
0x28b2   :  { %v5473_v5 = vpop.permute.xlu0 %5472 }
0x28b3   :  { %v5506_v58 = vpop.permute.xlu1 %5505  ;;  %v5475_v6 = vmul.f32 %v5473_v5, %v5470_v34 }
0x28b4   :  { %v5508_v50 = vmul.f32 %v5506_v58, %v5503_v60 }
0x28b5   :  { %v8235_v7 = vadd.f32 %v5476_v3, %v5475_v6 }
0x28b6   :  { %v8237_v8 = vadd.f32 %v5509_v57, %v5508_v50  ;;  %v6077_v57 = vld [vmem:[%s8401_s22] sm:$0xff]  ;;  %v6078_v50 = vld [vmem:[%s8401_s22 + $0x8] sm:$0xff] }
0x28b7   :  { %v5520_v9 = vrot.slane %v8235_v7, %v7337_v20 }
0x28b8   :  { %v5608_v10 = vrot.slane %v8237_v8, %v7337_v20 }
0x28b9   :  { %5521 = vrot.lane.b32.xlu0 %v5520_v9, %s7164_s7 }
0x28ba   :  { %5609 = vrot.lane.b32.xlu1 %v5608_v10, %s7164_s7  ;;  %v6080_v10 = vld [vmem:[%s8401_s22 + $0x18] sm:$0xff] }
0x292b   :  { %v5522_v11 = vpop.permute.xlu0 %5521 }
0x292c   :  { %v5610_v62 = vpop.permute.xlu1 %5609  ;;  %6844 = vmatmul.mubr.msk.f32.vlgmr.msra.gmra.mrb[46].mxu0 %vm408_vm5, %v5522_v11 }
0x292d   :  { %6849 = vmatmul.mubr.msk.f32.vlgmr.msra.gmra.mrb[46].mxu1 %vm408_vm5, %v5610_v62  ;;  %6852 = vmatpush3.msk.msra.mxu0 %vm412_vm2, %v7131_v56  ;;  %v6082_v56 = vld [vmem:[%s8401_s22 + $0x28] sm:$0xff] }
0x292e   :  { %6857 = vmatpush3.msk.msra.mxu1 %vm412_vm2, %v7132_v0  ;;  %6853 = vmatprep.mubr.msk.f32.mxu0 %vm7161_vm3, %v7160_v13 }
0x292f   :  { %6858 = vmatprep.mubr.msk.f32.mxu1 %vm7161_vm3, %v7160_v13  ;;  %6861 = vmatprep.subr.mxu0 %v7160_v13 }
0x2930   :  { %6854 = vmatmul.mubr.msk.f32.vlgmr.msra.gmra.mrb[48].mxu0 %vm408_vm5, %v5522_v11  ;;  %6866 = vmatprep.subr.mxu1 %v7160_v13 }
0x2931   :  { %6859 = vmatmul.mubr.msk.f32.vlgmr.msra.gmra.mrb[48].mxu1 %vm408_vm5, %v5610_v62  ;;  %6863 = vmatprep.mubr.msk.f32.mxu0 %vm7161_vm3, %v7160_v13  ;;  %v6081_v62 = vld [vmem:[%s8401_s22 + $0x20] sm:$0xff] }
0x2932   :  { %6868 = vmatprep.mubr.msk.f32.mxu1 %vm7161_vm3, %v7160_v13  ;;  %6862 = vmatpush3.msk.msra.mxu0 %vm412_vm2, %v6459_v41  ;;  %v6912_v0 = vpack.c.bf16 %v6082_v56, %v6081_v62 }
0x2933   :  { %6867 = vmatpush3.msk.msra.mxu1 %vm412_vm2, %v5981_v55 }
0x29ff   :  { %v5594_v12 = vpop.f32.mrb[46].mxu0 }
0x2a00   :  { %v5598_v14 = vadd.f32 %v5594_v12, %v8198_v25  ;;  %v5682_v15 = vpop.f32.mrb[46].mxu1  ;;  %v6845_v16 = vpop.f32.mrb[47].mxu0  ;;  %v6083_v12 = vld [vmem:[%s8401_s22 + $0x30] sm:$0x3] }
0x2a01   :  { %v6850_v17 = vpop.f32.mrb[47].mxu1  ;;  %v6171_v16 = vld [vmem:[%s8403_s24 + $0x10] sm:$0xff] }
0x2a02   :  { %v8268_v61 = vadd.f32 %v5682_v15, %v5598_v14  ;;  %v6169_v14 = vld [vmem:[%s8403_s24] sm:$0xff]  ;;  %v6170_v15 = vld [vmem:[%s8403_s24 + $0x8] sm:$0xff] }
0x2a03   :  { %v5753_v51 = vpop.f32.mrb[48].mxu0  ;;  %v6915_v17 = vpack.c.bf16 %v6170_v15, %v6169_v14 }
0x2a04   :  { %v5754_v18 = vadd.f32 %v7133_v39, %v5753_v51  ;;  %v5823_v22 = vpop.f32.mrb[48].mxu1  ;;  %v6855_v23 = vpop.f32.mrb[49].mxu0  ;;  %v6172_v51 = vld [vmem:[%s8403_s24 + $0x18] sm:$0xff] }
0x2a05   :  { %v5824_v21 = vadd.f32 %v7134_v19, %v5823_v22  ;;  %v6860_v26 = vpop.f32.mrb[49].mxu1  ;;  %v6918_v39 = vpack.c.bf16 %v6172_v51, %v6171_v16 }
0x2a06   :  { %v5841_v25 = vrot.slane %v5754_v18, %v7337_v20  ;;  %v5827_v28 = vadd.f32 %v5754_v18, %v2774_v30 }
0x2a07   :  { %v5874_v27 = vrot.slane %v5824_v21, %v7337_v20  ;;  %v5860_v37 = vadd.f32 %v5824_v21, %v8210_v38  ;;  %v6464_v21 = vld [vmem:[%s8400_s21] ss:$0 sm:$0xff] }
0x2a08   :  { %5842 = vrot.lane.b32.xlu0 %v5841_v25, %s7162_s10  ;;  %v6457_v31 = vmul.f32 -1.442695, %v5827_v28  ;;  %v6173_v28 = vld [vmem:[%s8403_s24 + $0x20] sm:$0xff] }
0x2a09   :  { %5875 = vrot.lane.b32.xlu1 %v5874_v27, %s7162_s10  ;;  %v6458_v32 = vmul.f32 -1.442695, %v5860_v37 }
0x2a0a   :  { %7115 = vpow2.f32 %v6457_v31  ;;  %v6175_v31 = vld [vmem:[%s8403_s24 + $0x30] sm:$0x3] }
0x2a0b   :  { %7117 = vpow2.f32 %v6458_v32  ;;  %v6465_v32 = vld [vmem:[%s8402_s23] ss:$0 sm:$0xff]  ;;  %s7166_s23 = smov [#allocation4]  }
0x2a14   :  { %v7116_v24 = vpop.eup %7115 }
0x2a15   :  { %v7118_v33 = vpop.eup %7117  ;;  %v5831_v47 = vadd.f32 1.0, %v7116_v24 }
0x2a16   :  { %v5864_v40 = vadd.f32 1.0, %v7118_v33 }
0x2a17   :  { %7119 = vrcp.f32 %v5831_v47 }
0x2a18   :  { %7121 = vrcp.f32 %v5864_v40 }
0x2a21   :  { %v7120_v42 = vpop.eup %7119 }
0x2a22   :  { %v7122_v29 = vpop.eup %7121  ;;  %v5852_v59 = vsub.f32 1.0, %v7120_v42  ;;  %v5858_v2 = vmul.f32 %v7120_v42, %v8235_v7  ;;  %v6906_v7 = vpack.c.bf16 %v6078_v50, %v6077_v57 }
0x2a23   :  { %v5885_v63 = vsub.f32 1.0, %v7122_v29  ;;  %v5891_v34 = vmul.f32 %v7122_v29, %v8237_v8 }
0x2a7a   :  { %v5843_v45 = vpop.permute.xlu0 %5842 }
0x2a7b   :  { %v5876_v44 = vpop.permute.xlu1 %5875  ;;  %v5845_v46 = vmul.f32 %v7120_v42, %v5843_v45  ;;  %v6468_v42 = vld [vmem:[%s8404_s25] ss:$0 sm:$0xff] }
0x2a7c   :  { %v5878_v48 = vmul.f32 %v7122_v29, %v5876_v44 }
0x2a7d   :  { %5847 = vrot.lane.b32.xlu0 %v5845_v46, %s7163_s1 }
0x2a7e   :  { %5880 = vrot.lane.b32.xlu1 %v5878_v48, %s7163_s1 }
0x2aef   :  { %v5848_v36 = vpop.permute.xlu0 %5847 }
0x2af0   :  { %v5881_v35 = vpop.permute.xlu1 %5880  ;;  %v5850_v52 = vadd.f32 %v5848_v36, %v2774_v30 }
0x2af1   :  { %v5883_v54 = vadd.f32 %v5881_v35, %v8210_v38  ;;  %v7165_v38 = vmov 0.0|0.0  }
0x2af2   :  { %7123 = vtanh.f32 %v5850_v52  ;;  %6905 = vmatprep.subr.bf16.mxu0 %v7165_v38  ;;  %6914 = vmatprep.subr.bf16.mxu1 %v7165_v38 }
0x2af3   :  { %7125 = vtanh.f32 %v5883_v54 }
0x2afc   :  { %v7124_v43 = vpop.eup %7123 }
0x2afd   :  { %v7126_v53 = vpop.eup %7125  ;;  %5854 = vrot.lane.b32.xlu0 %v7124_v43, %s7164_s7 }
0x2afe   :  { %5887 = vrot.lane.b32.xlu1 %v7126_v53, %s7164_s7 }
0x2b6f   :  { %v5855_v49 = vpop.permute.xlu0 %5854 }
0x2b70   :  { %v5888_v1 = vpop.permute.xlu1 %5887  ;;  %v5857_v4 = vmul.f32 %v5855_v49, %v5852_v59 }
0x2b71   :  { %v5890_v60 = vmul.f32 %v5888_v1, %v5885_v63 }
0x2b72   :  { %v5859_v5 = vadd.f32 %v5858_v2, %v5857_v4 }
0x2b73   :  { %v5892_v58 = vadd.f32 %v5891_v34, %v5890_v60 }
0x2b74   :  { %v5902_v3 = vrot.slane %v5859_v5, %v7337_v20 }
0x2b75   :  { %v5989_v6 = vrot.slane %v5892_v58, %v7337_v20  ;;  %v6079_v20 = vld [vmem:[%s8401_s22 + $0x10] sm:$0xff] }
0x2b76   :  { %5903 = vrot.lane.b32.xlu0 %v5902_v3, %s7164_s7  ;;  %v6909_v11 = vpack.c.bf16 %v6080_v10, %v6079_v20 }
0x2b77   :  { %5990 = vrot.lane.b32.xlu1 %v5989_v6, %s7164_s7 }
0x2be8   :  { %v5904_v8 = vpop.permute.xlu0 %5903 }
0x2be9   :  { %v5991_v9 = vpop.permute.xlu1 %5990  ;;  %6864 = vmatmul.mubr.msk.f32.vlgmr.msra.gmra.mrb[50].mxu0 %vm408_vm5, %v5904_v8 }
0x2bea   :  { %6869 = vmatmul.mubr.msk.f32.vlgmr.msra.gmra.mrb[50].mxu1 %vm408_vm5, %v5991_v9  ;;  %6907 = vmatpush3.bf16.msra.mxu0 %v6906_v7 }
0x2beb   :  { %6908 = vmatprep.subr.bf16.mxu0 %v7165_v38  ;;  %6885 = vmatprep.mubr.msk.f32.mxu0 %vm7161_vm3, %v7160_v13 }
0x2bec   :  { %6902 = vmatprep.mubr.msk.f32.mxu1 %vm7161_vm3, %v7160_v13  ;;  %6916 = vmatpush3.bf16.msra.mxu1 %v6915_v17 }
0x2bed   :  { %6917 = vmatprep.subr.bf16.mxu1 %v7165_v38 }
0x2bee   :  { %6910 = vmatpush3.bf16.msra.mxu0 %v6909_v11 }
0x2bef   :  { %6911 = vmatprep.subr.bf16.mxu0 %v7165_v38 }
0x2bf0   :  { %6919 = vmatpush3.bf16.msra.mxu1 %v6918_v39 }
0x2bf1   :  { %6920 = vmatprep.subr.bf16.mxu1 %v7165_v38 }
0x2bf2   :  { %6913 = vmatpush3.bf16.msra.mxu0 %v6912_v0 }
0x2bf3   :  { %6883 = vmatprep.subr.mxu0 %v7160_v13 }
0x2bf6   :  { %6884 = vmatpush3.msk.msra.mxu0 %vm412_vm2, %v6083_v12 }
0x2cbc   :  { %v5976_v18 = vpop.f32.mrb[50].mxu0 }
0x2cbd   :  { %v5980_v22 = vadd.f32 %v5976_v18, %v8268_v61  ;;  %v6063_v23 = vpop.f32.mrb[50].mxu1  ;;  %v6865_v19 = vpop.f32.mrb[51].mxu0  ;;  %v6174_v61 = vld [vmem:[%s8403_s24 + $0x28] sm:$0xff]  ;;  %s6278_s24 = sshll.u32 %s7166_s23, 4  ;;  %s6279_s24 = int_to_ptr.vmem [resolvable:$true] %s6278_s24 }
0x2cbe   :  { %v6870_v26 = vpop.f32.mrb[51].mxu1  ;;  %v6921_v37 = vpack.c.bf16 %v6174_v61, %v6173_v28  ;;  %s7135_s25 = scalar_lea.vmem %s6279_s24, 32  ;;  %p7140_p1 = scmp.lt.s32.totalorder %s6279_s24, %s6279_s24 }
0x2cbf   :  { %v6067_v25 = vadd.f32 %v6063_v23, %v5980_v22  ;;  %p7136_p0 = scmp.ne.s32.totalorder %s6279_s24, %s7135_s25  ;;  %p7141_p2 = scmp.lt.s32.totalorder %s7135_s25, %s7135_s25 }
0x2cc0   :  { %6922 = vmatpush3.bf16.msra.mxu1 %v6921_v37 }
0x2cc1   :  { %v6075_v27 = vadd.f32 %v6464_v21, %v6067_v25  ;;  %6900 = vmatprep.subr.mxu1 %v7160_v13  ;;  %p7142_p3 = por %p7141_p2, %p7140_p1 }
0x2cc3   :  { %v6076_v30 = vmax.f32 %v6075_v27, 0.0  ;;  %p7143_p4 = pnand %p7142_p3, %p7136_p0 }
0x2cc4   :  { %6901 = vmatpush3.msk.msra.mxu1 %vm412_vm2, %v6175_v31 }
0x2cc5   :  { %6886 = vmatmul.mubr.msk.f32.vlgmr.msra.gmra.mrb[52].mxu0 %vm6091_vm6, %v6076_v30 }
0x2d98   :  { %v6164_v24 = vpop.f32.mrb[52].mxu0 }
0x2d99   :  { %v6165_v33 = vadd.f32 %v6465_v32, %v6164_v24  ;;  %v6887_v47 = vpop.f32.mrb[53].mxu0 }
0x2d9b   :  { %v6168_v40 = vmax.f32 %v6165_v33, 0.0 }
0x2d9d   :  { %6903 = vmatmul.mubr.msk.f32.vlgmr.msra.gmra.mrb[52].mxu1 %vm6091_vm6, %v6168_v40 }
0x2e70   :  { %v6255_v13 = vpop.f32.mrb[52].mxu1 }
0x2e71   :  { %v6256_v45 = vadd.f32 %v6468_v42, %v6255_v13  ;;  %v6904_v29 = vpop.f32.mrb[53].mxu1 }
0x2e73   :  { %v6260_v44 = vsel %vm6259_vm7, %v6256_v45, -inf }
0x2e74   :  { %6261 = vmax.xlane.f32.xlu0 %v6260_v44 }
0x2f01   :  { %v6262_v46 = vpop.xlane.xlu0 %6261 }
0x2f02   :  { %v6263_v48 = vsub.f32 %v6256_v45, %v6262_v46 }
0x2f04   :  { %v6264_v36 = vmul.f32 1.442695, %v6263_v48 }
0x2f06   :  { %7127 = vpow2.f32 %v6264_v36 }
0x2f10   :  { %v7128_v35 = vpop.eup %7127 }
0x2f11   :  { %v6266_v52 = vsel %vm6259_vm7, %v7128_v35, 0.0 }
0x2f12   :  { %6267 = vadd.xlane.f32.xlu1 %v6266_v52 }
0x2f9f   :  { %v6268_v54 = vpop.xlane.xlu1 %6267 }
0x2fa0   :  { %7129 = vrcp.f32 %v6268_v54 }
0x2faa   :  { %v7130_v41 = vpop.eup %7129 }
0x2fab   :  { %v6270_v55 = vmul.f32 %v7130_v41, %v7128_v35 }
0x2fad   :  { %6271 = vst.msk [vmem:[#allocation4] sm:$0x3] %vm6259_vm7, %v6270_v55 }
0x2fae   :  { %7146 = shalt.err (!%p7143_p4)
}
0x2faf   :  { %s7147_s2 = scalar_lea.hbm %s8405_s26, 32 }
0x2fb0   :  { %p7148_p5 = scmp.ne.s32.totalorder %s8405_s26, %s7147_s2  ;;  %p7151_p6 = scmp.lt.u32.totalorder %s7147_s2, %s8405_s26 }
0x2fb2   :  { %p7153_p7 = pnand %p7151_p6, %p7148_p5 }
0x2fb4   :  { %7156 = shalt.err (!%p7153_p7)
}
0x2fb5   :  { %6281 = dma.vmem_to_hbm [thread:$0]  %s6279_s24, 32, %s8405_s26, [#allocation5]  }
0x2fb6   :  { %7157 = dma.done.wait [#allocation5], 32  }
0x2fb7   :  { %7158 = vsyncadd [#allocation5], 4294967264 }
0x2fb8   :  { %6285 = vsyncpa [#allocation5], 1 }

</bundles_post_ra>
